<compile_context>
chip_gen: v7x
topology: tpu7x:2x2x1
jax: 0.10.0
libtpu: 0.0.40
codegen_flags: <defaults>
</compile_context>

<pallas_src>
import functools

import jax
import jax.numpy as jnp
from jax.experimental import pallas as pl
from jax.experimental.pallas import tpu as pltpu


# ----------------------------- Pallas kernels -----------------------------

def _gmm_kernel(a_ref, b_ref, bias_ref, o_ref, *, relu_out):
    """out = maybe_relu(a @ b + bias); a/b bf16, accumulate + elementwise f32."""
    acc = jnp.dot(a_ref[...], b_ref[...], preferred_element_type=jnp.float32)
    acc = acc + bias_ref[...]
    if relu_out:
        acc = jnp.maximum(acc, 0.0)
    o_ref[...] = acc


def _gmm(a, b, bias, relu_out=False):
    """Grouped matmul: (G,M,K)bf16 @ (G,K,N)bf16 + (G,1,N)f32 -> (G,M,N)f32."""
    G, M, K = a.shape
    N = b.shape[-1]
    TM = M if M <= 512 else 256
    Mp = ((M + TM - 1) // TM) * TM
    if Mp != M:
        a = jnp.pad(a, ((0, 0), (0, Mp - M), (0, 0)))
    out = pl.pallas_call(
        functools.partial(_gmm_kernel, relu_out=relu_out),
        grid=(G, Mp // TM),
        in_specs=[pl.BlockSpec((None, TM, K), lambda g, i: (g, i, 0)),
                  pl.BlockSpec((None, K, N), lambda g, i: (g, 0, 0)),
                  pl.BlockSpec((None, 1, N), lambda g, i: (g, 0, 0))],
        out_specs=pl.BlockSpec((None, TM, N), lambda g, i: (g, i, 0)),
        out_shape=jax.ShapeDtypeStruct((G, Mp, N), jnp.float32),
        compiler_params=pltpu.CompilerParams(
            dimension_semantics=("parallel", "parallel")),
    )(a, b, bias)
    if Mp != M:
        out = out[:, :M]
    return out


def _resblock_kernel(a_ref, w1_ref, b1_ref, w2_ref, b2_ref, x_ref, o_ref,
                     *, final_relu):
    """Fused ResBlock body: two back-to-back MXU dots, intermediate in VMEM."""
    h = jnp.dot(a_ref[...], w1_ref[...],
                preferred_element_type=jnp.float32) + b1_ref[...]
    h = jnp.maximum(h, 0.0)
    out = jnp.dot(h.astype(jnp.bfloat16), w2_ref[...],
                  preferred_element_type=jnp.float32)
    out = out + b2_ref[...] + x_ref[...]
    if final_relu:
        out = jnp.maximum(out, 0.0)
    o_ref[...] = out


def _proj_quantize_kernel(a_ref, w_ref, b_ref, e_ref, et_ref, q_ref, diff_ref):
    """Fused 1x1-conv projection + vector quantization (all in VMEM)."""
    x = jnp.dot(a_ref[...], w_ref[...],
                preferred_element_type=jnp.float32) + b_ref[...]   # (M, D) f32
    e = e_ref[...]                                                 # (D, NE) f32
    dist = (jnp.sum(x * x, axis=1, keepdims=True)
            - 2.0 * jnp.dot(x, e, preferred_element_type=jnp.float32)
            + jnp.sum(e * e, axis=0, keepdims=True))               # (M, NE)
    n_embed = dist.shape[1]
    iota = jax.lax.broadcasted_iota(jnp.int32, dist.shape, 1)
    minv = jnp.min(dist, axis=1, keepdims=True)
    # first index attaining the minimum distance (== argmin, ties -> first)
    idx = jnp.min(jnp.where(dist == minv, iota, n_embed), axis=1, keepdims=True)
    onehot = (iota == idx).astype(jnp.float32)
    q = jnp.dot(onehot, et_ref[...], preferred_element_type=jnp.float32)
    q_ref[...] = q
    d = (q - x) ** 2
    total = jnp.sum(jnp.sum(d, axis=1, keepdims=True), axis=0, keepdims=True)
    diff_ref[...] = total / float(d.shape[0] * d.shape[1])


# ---------------------------- layer wrappers -------------------------------

def _im2col(x, kh, kw, stride, pad):
    """x: (G, B, H, W, C) -> (G, B*Ho*Wo, kh*kw*C) patches (tap order i, j, c)."""
    if pad:
        x = jnp.pad(x, ((0, 0), (0, 0), (pad, pad), (pad, pad), (0, 0)))
    G, B, H, W, C = x.shape
    Ho = (H - kh) // stride + 1
    Wo = (W - kw) // stride + 1
    cols = [x[:, :, i:i + stride * Ho:stride, j:j + stride * Wo:stride, :]
            for i in range(kh) for j in range(kw)]
    patches = jnp.concatenate(cols, axis=-1)
    return patches.reshape(G, B * Ho * Wo, kh * kw * C), (B, Ho, Wo)


def conv2d(x, layer, k, stride=1, pad=0, relu_out=False):
    """x: (G,B,H,W,Cin) f32; layer: {'w': (G,k*k*Cin,O) bf16, 'b': (G,1,O) f32}."""
    G = x.shape[0]
    a, (B, Ho, Wo) = _im2col(x, k, k, stride, pad)
    out = _gmm(a.astype(jnp.bfloat16), layer["w"], layer["b"], relu_out=relu_out)
    return out.reshape(G, B, Ho, Wo, layer["w"].shape[-1])


def conv_transpose2d(x, layer, relu_out=False):
    """Sub-pixel ConvTranspose2d (kernel 4, stride 2, pad 1).

    One dense matmul with a (4*C, 4*O) weight produces all 4 output phases;
    the wrapper interleaves them into the 2H x 2W output.
    """
    G, B, H, W, C = x.shape
    O = layer["w"].shape[-1] // 4
    xp = jnp.pad(x, ((0, 0), (0, 0), (1, 1), (1, 1), (0, 0)))
    cols = [xp[:, :, ty:ty + H + 1, tx:tx + W + 1, :]
            for ty in (0, 1) for tx in (0, 1)]
    a = jnp.concatenate(cols, axis=-1).reshape(G, B * (H + 1) * (W + 1), 4 * C)
    out = _gmm(a.astype(jnp.bfloat16), layer["w"], layer["b"], relu_out=relu_out)
    out = out.reshape(G, B, H + 1, W + 1, 4, O)
    ph = jnp.stack([out[:, :, r:r + H, s:s + W, 2 * r + s, :]
                    for r in (0, 1) for s in (0, 1)], axis=4)
    ph = ph.reshape(G, B, H, W, 2, 2, O).transpose(0, 1, 2, 4, 3, 5, 6)
    return ph.reshape(G, B, 2 * H, 2 * W, O)


def resblock(x, rp, final_relu=False):
    """Fused ResBlock: ReLU -> Conv3x3(C->R) -> ReLU -> Conv1x1(R->C) -> +x [-> ReLU]."""
    G, B, H, W, C = x.shape
    M = B * H * W
    a, _ = _im2col(x, 3, 3, 1, 1)
    a = jnp.maximum(a, 0.0).astype(jnp.bfloat16)   # pre-activation ReLU in f32
    w1, b1 = rp["c1"]["w"], rp["c1"]["b"]          # (G, 9C, R), (G, 1, R)
    w2, b2 = rp["c2"]["w"], rp["c2"]["b"]          # (G, R, C), (G, 1, C)
    R = w1.shape[-1]
    out = pl.pallas_call(
        functools.partial(_resblock_kernel, final_relu=final_relu),
        grid=(G,),
        in_specs=[pl.BlockSpec((None, M, 9 * C), lambda g: (g, 0, 0)),
                  pl.BlockSpec((None, 9 * C, R), lambda g: (g, 0, 0)),
                  pl.BlockSpec((None, 1, R), lambda g: (g, 0, 0)),
                  pl.BlockSpec((None, R, C), lambda g: (g, 0, 0)),
                  pl.BlockSpec((None, 1, C), lambda g: (g, 0, 0)),
                  pl.BlockSpec((None, M, C), lambda g: (g, 0, 0))],
        out_specs=pl.BlockSpec((None, M, C), lambda g: (g, 0, 0)),
        out_shape=jax.ShapeDtypeStruct((G, M, C), jnp.float32),
        compiler_params=pltpu.CompilerParams(
            dimension_semantics=("parallel",)),
    )(a, w1, b1, w2, b2, x.reshape(G, M, C))
    return out.reshape(G, B, H, W, C)


def proj_quantize(x, layer, emb):
    """Fused quantize_conv (1x1) + Quantize.

    x: (G,B,H,W,Cin) f32; layer: {'w': (G,Cin,D) bf16, 'b': (G,1,D) f32};
    emb: {'e': (G,D,NE), 'et': (G,NE,D)} f32 -> (quantized (G,B,H,W,D), diff (G,)).
    """
    G, B, H, W, Cin = x.shape
    M = B * H * W
    D = layer["w"].shape[-1]
    NE = emb["e"].shape[-1]
    a = x.reshape(G, M, Cin).astype(jnp.bfloat16)
    q, diff = pl.pallas_call(
        _proj_quantize_kernel,
        grid=(G,),
        in_specs=[pl.BlockSpec((None, M, Cin), lambda g: (g, 0, 0)),
                  pl.BlockSpec((None, Cin, D), lambda g: (g, 0, 0)),
                  pl.BlockSpec((None, 1, D), lambda g: (g, 0, 0)),
                  pl.BlockSpec((None, D, NE), lambda g: (g, 0, 0)),
                  pl.BlockSpec((None, NE, D), lambda g: (g, 0, 0))],
        out_specs=(pl.BlockSpec((None, M, D), lambda g: (g, 0, 0)),
                   pl.BlockSpec((None, 1, 1), lambda g: (g, 0, 0))),
        out_shape=(jax.ShapeDtypeStruct((G, M, D), jnp.float32),
                   jax.ShapeDtypeStruct((G, 1, 1), jnp.float32)),
        compiler_params=pltpu.CompilerParams(
            dimension_semantics=("parallel",)),
    )(a, layer["w"], layer["b"], emb["e"], emb["et"])
    return q.reshape(G, B, H, W, D), diff.reshape(G)


# --------------------------- model building blocks -------------------------

def encoder(x, p, stride):
    if stride == 4:
        x = conv2d(x, p["c1"], 4, stride=2, pad=1, relu_out=True)
        x = conv2d(x, p["c2"], 4, stride=2, pad=1, relu_out=True)
        x = conv2d(x, p["c3"], 3, stride=1, pad=1)
    else:  # stride == 2
        x = conv2d(x, p["c1"], 4, stride=2, pad=1, relu_out=True)
        x = conv2d(x, p["c2"], 3, stride=1, pad=1)
    n = len(p["res"])
    for i, rp in enumerate(p["res"]):
        x = resblock(x, rp, final_relu=(i == n - 1))  # trailing nn.ReLU fused
    return x


def decoder(x, p, stride):
    x = conv2d(x, p["cin"], 3, stride=1, pad=1)
    n = len(p["res"])
    for i, rp in enumerate(p["res"]):
        x = resblock(x, rp, final_relu=(i == n - 1))  # trailing nn.ReLU fused
    if stride == 4:
        x = conv_transpose2d(x, p["ct1"], relu_out=True)
        x = conv_transpose2d(x, p["ct2"])
    else:
        x = conv_transpose2d(x, p["ct1"])
    return x


def unif_model_forward(sp, mnist_nchw, svhn_nchw, only_top=False,
                       only_bot=False):
    mnist = jnp.transpose(mnist_nchw, (0, 2, 3, 1))
    svhn = jnp.transpose(svhn_nchw, (0, 2, 3, 1))

    # Group mnist/svhn as a leading G=2 axis (mnist padded to 3 channels; the
    # matching weight input-channels were zero-padded in stack_params).
    cpad = svhn.shape[-1] - mnist.shape[-1]
    mnist3 = jnp.pad(mnist, ((0, 0), (0, 0), (0, 0), (0, cpad)))
    x_ms = jnp.stack([mnist3, svhn], axis=0)                # (2, B, 16, 16, 3)

    enc_ms = encoder(x_ms, sp["enc_ms"], 4)                 # (2, B, 4, 4, 32)
    enc_m, enc_s = enc_ms[0], enc_ms[1]

    # ---- encode ----
    enc_b = jnp.concatenate([enc_m, enc_s], axis=-1)[None]  # (1, B, 4, 4, 64)
    enc_t = encoder(enc_b, sp["enc_t"], 2)                  # (1, B, 2, 2, 32)
    quant_t, diff_t = proj_quantize(enc_t, sp["q_conv_t"], sp["embed_t"])
    dec_t = decoder(quant_t, sp["dec_t"], 2)                # (1, B, 4, 4, 16)

    cat_b = jnp.stack(
        [jnp.concatenate([dec_t[0], enc_m], axis=-1),
         jnp.concatenate([dec_t[0], enc_s], axis=-1)], axis=0)  # (2,B,4,4,48)
    quant_b, diff_b = proj_quantize(cat_b, sp["q_conv_b"], sp["embed_b"])

    diff = (jnp.sum(diff_t) + jnp.sum(diff_b)).reshape(1)

    # ---- decode ----
    up_t = conv_transpose2d(quant_t, sp["upsample_t"])      # (1, B, 4, 4, 16)
    if only_bot:
        up_t = jnp.zeros_like(up_t)
    if only_top:
        quant_b = jnp.zeros_like(quant_b)
    quant_cat = jnp.concatenate(
        [jnp.broadcast_to(up_t, (2,) + up_t.shape[1:]), quant_b], axis=-1)

    dec_ms = decoder(quant_cat, sp["dec_ms"], 4)            # (2, B, 16, 16, 3)
    dec_m = jnp.transpose(dec_ms[0][..., :1], (0, 3, 1, 2))
    dec_s = jnp.transpose(dec_ms[1], (0, 3, 1, 2))
    return dec_m, dec_s, diff


# ------------------ one-time weight repack (matmul-ready) -------------------

def _conv_wm(w, b):
    """PyTorch Conv2d weight (O,I,kh,kw) -> bf16 (kh*kw*I, O); bias -> f32 (1, O)."""
    O, I, kh, kw = w.shape
    wm = jnp.transpose(w, (2, 3, 1, 0)).reshape(kh * kw * I, O)
    return wm.astype(jnp.bfloat16), b.reshape(1, O).astype(jnp.float32)


def _convT_wm(w, b):
    """PyTorch ConvTranspose2d weight (I,O,4,4), stride 2, pad 1 ->
    sub-pixel matmul weight bf16 (4*I, 4*O) (phase-major columns) + bias (1, 4*O)."""
    I, O, kh, kw = w.shape
    assert kh == 4 and kw == 4
    cols = []
    for r in (0, 1):
        for s in (0, 1):
            taps = [w[:, :, 3 - r - 2 * ty, 3 - s - 2 * tx]
                    for ty in (0, 1) for tx in (0, 1)]        # each (I, O)
            cols.append(jnp.concatenate(taps, axis=0))        # (4*I, O)
    wm = jnp.concatenate(cols, axis=1)                        # (4*I, 4*O)
    bias = jnp.tile(b, 4).reshape(1, 4 * O)
    return wm.astype(jnp.bfloat16), bias.astype(jnp.float32)


def stack_params(p):
    """Repack per-module params into grouped, matmul-ready bf16 weight slabs."""

    def conv_g(pairs):
        wm, bs = zip(*[_conv_wm(w, b) for w, b in pairs])
        return {"w": jnp.stack(wm, 0), "b": jnp.stack(bs, 0)}

    def convT_g(pairs):
        wm, bs = zip(*[_convT_wm(w, b) for w, b in pairs])
        return {"w": jnp.stack(wm, 0), "b": jnp.stack(bs, 0)}

    def res_g(rps):
        return {"c1": conv_g([(rp["w1"], rp["b1"]) for rp in rps]),
                "c2": conv_g([(rp["w2"], rp["b2"]) for rp in rps])}

    def enc_g(branches, stride):
        out = {"c1": conv_g([(b["c1w"], b["c1b"]) for b in branches]),
               "c2": conv_g([(b["c2w"], b["c2b"]) for b in branches]),
               "res": [res_g([b["res"][i] for b in branches])
                       for i in range(len(branches[0]["res"]))]}
        if stride == 4:
            out["c3"] = conv_g([(b["c3w"], b["c3b"]) for b in branches])
        return out

    def dec_g(branches, stride):
        out = {"cin": conv_g([(b["cinw"], b["cinb"]) for b in branches]),
               "res": [res_g([b["res"][i] for b in branches])
                       for i in range(len(branches[0]["res"]))],
               "ct1": convT_g([(b["ct1w"], b["ct1b"]) for b in branches])}
        if stride == 4:
            out["ct2"] = convT_g([(b["ct2w"], b["ct2b"]) for b in branches])
        return out

    # mnist encoder first conv: pad its 1 input channel to svhn's 3 (zeros).
    em = dict(p["enc_mnist"])
    cin_pad = p["enc_svhn"]["c1w"].shape[1] - em["c1w"].shape[1]
    em["c1w"] = jnp.pad(em["c1w"], ((0, 0), (0, cin_pad), (0, 0), (0, 0)))

    # mnist decoder head: pad its 1 output channel to svhn's 3 (zeros).
    dm = dict(p["dec_mnist"])
    cout_pad = p["dec_svhn"]["ct2w"].shape[1] - dm["ct2w"].shape[1]
    dm["ct2w"] = jnp.pad(dm["ct2w"], ((0, 0), (0, cout_pad), (0, 0), (0, 0)))
    dm["ct2b"] = jnp.pad(dm["ct2b"], ((0, cout_pad),))

    return {
        "enc_ms": enc_g([em, p["enc_svhn"]], 4),
        "enc_t": enc_g([p["enc_t"]], 2),
        "q_conv_t": conv_g([(p["q_conv_t_w"], p["q_conv_t_b"])]),
        "embed_t": {"e": p["embed_t"][None].astype(jnp.float32),
                    "et": p["embed_t"].T[None].astype(jnp.float32)},
        "dec_t": dec_g([p["dec_t"]], 2),
        "q_conv_b": conv_g([(p["q_conv_bm_w"], p["q_conv_bm_b"]),
                            (p["q_conv_bs_w"], p["q_conv_bs_b"])]),
        "embed_b": {"e": jnp.stack([p["embed_bm"], p["embed_bs"]],
                                   0).astype(jnp.float32),
                    "et": jnp.stack([p["embed_bm"].T, p["embed_bs"].T],
                                    0).astype(jnp.float32)},
        "upsample_t": convT_g([(p["upsample_t_w"], p["upsample_t_b"])]),
        "dec_ms": dec_g([dm, p["dec_svhn"]], 4),
    }


# ------------------------- deterministic param init ------------------------

def init_params(key, in_channel=3, channel=32, n_res_block=2,
                n_res_channel=8, embed_dim=16, n_embed=64):
    keys = iter(jax.random.split(key, 512))

    def w(shape, scale=0.05):
        return scale * jax.random.normal(next(keys), shape, dtype=jnp.float32)

    def conv_p(o, i, k):
        return w((o, i, k, k)), w((o,), 0.01)

    def res_p():
        w1, b1 = conv_p(n_res_channel, channel, 3)
        w2, b2 = conv_p(channel, n_res_channel, 1)
        return {"w1": w1, "b1": b1, "w2": w2, "b2": b2}

    def enc_p(in_ch, stride):
        p = {}
        if stride == 4:
            p["c1w"], p["c1b"] = conv_p(channel // 2, in_ch, 4)
            p["c2w"], p["c2b"] = conv_p(channel, channel // 2, 4)
            p["c3w"], p["c3b"] = conv_p(channel, channel, 3)
        else:
            p["c1w"], p["c1b"] = conv_p(channel // 2, in_ch, 4)
            p["c2w"], p["c2b"] = conv_p(channel, channel // 2, 3)
        p["res"] = [res_p() for _ in range(n_res_block)]
        return p

    def dec_p(in_ch, out_ch, stride):
        p = {}
        p["cinw"], p["cinb"] = conv_p(channel, in_ch, 3)
        p["res"] = [res_p() for _ in range(n_res_block)]
        if stride == 4:
            p["ct1w"] = w((channel, channel // 2, 4, 4))
            p["ct1b"] = w((channel // 2,), 0.01)
            p["ct2w"] = w((channel // 2, out_ch, 4, 4))
            p["ct2b"] = w((out_ch,), 0.01)
        else:
            p["ct1w"] = w((channel, out_ch, 4, 4))
            p["ct1b"] = w((out_ch,), 0.01)
        return p

    return {
        "enc_mnist": enc_p(1, 4),
        "enc_svhn": enc_p(in_channel, 4),
        "enc_t": enc_p(2 * channel, 2),
        "q_conv_t_w": w((embed_dim, channel, 1, 1)),
        "q_conv_t_b": w((embed_dim,), 0.01),
        "embed_t": jax.random.normal(next(keys), (embed_dim, n_embed),
                                     jnp.float32),
        "dec_t": dec_p(embed_dim, embed_dim, 2),
        "q_conv_bm_w": w((embed_dim, embed_dim + channel, 1, 1)),
        "q_conv_bm_b": w((embed_dim,), 0.01),
        "embed_bm": jax.random.normal(next(keys), (embed_dim, n_embed),
                                      jnp.float32),
        "upsample_t_w": w((embed_dim, embed_dim, 4, 4)),
        "upsample_t_b": w((embed_dim,), 0.01),
        "q_conv_bs_w": w((embed_dim, embed_dim + channel, 1, 1)),
        "q_conv_bs_b": w((embed_dim,), 0.01),
        "embed_bs": jax.random.normal(next(keys), (embed_dim, n_embed),
                                      jnp.float32),
        "dec_mnist": dec_p(2 * embed_dim, 1, 4),
        "dec_svhn": dec_p(2 * embed_dim, in_channel, 4),
    }


# ----------------------------------- main -----------------------------------

if __name__ == "__main__":
    key = jax.random.PRNGKey(0)
    kp, km, ks = jax.random.split(key, 3)

    # Small, shape-consistent config: channel=32, n_res_block=2,
    # n_res_channel=8, embed_dim=16, n_embed=64; 16x16 images, batch=2.
    params = init_params(kp, in_channel=3, channel=32, n_res_block=2,
                         n_res_channel=8, embed_dim=16, n_embed=64)
    sp = stack_params(params)  # one-time repack into grouped bf16 weights

    mnist = jax.random.normal(km, (2, 1, 16, 16), jnp.float32)
    svhn = jax.random.normal(ks, (2, 3, 16, 16), jnp.float32)

    fwd = jax.jit(functools.partial(unif_model_forward,
                                    only_top=False, only_bot=False))
    dec_m, dec_s, diff = fwd(sp, mnist, svhn)
    jax.block_until_ready((dec_m, dec_s, diff))

    assert dec_m.shape == (2, 1, 16, 16), dec_m.shape
    assert dec_s.shape == (2, 3, 16, 16), dec_s.shape
    assert diff.shape == (1,), diff.shape
    # TODO(synk): EMA codebook updates from Quantize.forward (training-mode
    # buffer side effects) and the returned code indices are not reproduced;
    # forward outputs (dec_m, dec_s, diff) are unaffected.
    print("KERNEL_OK")
</pallas_src>

<mosaic_0001>
module attributes {stable_mosaic.version = 11 : i64} {
  func.func @_gmm_kernel(%arg0: i32, %arg1: i32, %arg2: memref<1x128x48xbf16, #tpu.memory_space<vmem>>, %arg3: memref<1x48x16xbf16, #tpu.memory_space<vmem>>, %arg4: memref<1x1x16xf32, #tpu.memory_space<vmem>>, %arg5: memref<1x128x16xf32, #tpu.memory_space<vmem>>) attributes {dimension_semantics = [#tpu.dimension_semantics<parallel>, #tpu.dimension_semantics<parallel>], iteration_bounds = array<i64: 2, 1>, scalar_prefetch = 0 : i64, scratch_operands = 0 : i64, tpu.core_type = #tpu.core_type<tc>, window_params = [{transform_indices = @transform_0, window_bounds = array<i64: 1, 128, 48>}, {transform_indices = @transform_1, window_bounds = array<i64: 1, 48, 16>}, {transform_indices = @transform_2, window_bounds = array<i64: 1, 1, 16>}, {transform_indices = @transform_3, window_bounds = array<i64: 1, 128, 16>}]} {
    %c0 = arith.constant 0 : index
    %c0_0 = arith.constant 0 : index
    %c0_1 = arith.constant 0 : index
    %0 = vector.load %arg2[%c0, %c0_0, %c0_1] : memref<1x128x48xbf16, #tpu.memory_space<vmem>>, vector<1x128x48xbf16>
    %1 = vector.shape_cast %0 : vector<1x128x48xbf16> to vector<128x48xbf16>
    %c0_2 = arith.constant 0 : index
    %c0_3 = arith.constant 0 : index
    %c0_4 = arith.constant 0 : index
    %2 = vector.load %arg3[%c0_2, %c0_3, %c0_4] : memref<1x48x16xbf16, #tpu.memory_space<vmem>>, vector<1x48x16xbf16>
    %3 = vector.shape_cast %2 : vector<1x48x16xbf16> to vector<48x16xbf16>
    %cst = arith.constant dense<0.000000e+00> : vector<128x16xf32>
    %4 = tpu.matmul %1, %3, %cst {dimension_numbers = #tpu.dot_dimension_numbers<[1], [0], [0], [1], [0, 0, 1, 1], [], []>} : vector<128x48xbf16>, vector<48x16xbf16>, vector<128x16xf32> -> vector<128x16xf32>
    %c0_5 = arith.constant 0 : index
    %c0_6 = arith.constant 0 : index
    %c0_7 = arith.constant 0 : index
    %5 = vector.load %arg4[%c0_5, %c0_6, %c0_7] : memref<1x1x16xf32, #tpu.memory_space<vmem>>, vector<1x1x16xf32>
    %6 = vector.shape_cast %5 : vector<1x1x16xf32> to vector<1x16xf32>
    %7 = vector.broadcast %6 : vector<1x16xf32> to vector<128x16xf32>
    %8 = arith.addf %4, %7 : vector<128x16xf32>
    %cst_8 = arith.constant 0.000000e+00 : f32
    %9 = vector.broadcast %cst_8 : f32 to vector<128x16xf32>
    %10 = arith.maximumf %8, %9 : vector<128x16xf32>
    %c0_9 = arith.constant 0 : index
    %c0_10 = arith.constant 0 : index
    %c0_11 = arith.constant 0 : index
    %11 = vector.load %arg5[%c0_9, %c0_10, %c0_11] : memref<1x128x16xf32, #tpu.memory_space<vmem>>, vector<1x128x16xf32>
    %12 = vector.shape_cast %11 : vector<1x128x16xf32> to vector<128x16xf32>
    %13 = vector.shape_cast %10 : vector<128x16xf32> to vector<1x128x16xf32>
    tpu.vector_store %arg5[%c0_9, %c0_10, %c0_11], %13 {strides = array<i32>} : memref<1x128x16xf32, #tpu.memory_space<vmem>>, vector<1x128x16xf32>,
    return
  }
  func.func @transform_0(%arg0: i32, %arg1: i32) -> (i32, i32, i32) {
    %c0_i32 = arith.constant 0 : i32
    %c0_i32_0 = arith.constant 0 : i32
    return %arg0, %arg1, %c0_i32 : i32, i32, i32
  }
  func.func @transform_1(%arg0: i32, %arg1: i32) -> (i32, i32, i32) {
    %c0_i32 = arith.constant 0 : i32
    %c0_i32_0 = arith.constant 0 : i32
    %c0_i32_1 = arith.constant 0 : i32
    return %arg0, %c0_i32, %c0_i32_0 : i32, i32, i32
  }
  func.func @transform_2(%arg0: i32, %arg1: i32) -> (i32, i32, i32) {
    %c0_i32 = arith.constant 0 : i32
    %c0_i32_0 = arith.constant 0 : i32
    %c0_i32_1 = arith.constant 0 : i32
    return %arg0, %c0_i32, %c0_i32_0 : i32, i32, i32
  }
  func.func @transform_3(%arg0: i32, %arg1: i32) -> (i32, i32, i32) {
    %c0_i32 = arith.constant 0 : i32
    %c0_i32_0 = arith.constant 0 : i32
    return %arg0, %arg1, %c0_i32 : i32, i32, i32
  }
}

module attributes {stable_mosaic.version = 11 : i64} {
  func.func @_gmm_kernel(%arg0: i32, %arg1: i32, %arg2: memref<1x32x256xbf16, #tpu.memory_space<vmem>>, %arg3: memref<1x256x32xbf16, #tpu.memory_space<vmem>>, %arg4: memref<1x1x32xf32, #tpu.memory_space<vmem>>, %arg5: memref<1x32x32xf32, #tpu.memory_space<vmem>>) attributes {dimension_semantics = [#tpu.dimension_semantics<parallel>, #tpu.dimension_semantics<parallel>], iteration_bounds = array<i64: 2, 1>, scalar_prefetch = 0 : i64, scratch_operands = 0 : i64, tpu.core_type = #tpu.core_type<tc>, window_params = [{transform_indices = @transform_0, window_bounds = array<i64: 1, 32, 256>}, {transform_indices = @transform_1, window_bounds = array<i64: 1, 256, 32>}, {transform_indices = @transform_2, window_bounds = array<i64: 1, 1, 32>}, {transform_indices = @transform_3, window_bounds = array<i64: 1, 32, 32>}]} {
    %c0 = arith.constant 0 : index
    %c0_0 = arith.constant 0 : index
    %c0_1 = arith.constant 0 : index
    %0 = vector.load %arg2[%c0, %c0_0, %c0_1] : memref<1x32x256xbf16, #tpu.memory_space<vmem>>, vector<1x32x256xbf16>
    %1 = vector.shape_cast %0 : vector<1x32x256xbf16> to vector<32x256xbf16>
    %c0_2 = arith.constant 0 : index
    %c0_3 = arith.constant 0 : index
    %c0_4 = arith.constant 0 : index
    %2 = vector.load %arg3[%c0_2, %c0_3, %c0_4] : memref<1x256x32xbf16, #tpu.memory_space<vmem>>, vector<1x256x32xbf16>
    %3 = vector.shape_cast %2 : vector<1x256x32xbf16> to vector<256x32xbf16>
    %cst = arith.constant dense<0.000000e+00> : vector<32x32xf32>
    %4 = tpu.matmul %1, %3, %cst {dimension_numbers = #tpu.dot_dimension_numbers<[1], [0], [0], [1], [0, 0, 1, 1], [], []>} : vector<32x256xbf16>, vector<256x32xbf16>, vector<32x32xf32> -> vector<32x32xf32>
    %c0_5 = arith.constant 0 : index
    %c0_6 = arith.constant 0 : index
    %c0_7 = arith.constant 0 : index
    %5 = vector.load %arg4[%c0_5, %c0_6, %c0_7] : memref<1x1x32xf32, #tpu.memory_space<vmem>>, vector<1x1x32xf32>
    %6 = vector.shape_cast %5 : vector<1x1x32xf32> to vector<1x32xf32>
    %7 = vector.broadcast %6 : vector<1x32xf32> to vector<32x32xf32>
    %8 = arith.addf %4, %7 : vector<32x32xf32>
    %cst_8 = arith.constant 0.000000e+00 : f32
    %9 = vector.broadcast %cst_8 : f32 to vector<32x32xf32>
    %10 = arith.maximumf %8, %9 : vector<32x32xf32>
    %c0_9 = arith.constant 0 : index
    %c0_10 = arith.constant 0 : index
    %c0_11 = arith.constant 0 : index
    %11 = vector.load %arg5[%c0_9, %c0_10, %c0_11] : memref<1x32x32xf32, #tpu.memory_space<vmem>>, vector<1x32x32xf32>
    %12 = vector.shape_cast %11 : vector<1x32x32xf32> to vector<32x32xf32>
    %13 = vector.shape_cast %10 : vector<32x32xf32> to vector<1x32x32xf32>
    tpu.vector_store %arg5[%c0_9, %c0_10, %c0_11], %13 {strides = array<i32>} : memref<1x32x32xf32, #tpu.memory_space<vmem>>, vector<1x32x32xf32>,
    return
  }
  func.func @transform_0(%arg0: i32, %arg1: i32) -> (i32, i32, i32) {
    %c0_i32 = arith.constant 0 : i32
    %c0_i32_0 = arith.constant 0 : i32
    return %arg0, %arg1, %c0_i32 : i32, i32, i32
  }
  func.func @transform_1(%arg0: i32, %arg1: i32) -> (i32, i32, i32) {
    %c0_i32 = arith.constant 0 : i32
    %c0_i32_0 = arith.constant 0 : i32
    %c0_i32_1 = arith.constant 0 : i32
    return %arg0, %c0_i32, %c0_i32_0 : i32, i32, i32
  }
  func.func @transform_2(%arg0: i32, %arg1: i32) -> (i32, i32, i32) {
    %c0_i32 = arith.constant 0 : i32
    %c0_i32_0 = arith.constant 0 : i32
    %c0_i32_1 = arith.constant 0 : i32
    return %arg0, %c0_i32, %c0_i32_0 : i32, i32, i32
  }
  func.func @transform_3(%arg0: i32, %arg1: i32) -> (i32, i32, i32) {
    %c0_i32 = arith.constant 0 : i32
    %c0_i32_0 = arith.constant 0 : i32
    return %arg0, %arg1, %c0_i32 : i32, i32, i32
  }
}

module attributes {stable_mosaic.version = 11 : i64} {
  func.func @_gmm_kernel(%arg0: i32, %arg1: i32, %arg2: memref<1x32x288xbf16, #tpu.memory_space<vmem>>, %arg3: memref<1x288x32xbf16, #tpu.memory_space<vmem>>, %arg4: memref<1x1x32xf32, #tpu.memory_space<vmem>>, %arg5: memref<1x32x32xf32, #tpu.memory_space<vmem>>) attributes {dimension_semantics = [#tpu.dimension_semantics<parallel>, #tpu.dimension_semantics<parallel>], iteration_bounds = array<i64: 2, 1>, scalar_prefetch = 0 : i64, scratch_operands = 0 : i64, tpu.core_type = #tpu.core_type<tc>, window_params = [{transform_indices = @transform_0, window_bounds = array<i64: 1, 32, 288>}, {transform_indices = @transform_1, window_bounds = array<i64: 1, 288, 32>}, {transform_indices = @transform_2, window_bounds = array<i64: 1, 1, 32>}, {transform_indices = @transform_3, window_bounds = array<i64: 1, 32, 32>}]} {
    %c0 = arith.constant 0 : index
    %c0_0 = arith.constant 0 : index
    %c0_1 = arith.constant 0 : index
    %0 = vector.load %arg2[%c0, %c0_0, %c0_1] : memref<1x32x288xbf16, #tpu.memory_space<vmem>>, vector<1x32x288xbf16>
    %1 = vector.shape_cast %0 : vector<1x32x288xbf16> to vector<32x288xbf16>
    %c0_2 = arith.constant 0 : index
    %c0_3 = arith.constant 0 : index
    %c0_4 = arith.constant 0 : index
    %2 = vector.load %arg3[%c0_2, %c0_3, %c0_4] : memref<1x288x32xbf16, #tpu.memory_space<vmem>>, vector<1x288x32xbf16>
    %3 = vector.shape_cast %2 : vector<1x288x32xbf16> to vector<288x32xbf16>
    %cst = arith.constant dense<0.000000e+00> : vector<32x32xf32>
    %4 = tpu.matmul %1, %3, %cst {dimension_numbers = #tpu.dot_dimension_numbers<[1], [0], [0], [1], [0, 0, 1, 1], [], []>} : vector<32x288xbf16>, vector<288x32xbf16>, vector<32x32xf32> -> vector<32x32xf32>
    %c0_5 = arith.constant 0 : index
    %c0_6 = arith.constant 0 : index
    %c0_7 = arith.constant 0 : index
    %5 = vector.load %arg4[%c0_5, %c0_6, %c0_7] : memref<1x1x32xf32, #tpu.memory_space<vmem>>, vector<1x1x32xf32>
    %6 = vector.shape_cast %5 : vector<1x1x32xf32> to vector<1x32xf32>
    %7 = vector.broadcast %6 : vector<1x32xf32> to vector<32x32xf32>
    %8 = arith.addf %4, %7 : vector<32x32xf32>
    %c0_8 = arith.constant 0 : index
    %c0_9 = arith.constant 0 : index
    %c0_10 = arith.constant 0 : index
    %9 = vector.load %arg5[%c0_8, %c0_9, %c0_10] : memref<1x32x32xf32, #tpu.memory_space<vmem>>, vector<1x32x32xf32>
    %10 = vector.shape_cast %9 : vector<1x32x32xf32> to vector<32x32xf32>
    %11 = vector.shape_cast %8 : vector<32x32xf32> to vector<1x32x32xf32>
    tpu.vector_store %arg5[%c0_8, %c0_9, %c0_10], %11 {strides = array<i32>} : memref<1x32x32xf32, #tpu.memory_space<vmem>>, vector<1x32x32xf32>,
    return
  }
  func.func @transform_0(%arg0: i32, %arg1: i32) -> (i32, i32, i32) {
    %c0_i32 = arith.constant 0 : i32
    %c0_i32_0 = arith.constant 0 : i32
    return %arg0, %arg1, %c0_i32 : i32, i32, i32
  }
  func.func @transform_1(%arg0: i32, %arg1: i32) -> (i32, i32, i32) {
    %c0_i32 = arith.constant 0 : i32
    %c0_i32_0 = arith.constant 0 : i32
    %c0_i32_1 = arith.constant 0 : i32
    return %arg0, %c0_i32, %c0_i32_0 : i32, i32, i32
  }
  func.func @transform_2(%arg0: i32, %arg1: i32) -> (i32, i32, i32) {
    %c0_i32 = arith.constant 0 : i32
    %c0_i32_0 = arith.constant 0 : i32
    %c0_i32_1 = arith.constant 0 : i32
    return %arg0, %c0_i32, %c0_i32_0 : i32, i32, i32
  }
  func.func @transform_3(%arg0: i32, %arg1: i32) -> (i32, i32, i32) {
    %c0_i32 = arith.constant 0 : i32
    %c0_i32_0 = arith.constant 0 : i32
    return %arg0, %arg1, %c0_i32 : i32, i32, i32
  }
}

module attributes {stable_mosaic.version = 11 : i64} {
  func.func @_resblock_kernel(%arg0: i32, %arg1: memref<1x32x288xbf16, #tpu.memory_space<vmem>>, %arg2: memref<1x288x8xbf16, #tpu.memory_space<vmem>>, %arg3: memref<1x1x8xf32, #tpu.memory_space<vmem>>, %arg4: memref<1x8x32xbf16, #tpu.memory_space<vmem>>, %arg5: memref<1x1x32xf32, #tpu.memory_space<vmem>>, %arg6: memref<1x32x32xf32, #tpu.memory_space<vmem>>, %arg7: memref<1x32x32xf32, #tpu.memory_space<vmem>>) attributes {dimension_semantics = [#tpu.dimension_semantics<parallel>], iteration_bounds = array<i64: 2>, scalar_prefetch = 0 : i64, scratch_operands = 0 : i64, tpu.core_type = #tpu.core_type<tc>, window_params = [{transform_indices = @transform_0, window_bounds = array<i64: 1, 32, 288>}, {transform_indices = @transform_1, window_bounds = array<i64: 1, 288, 8>}, {transform_indices = @transform_2, window_bounds = array<i64: 1, 1, 8>}, {transform_indices = @transform_3, window_bounds = array<i64: 1, 8, 32>}, {transform_indices = @transform_4, window_bounds = array<i64: 1, 1, 32>}, {transform_indices = @transform_5, window_bounds = array<i64: 1, 32, 32>}, {transform_indices = @transform_6, window_bounds = array<i64: 1, 32, 32>}]} {
    %c0 = arith.constant 0 : index
    %c0_0 = arith.constant 0 : index
    %c0_1 = arith.constant 0 : index
    %0 = vector.load %arg1[%c0, %c0_0, %c0_1] : memref<1x32x288xbf16, #tpu.memory_space<vmem>>, vector<1x32x288xbf16>
    %1 = vector.shape_cast %0 : vector<1x32x288xbf16> to vector<32x288xbf16>
    %c0_2 = arith.constant 0 : index
    %c0_3 = arith.constant 0 : index
    %c0_4 = arith.constant 0 : index
    %2 = vector.load %arg2[%c0_2, %c0_3, %c0_4] : memref<1x288x8xbf16, #tpu.memory_space<vmem>>, vector<1x288x8xbf16>
    %3 = vector.shape_cast %2 : vector<1x288x8xbf16> to vector<288x8xbf16>
    %cst = arith.constant dense<0.000000e+00> : vector<32x8xf32>
    %4 = tpu.matmul %1, %3, %cst {dimension_numbers = #tpu.dot_dimension_numbers<[1], [0], [0], [1], [0, 0, 1, 1], [], []>} : vector<32x288xbf16>, vector<288x8xbf16>, vector<32x8xf32> -> vector<32x8xf32>
    %c0_5 = arith.constant 0 : index
    %c0_6 = arith.constant 0 : index
    %c0_7 = arith.constant 0 : index
    %5 = vector.load %arg3[%c0_5, %c0_6, %c0_7] : memref<1x1x8xf32, #tpu.memory_space<vmem>>, vector<1x1x8xf32>
    %6 = vector.shape_cast %5 : vector<1x1x8xf32> to vector<1x8xf32>
    %7 = vector.broadcast %6 : vector<1x8xf32> to vector<32x8xf32>
    %8 = arith.addf %4, %7 : vector<32x8xf32>
    %cst_8 = arith.constant 0.000000e+00 : f32
    %9 = vector.broadcast %cst_8 : f32 to vector<32x8xf32>
    %10 = arith.maximumf %8, %9 : vector<32x8xf32>
    %11 = arith.truncf %10 : vector<32x8xf32> to vector<32x8xbf16>
    %c0_9 = arith.constant 0 : index
    %c0_10 = arith.constant 0 : index
    %c0_11 = arith.constant 0 : index
    %12 = vector.load %arg4[%c0_9, %c0_10, %c0_11] : memref<1x8x32xbf16, #tpu.memory_space<vmem>>, vector<1x8x32xbf16>
    %13 = vector.shape_cast %12 : vector<1x8x32xbf16> to vector<8x32xbf16>
    %cst_12 = arith.constant dense<0.000000e+00> : vector<32x32xf32>
    %14 = tpu.matmul %11, %13, %cst_12 {dimension_numbers = #tpu.dot_dimension_numbers<[1], [0], [0], [1], [0, 0, 1, 1], [], []>} : vector<32x8xbf16>, vector<8x32xbf16>, vector<32x32xf32> -> vector<32x32xf32>
    %c0_13 = arith.constant 0 : index
    %c0_14 = arith.constant 0 : index
    %c0_15 = arith.constant 0 : index
    %15 = vector.load %arg5[%c0_13, %c0_14, %c0_15] : memref<1x1x32xf32, #tpu.memory_space<vmem>>, vector<1x1x32xf32>
    %16 = vector.shape_cast %15 : vector<1x1x32xf32> to vector<1x32xf32>
    %17 = vector.broadcast %16 : vector<1x32xf32> to vector<32x32xf32>
    %18 = arith.addf %14, %17 : vector<32x32xf32>
    %c0_16 = arith.constant 0 : index
    %c0_17 = arith.constant 0 : index
    %c0_18 = arith.constant 0 : index
    %19 = vector.load %arg6[%c0_16, %c0_17, %c0_18] : memref<1x32x32xf32, #tpu.memory_space<vmem>>, vector<1x32x32xf32>
    %20 = vector.shape_cast %19 : vector<1x32x32xf32> to vector<32x32xf32>
    %21 = arith.addf %18, %20 : vector<32x32xf32>
    %c0_19 = arith.constant 0 : index
    %c0_20 = arith.constant 0 : index
    %c0_21 = arith.constant 0 : index
    %22 = vector.load %arg7[%c0_19, %c0_20, %c0_21] : memref<1x32x32xf32, #tpu.memory_space<vmem>>, vector<1x32x32xf32>
    %23 = vector.shape_cast %22 : vector<1x32x32xf32> to vector<32x32xf32>
    %24 = vector.shape_cast %21 : vector<32x32xf32> to vector<1x32x32xf32>
    tpu.vector_store %arg7[%c0_19, %c0_20, %c0_21], %24 {strides = array<i32>} : memref<1x32x32xf32, #tpu.memory_space<vmem>>, vector<1x32x32xf32>,
    return
  }
  func.func @transform_0(%arg0: i32) -> (i32, i32, i32) {
    %c0_i32 = arith.constant 0 : i32
    %c0_i32_0 = arith.constant 0 : i32
    %c0_i32_1 = arith.constant 0 : i32
    return %arg0, %c0_i32, %c0_i32_0 : i32, i32, i32
  }
  func.func @transform_1(%arg0: i32) -> (i32, i32, i32) {
    %c0_i32 = arith.constant 0 : i32
    %c0_i32_0 = arith.constant 0 : i32
    %c0_i32_1 = arith.constant 0 : i32
    return %arg0, %c0_i32, %c0_i32_0 : i32, i32, i32
  }
  func.func @transform_2(%arg0: i32) -> (i32, i32, i32) {
    %c0_i32 = arith.constant 0 : i32
    %c0_i32_0 = arith.constant 0 : i32
    %c0_i32_1 = arith.constant 0 : i32
    return %arg0, %c0_i32, %c0_i32_0 : i32, i32, i32
  }
  func.func @transform_3(%arg0: i32) -> (i32, i32, i32) {
    %c0_i32 = arith.constant 0 : i32
    %c0_i32_0 = arith.constant 0 : i32
    %c0_i32_1 = arith.constant 0 : i32
    return %arg0, %c0_i32, %c0_i32_0 : i32, i32, i32
  }
  func.func @transform_4(%arg0: i32) -> (i32, i32, i32) {
    %c0_i32 = arith.constant 0 : i32
    %c0_i32_0 = arith.constant 0 : i32
    %c0_i32_1 = arith.constant 0 : i32
    return %arg0, %c0_i32, %c0_i32_0 : i32, i32, i32
  }
  func.func @transform_5(%arg0: i32) -> (i32, i32, i32) {
    %c0_i32 = arith.constant 0 : i32
    %c0_i32_0 = arith.constant 0 : i32
    %c0_i32_1 = arith.constant 0 : i32
    return %arg0, %c0_i32, %c0_i32_0 : i32, i32, i32
  }
  func.func @transform_6(%arg0: i32) -> (i32, i32, i32) {
    %c0_i32 = arith.constant 0 : i32
    %c0_i32_0 = arith.constant 0 : i32
    %c0_i32_1 = arith.constant 0 : i32
    return %arg0, %c0_i32, %c0_i32_0 : i32, i32, i32
  }
}

module attributes {stable_mosaic.version = 11 : i64} {
  func.func @_resblock_kernel(%arg0: i32, %arg1: memref<1x32x288xbf16, #tpu.memory_space<vmem>>, %arg2: memref<1x288x8xbf16, #tpu.memory_space<vmem>>, %arg3: memref<1x1x8xf32, #tpu.memory_space<vmem>>, %arg4: memref<1x8x32xbf16, #tpu.memory_space<vmem>>, %arg5: memref<1x1x32xf32, #tpu.memory_space<vmem>>, %arg6: memref<1x32x32xf32, #tpu.memory_space<vmem>>, %arg7: memref<1x32x32xf32, #tpu.memory_space<vmem>>) attributes {dimension_semantics = [#tpu.dimension_semantics<parallel>], iteration_bounds = array<i64: 2>, scalar_prefetch = 0 : i64, scratch_operands = 0 : i64, tpu.core_type = #tpu.core_type<tc>, window_params = [{transform_indices = @transform_0, window_bounds = array<i64: 1, 32, 288>}, {transform_indices = @transform_1, window_bounds = array<i64: 1, 288, 8>}, {transform_indices = @transform_2, window_bounds = array<i64: 1, 1, 8>}, {transform_indices = @transform_3, window_bounds = array<i64: 1, 8, 32>}, {transform_indices = @transform_4, window_bounds = array<i64: 1, 1, 32>}, {transform_indices = @transform_5, window_bounds = array<i64: 1, 32, 32>}, {transform_indices = @transform_6, window_bounds = array<i64: 1, 32, 32>}]} {
    %c0 = arith.constant 0 : index
    %c0_0 = arith.constant 0 : index
    %c0_1 = arith.constant 0 : index
    %0 = vector.load %arg1[%c0, %c0_0, %c0_1] : memref<1x32x288xbf16, #tpu.memory_space<vmem>>, vector<1x32x288xbf16>
    %1 = vector.shape_cast %0 : vector<1x32x288xbf16> to vector<32x288xbf16>
    %c0_2 = arith.constant 0 : index
    %c0_3 = arith.constant 0 : index
    %c0_4 = arith.constant 0 : index
    %2 = vector.load %arg2[%c0_2, %c0_3, %c0_4] : memref<1x288x8xbf16, #tpu.memory_space<vmem>>, vector<1x288x8xbf16>
    %3 = vector.shape_cast %2 : vector<1x288x8xbf16> to vector<288x8xbf16>
    %cst = arith.constant dense<0.000000e+00> : vector<32x8xf32>
    %4 = tpu.matmul %1, %3, %cst {dimension_numbers = #tpu.dot_dimension_numbers<[1], [0], [0], [1], [0, 0, 1, 1], [], []>} : vector<32x288xbf16>, vector<288x8xbf16>, vector<32x8xf32> -> vector<32x8xf32>
    %c0_5 = arith.constant 0 : index
    %c0_6 = arith.constant 0 : index
    %c0_7 = arith.constant 0 : index
    %5 = vector.load %arg3[%c0_5, %c0_6, %c0_7] : memref<1x1x8xf32, #tpu.memory_space<vmem>>, vector<1x1x8xf32>
    %6 = vector.shape_cast %5 : vector<1x1x8xf32> to vector<1x8xf32>
    %7 = vector.broadcast %6 : vector<1x8xf32> to vector<32x8xf32>
    %8 = arith.addf %4, %7 : vector<32x8xf32>
    %cst_8 = arith.constant 0.000000e+00 : f32
    %9 = vector.broadcast %cst_8 : f32 to vector<32x8xf32>
    %10 = arith.maximumf %8, %9 : vector<32x8xf32>
    %11 = arith.truncf %10 : vector<32x8xf32> to vector<32x8xbf16>
    %c0_9 = arith.constant 0 : index
    %c0_10 = arith.constant 0 : index
    %c0_11 = arith.constant 0 : index
    %12 = vector.load %arg4[%c0_9, %c0_10, %c0_11] : memref<1x8x32xbf16, #tpu.memory_space<vmem>>, vector<1x8x32xbf16>
    %13 = vector.shape_cast %12 : vector<1x8x32xbf16> to vector<8x32xbf16>
    %cst_12 = arith.constant dense<0.000000e+00> : vector<32x32xf32>
    %14 = tpu.matmul %11, %13, %cst_12 {dimension_numbers = #tpu.dot_dimension_numbers<[1], [0], [0], [1], [0, 0, 1, 1], [], []>} : vector<32x8xbf16>, vector<8x32xbf16>, vector<32x32xf32> -> vector<32x32xf32>
    %c0_13 = arith.constant 0 : index
    %c0_14 = arith.constant 0 : index
    %c0_15 = arith.constant 0 : index
    %15 = vector.load %arg5[%c0_13, %c0_14, %c0_15] : memref<1x1x32xf32, #tpu.memory_space<vmem>>, vector<1x1x32xf32>
    %16 = vector.shape_cast %15 : vector<1x1x32xf32> to vector<1x32xf32>
    %17 = vector.broadcast %16 : vector<1x32xf32> to vector<32x32xf32>
    %18 = arith.addf %14, %17 : vector<32x32xf32>
    %c0_16 = arith.constant 0 : index
    %c0_17 = arith.constant 0 : index
    %c0_18 = arith.constant 0 : index
    %19 = vector.load %arg6[%c0_16, %c0_17, %c0_18] : memref<1x32x32xf32, #tpu.memory_space<vmem>>, vector<1x32x32xf32>
    %20 = vector.shape_cast %19 : vector<1x32x32xf32> to vector<32x32xf32>
    %21 = arith.addf %18, %20 : vector<32x32xf32>
    %cst_19 = arith.constant 0.000000e+00 : f32
    %22 = vector.broadcast %cst_19 : f32 to vector<32x32xf32>
    %23 = arith.maximumf %21, %22 : vector<32x32xf32>
    %c0_20 = arith.constant 0 : index
    %c0_21 = arith.constant 0 : index
    %c0_22 = arith.constant 0 : index
    %24 = vector.load %arg7[%c0_20, %c0_21, %c0_22] : memref<1x32x32xf32, #tpu.memory_space<vmem>>, vector<1x32x32xf32>
    %25 = vector.shape_cast %24 : vector<1x32x32xf32> to vector<32x32xf32>
    %26 = vector.shape_cast %23 : vector<32x32xf32> to vector<1x32x32xf32>
    tpu.vector_store %arg7[%c0_20, %c0_21, %c0_22], %26 {strides = array<i32>} : memref<1x32x32xf32, #tpu.memory_space<vmem>>, vector<1x32x32xf32>,
    return
  }
  func.func @transform_0(%arg0: i32) -> (i32, i32, i32) {
    %c0_i32 = arith.constant 0 : i32
    %c0_i32_0 = arith.constant 0 : i32
    %c0_i32_1 = arith.constant 0 : i32
    return %arg0, %c0_i32, %c0_i32_0 : i32, i32, i32
  }
  func.func @transform_1(%arg0: i32) -> (i32, i32, i32) {
    %c0_i32 = arith.constant 0 : i32
    %c0_i32_0 = arith.constant 0 : i32
    %c0_i32_1 = arith.constant 0 : i32
    return %arg0, %c0_i32, %c0_i32_0 : i32, i32, i32
  }
  func.func @transform_2(%arg0: i32) -> (i32, i32, i32) {
    %c0_i32 = arith.constant 0 : i32
    %c0_i32_0 = arith.constant 0 : i32
    %c0_i32_1 = arith.constant 0 : i32
    return %arg0, %c0_i32, %c0_i32_0 : i32, i32, i32
  }
  func.func @transform_3(%arg0: i32) -> (i32, i32, i32) {
    %c0_i32 = arith.constant 0 : i32
    %c0_i32_0 = arith.constant 0 : i32
    %c0_i32_1 = arith.constant 0 : i32
    return %arg0, %c0_i32, %c0_i32_0 : i32, i32, i32
  }
  func.func @transform_4(%arg0: i32) -> (i32, i32, i32) {
    %c0_i32 = arith.constant 0 : i32
    %c0_i32_0 = arith.constant 0 : i32
    %c0_i32_1 = arith.constant 0 : i32
    return %arg0, %c0_i32, %c0_i32_0 : i32, i32, i32
  }
  func.func @transform_5(%arg0: i32) -> (i32, i32, i32) {
    %c0_i32 = arith.constant 0 : i32
    %c0_i32_0 = arith.constant 0 : i32
    %c0_i32_1 = arith.constant 0 : i32
    return %arg0, %c0_i32, %c0_i32_0 : i32, i32, i32
  }
  func.func @transform_6(%arg0: i32) -> (i32, i32, i32) {
    %c0_i32 = arith.constant 0 : i32
    %c0_i32_0 = arith.constant 0 : i32
    %c0_i32_1 = arith.constant 0 : i32
    return %arg0, %c0_i32, %c0_i32_0 : i32, i32, i32
  }
}

module attributes {stable_mosaic.version = 11 : i64} {
  func.func @_gmm_kernel(%arg0: i32, %arg1: i32, %arg2: memref<1x8x1024xbf16, #tpu.memory_space<vmem>>, %arg3: memref<1x1024x16xbf16, #tpu.memory_space<vmem>>, %arg4: memref<1x1x16xf32, #tpu.memory_space<vmem>>, %arg5: memref<1x8x16xf32, #tpu.memory_space<vmem>>) attributes {dimension_semantics = [#tpu.dimension_semantics<parallel>, #tpu.dimension_semantics<parallel>], iteration_bounds = array<i64: 1, 1>, scalar_prefetch = 0 : i64, scratch_operands = 0 : i64, tpu.core_type = #tpu.core_type<tc>, window_params = [{transform_indices = @transform_0, window_bounds = array<i64: 1, 8, 1024>}, {transform_indices = @transform_1, window_bounds = array<i64: 1, 1024, 16>}, {transform_indices = @transform_2, window_bounds = array<i64: 1, 1, 16>}, {transform_indices = @transform_3, window_bounds = array<i64: 1, 8, 16>}]} {
    %c0 = arith.constant 0 : index
    %c0_0 = arith.constant 0 : index
    %c0_1 = arith.constant 0 : index
    %0 = vector.load %arg2[%c0, %c0_0, %c0_1] : memref<1x8x1024xbf16, #tpu.memory_space<vmem>>, vector<1x8x1024xbf16>
    %1 = vector.shape_cast %0 : vector<1x8x1024xbf16> to vector<8x1024xbf16>
    %c0_2 = arith.constant 0 : index
    %c0_3 = arith.constant 0 : index
    %c0_4 = arith.constant 0 : index
    %2 = vector.load %arg3[%c0_2, %c0_3, %c0_4] : memref<1x1024x16xbf16, #tpu.memory_space<vmem>>, vector<1x1024x16xbf16>
    %3 = vector.shape_cast %2 : vector<1x1024x16xbf16> to vector<1024x16xbf16>
    %cst = arith.constant dense<0.000000e+00> : vector<8x16xf32>
    %4 = tpu.matmul %1, %3, %cst {dimension_numbers = #tpu.dot_dimension_numbers<[1], [0], [0], [1], [0, 0, 1, 1], [], []>} : vector<8x1024xbf16>, vector<1024x16xbf16>, vector<8x16xf32> -> vector<8x16xf32>
    %c0_5 = arith.constant 0 : index
    %c0_6 = arith.constant 0 : index
    %c0_7 = arith.constant 0 : index
    %5 = vector.load %arg4[%c0_5, %c0_6, %c0_7] : memref<1x1x16xf32, #tpu.memory_space<vmem>>, vector<1x1x16xf32>
    %6 = vector.shape_cast %5 : vector<1x1x16xf32> to vector<1x16xf32>
    %7 = vector.broadcast %6 : vector<1x16xf32> to vector<8x16xf32>
    %8 = arith.addf %4, %7 : vector<8x16xf32>
    %cst_8 = arith.constant 0.000000e+00 : f32
    %9 = vector.broadcast %cst_8 : f32 to vector<8x16xf32>
    %10 = arith.maximumf %8, %9 : vector<8x16xf32>
    %c0_9 = arith.constant 0 : index
    %c0_10 = arith.constant 0 : index
    %c0_11 = arith.constant 0 : index
    %11 = vector.load %arg5[%c0_9, %c0_10, %c0_11] : memref<1x8x16xf32, #tpu.memory_space<vmem>>, vector<1x8x16xf32>
    %12 = vector.shape_cast %11 : vector<1x8x16xf32> to vector<8x16xf32>
    %13 = vector.shape_cast %10 : vector<8x16xf32> to vector<1x8x16xf32>
    tpu.vector_store %arg5[%c0_9, %c0_10, %c0_11], %13 {strides = array<i32>} : memref<1x8x16xf32, #tpu.memory_space<vmem>>, vector<1x8x16xf32>,
    return
  }
  func.func @transform_0(%arg0: i32, %arg1: i32) -> (i32, i32, i32) {
    %c0_i32 = arith.constant 0 : i32
    %c0_i32_0 = arith.constant 0 : i32
    return %arg0, %arg1, %c0_i32 : i32, i32, i32
  }
  func.func @transform_1(%arg0: i32, %arg1: i32) -> (i32, i32, i32) {
    %c0_i32 = arith.constant 0 : i32
    %c0_i32_0 = arith.constant 0 : i32
    %c0_i32_1 = arith.constant 0 : i32
    return %arg0, %c0_i32, %c0_i32_0 : i32, i32, i32
  }
  func.func @transform_2(%arg0: i32, %arg1: i32) -> (i32, i32, i32) {
    %c0_i32 = arith.constant 0 : i32
    %c0_i32_0 = arith.constant 0 : i32
    %c0_i32_1 = arith.constant 0 : i32
    return %arg0, %c0_i32, %c0_i32_0 : i32, i32, i32
  }
  func.func @transform_3(%arg0: i32, %arg1: i32) -> (i32, i32, i32) {
    %c0_i32 = arith.constant 0 : i32
    %c0_i32_0 = arith.constant 0 : i32
    return %arg0, %arg1, %c0_i32 : i32, i32, i32
  }
}

module attributes {stable_mosaic.version = 11 : i64} {
  func.func @_gmm_kernel(%arg0: i32, %arg1: i32, %arg2: memref<1x8x144xbf16, #tpu.memory_space<vmem>>, %arg3: memref<1x144x32xbf16, #tpu.memory_space<vmem>>, %arg4: memref<1x1x32xf32, #tpu.memory_space<vmem>>, %arg5: memref<1x8x32xf32, #tpu.memory_space<vmem>>) attributes {dimension_semantics = [#tpu.dimension_semantics<parallel>, #tpu.dimension_semantics<parallel>], iteration_bounds = array<i64: 1, 1>, scalar_prefetch = 0 : i64, scratch_operands = 0 : i64, tpu.core_type = #tpu.core_type<tc>, window_params = [{transform_indices = @transform_0, window_bounds = array<i64: 1, 8, 144>}, {transform_indices = @transform_1, window_bounds = array<i64: 1, 144, 32>}, {transform_indices = @transform_2, window_bounds = array<i64: 1, 1, 32>}, {transform_indices = @transform_3, window_bounds = array<i64: 1, 8, 32>}]} {
    %c0 = arith.constant 0 : index
    %c0_0 = arith.constant 0 : index
    %c0_1 = arith.constant 0 : index
    %0 = vector.load %arg2[%c0, %c0_0, %c0_1] : memref<1x8x144xbf16, #tpu.memory_space<vmem>>, vector<1x8x144xbf16>
    %1 = vector.shape_cast %0 : vector<1x8x144xbf16> to vector<8x144xbf16>
    %c0_2 = arith.constant 0 : index
    %c0_3 = arith.constant 0 : index
    %c0_4 = arith.constant 0 : index
    %2 = vector.load %arg3[%c0_2, %c0_3, %c0_4] : memref<1x144x32xbf16, #tpu.memory_space<vmem>>, vector<1x144x32xbf16>
    %3 = vector.shape_cast %2 : vector<1x144x32xbf16> to vector<144x32xbf16>
    %cst = arith.constant dense<0.000000e+00> : vector<8x32xf32>
    %4 = tpu.matmul %1, %3, %cst {dimension_numbers = #tpu.dot_dimension_numbers<[1], [0], [0], [1], [0, 0, 1, 1], [], []>} : vector<8x144xbf16>, vector<144x32xbf16>, vector<8x32xf32> -> vector<8x32xf32>
    %c0_5 = arith.constant 0 : index
    %c0_6 = arith.constant 0 : index
    %c0_7 = arith.constant 0 : index
    %5 = vector.load %arg4[%c0_5, %c0_6, %c0_7] : memref<1x1x32xf32, #tpu.memory_space<vmem>>, vector<1x1x32xf32>
    %6 = vector.shape_cast %5 : vector<1x1x32xf32> to vector<1x32xf32>
    %7 = vector.broadcast %6 : vector<1x32xf32> to vector<8x32xf32>
    %8 = arith.addf %4, %7 : vector<8x32xf32>
    %c0_8 = arith.constant 0 : index
    %c0_9 = arith.constant 0 : index
    %c0_10 = arith.constant 0 : index
    %9 = vector.load %arg5[%c0_8, %c0_9, %c0_10] : memref<1x8x32xf32, #tpu.memory_space<vmem>>, vector<1x8x32xf32>
    %10 = vector.shape_cast %9 : vector<1x8x32xf32> to vector<8x32xf32>
    %11 = vector.shape_cast %8 : vector<8x32xf32> to vector<1x8x32xf32>
    tpu.vector_store %arg5[%c0_8, %c0_9, %c0_10], %11 {strides = array<i32>} : memref<1x8x32xf32, #tpu.memory_space<vmem>>, vector<1x8x32xf32>,
    return
  }
  func.func @transform_0(%arg0: i32, %arg1: i32) -> (i32, i32, i32) {
    %c0_i32 = arith.constant 0 : i32
    %c0_i32_0 = arith.constant 0 : i32
    return %arg0, %arg1, %c0_i32 : i32, i32, i32
  }
  func.func @transform_1(%arg0: i32, %arg1: i32) -> (i32, i32, i32) {
    %c0_i32 = arith.constant 0 : i32
    %c0_i32_0 = arith.constant 0 : i32
    %c0_i32_1 = arith.constant 0 : i32
    return %arg0, %c0_i32, %c0_i32_0 : i32, i32, i32
  }
  func.func @transform_2(%arg0: i32, %arg1: i32) -> (i32, i32, i32) {
    %c0_i32 = arith.constant 0 : i32
    %c0_i32_0 = arith.constant 0 : i32
    %c0_i32_1 = arith.constant 0 : i32
    return %arg0, %c0_i32, %c0_i32_0 : i32, i32, i32
  }
  func.func @transform_3(%arg0: i32, %arg1: i32) -> (i32, i32, i32) {
    %c0_i32 = arith.constant 0 : i32
    %c0_i32_0 = arith.constant 0 : i32
    return %arg0, %arg1, %c0_i32 : i32, i32, i32
  }
}

module attributes {stable_mosaic.version = 11 : i64} {
  func.func @_resblock_kernel(%arg0: i32, %arg1: memref<1x8x288xbf16, #tpu.memory_space<vmem>>, %arg2: memref<1x288x8xbf16, #tpu.memory_space<vmem>>, %arg3: memref<1x1x8xf32, #tpu.memory_space<vmem>>, %arg4: memref<1x8x32xbf16, #tpu.memory_space<vmem>>, %arg5: memref<1x1x32xf32, #tpu.memory_space<vmem>>, %arg6: memref<1x8x32xf32, #tpu.memory_space<vmem>>, %arg7: memref<1x8x32xf32, #tpu.memory_space<vmem>>) attributes {dimension_semantics = [#tpu.dimension_semantics<parallel>], iteration_bounds = array<i64: 1>, scalar_prefetch = 0 : i64, scratch_operands = 0 : i64, tpu.core_type = #tpu.core_type<tc>, window_params = [{transform_indices = @transform_0, window_bounds = array<i64: 1, 8, 288>}, {transform_indices = @transform_1, window_bounds = array<i64: 1, 288, 8>}, {transform_indices = @transform_2, window_bounds = array<i64: 1, 1, 8>}, {transform_indices = @transform_3, window_bounds = array<i64: 1, 8, 32>}, {transform_indices = @transform_4, window_bounds = array<i64: 1, 1, 32>}, {transform_indices = @transform_5, window_bounds = array<i64: 1, 8, 32>}, {transform_indices = @transform_6, window_bounds = array<i64: 1, 8, 32>}]} {
    %c0 = arith.constant 0 : index
    %c0_0 = arith.constant 0 : index
    %c0_1 = arith.constant 0 : index
    %0 = vector.load %arg1[%c0, %c0_0, %c0_1] : memref<1x8x288xbf16, #tpu.memory_space<vmem>>, vector<1x8x288xbf16>
    %1 = vector.shape_cast %0 : vector<1x8x288xbf16> to vector<8x288xbf16>
    %c0_2 = arith.constant 0 : index
    %c0_3 = arith.constant 0 : index
    %c0_4 = arith.constant 0 : index
    %2 = vector.load %arg2[%c0_2, %c0_3, %c0_4] : memref<1x288x8xbf16, #tpu.memory_space<vmem>>, vector<1x288x8xbf16>
    %3 = vector.shape_cast %2 : vector<1x288x8xbf16> to vector<288x8xbf16>
    %cst = arith.constant dense<0.000000e+00> : vector<8x8xf32>
    %4 = tpu.matmul %1, %3, %cst {dimension_numbers = #tpu.dot_dimension_numbers<[1], [0], [0], [1], [0, 0, 1, 1], [], []>} : vector<8x288xbf16>, vector<288x8xbf16>, vector<8x8xf32> -> vector<8x8xf32>
    %c0_5 = arith.constant 0 : index
    %c0_6 = arith.constant 0 : index
    %c0_7 = arith.constant 0 : index
    %5 = vector.load %arg3[%c0_5, %c0_6, %c0_7] : memref<1x1x8xf32, #tpu.memory_space<vmem>>, vector<1x1x8xf32>
    %6 = vector.shape_cast %5 : vector<1x1x8xf32> to vector<1x8xf32>
    %7 = vector.broadcast %6 : vector<1x8xf32> to vector<8x8xf32>
    %8 = arith.addf %4, %7 : vector<8x8xf32>
    %cst_8 = arith.constant 0.000000e+00 : f32
    %9 = vector.broadcast %cst_8 : f32 to vector<8x8xf32>
    %10 = arith.maximumf %8, %9 : vector<8x8xf32>
    %11 = arith.truncf %10 : vector<8x8xf32> to vector<8x8xbf16>
    %c0_9 = arith.constant 0 : index
    %c0_10 = arith.constant 0 : index
    %c0_11 = arith.constant 0 : index
    %12 = vector.load %arg4[%c0_9, %c0_10, %c0_11] : memref<1x8x32xbf16, #tpu.memory_space<vmem>>, vector<1x8x32xbf16>
    %13 = vector.shape_cast %12 : vector<1x8x32xbf16> to vector<8x32xbf16>
    %cst_12 = arith.constant dense<0.000000e+00> : vector<8x32xf32>
    %14 = tpu.matmul %11, %13, %cst_12 {dimension_numbers = #tpu.dot_dimension_numbers<[1], [0], [0], [1], [0, 0, 1, 1], [], []>} : vector<8x8xbf16>, vector<8x32xbf16>, vector<8x32xf32> -> vector<8x32xf32>
    %c0_13 = arith.constant 0 : index
    %c0_14 = arith.constant 0 : index
    %c0_15 = arith.constant 0 : index
    %15 = vector.load %arg5[%c0_13, %c0_14, %c0_15] : memref<1x1x32xf32, #tpu.memory_space<vmem>>, vector<1x1x32xf32>
    %16 = vector.shape_cast %15 : vector<1x1x32xf32> to vector<1x32xf32>
    %17 = vector.broadcast %16 : vector<1x32xf32> to vector<8x32xf32>
    %18 = arith.addf %14, %17 : vector<8x32xf32>
    %c0_16 = arith.constant 0 : index
    %c0_17 = arith.constant 0 : index
    %c0_18 = arith.constant 0 : index
    %19 = vector.load %arg6[%c0_16, %c0_17, %c0_18] : memref<1x8x32xf32, #tpu.memory_space<vmem>>, vector<1x8x32xf32>
    %20 = vector.shape_cast %19 : vector<1x8x32xf32> to vector<8x32xf32>
    %21 = arith.addf %18, %20 : vector<8x32xf32>
    %c0_19 = arith.constant 0 : index
    %c0_20 = arith.constant 0 : index
    %c0_21 = arith.constant 0 : index
    %22 = vector.load %arg7[%c0_19, %c0_20, %c0_21] : memref<1x8x32xf32, #tpu.memory_space<vmem>>, vector<1x8x32xf32>
    %23 = vector.shape_cast %22 : vector<1x8x32xf32> to vector<8x32xf32>
    %24 = vector.shape_cast %21 : vector<8x32xf32> to vector<1x8x32xf32>
    tpu.vector_store %arg7[%c0_19, %c0_20, %c0_21], %24 {strides = array<i32>} : memref<1x8x32xf32, #tpu.memory_space<vmem>>, vector<1x8x32xf32>,
    return
  }
  func.func @transform_0(%arg0: i32) -> (i32, i32, i32) {
    %c0_i32 = arith.constant 0 : i32
    %c0_i32_0 = arith.constant 0 : i32
    %c0_i32_1 = arith.constant 0 : i32
    return %arg0, %c0_i32, %c0_i32_0 : i32, i32, i32
  }
  func.func @transform_1(%arg0: i32) -> (i32, i32, i32) {
    %c0_i32 = arith.constant 0 : i32
    %c0_i32_0 = arith.constant 0 : i32
    %c0_i32_1 = arith.constant 0 : i32
    return %arg0, %c0_i32, %c0_i32_0 : i32, i32, i32
  }
  func.func @transform_2(%arg0: i32) -> (i32, i32, i32) {
    %c0_i32 = arith.constant 0 : i32
    %c0_i32_0 = arith.constant 0 : i32
    %c0_i32_1 = arith.constant 0 : i32
    return %arg0, %c0_i32, %c0_i32_0 : i32, i32, i32
  }
  func.func @transform_3(%arg0: i32) -> (i32, i32, i32) {
    %c0_i32 = arith.constant 0 : i32
    %c0_i32_0 = arith.constant 0 : i32
    %c0_i32_1 = arith.constant 0 : i32
    return %arg0, %c0_i32, %c0_i32_0 : i32, i32, i32
  }
  func.func @transform_4(%arg0: i32) -> (i32, i32, i32) {
    %c0_i32 = arith.constant 0 : i32
    %c0_i32_0 = arith.constant 0 : i32
    %c0_i32_1 = arith.constant 0 : i32
    return %arg0, %c0_i32, %c0_i32_0 : i32, i32, i32
  }
  func.func @transform_5(%arg0: i32) -> (i32, i32, i32) {
    %c0_i32 = arith.constant 0 : i32
    %c0_i32_0 = arith.constant 0 : i32
    %c0_i32_1 = arith.constant 0 : i32
    return %arg0, %c0_i32, %c0_i32_0 : i32, i32, i32
  }
  func.func @transform_6(%arg0: i32) -> (i32, i32, i32) {
    %c0_i32 = arith.constant 0 : i32
    %c0_i32_0 = arith.constant 0 : i32
    %c0_i32_1 = arith.constant 0 : i32
    return %arg0, %c0_i32, %c0_i32_0 : i32, i32, i32
  }
}

module attributes {stable_mosaic.version = 11 : i64} {
  func.func @_resblock_kernel(%arg0: i32, %arg1: memref<1x8x288xbf16, #tpu.memory_space<vmem>>, %arg2: memref<1x288x8xbf16, #tpu.memory_space<vmem>>, %arg3: memref<1x1x8xf32, #tpu.memory_space<vmem>>, %arg4: memref<1x8x32xbf16, #tpu.memory_space<vmem>>, %arg5: memref<1x1x32xf32, #tpu.memory_space<vmem>>, %arg6: memref<1x8x32xf32, #tpu.memory_space<vmem>>, %arg7: memref<1x8x32xf32, #tpu.memory_space<vmem>>) attributes {dimension_semantics = [#tpu.dimension_semantics<parallel>], iteration_bounds = array<i64: 1>, scalar_prefetch = 0 : i64, scratch_operands = 0 : i64, tpu.core_type = #tpu.core_type<tc>, window_params = [{transform_indices = @transform_0, window_bounds = array<i64: 1, 8, 288>}, {transform_indices = @transform_1, window_bounds = array<i64: 1, 288, 8>}, {transform_indices = @transform_2, window_bounds = array<i64: 1, 1, 8>}, {transform_indices = @transform_3, window_bounds = array<i64: 1, 8, 32>}, {transform_indices = @transform_4, window_bounds = array<i64: 1, 1, 32>}, {transform_indices = @transform_5, window_bounds = array<i64: 1, 8, 32>}, {transform_indices = @transform_6, window_bounds = array<i64: 1, 8, 32>}]} {
    %c0 = arith.constant 0 : index
    %c0_0 = arith.constant 0 : index
    %c0_1 = arith.constant 0 : index
    %0 = vector.load %arg1[%c0, %c0_0, %c0_1] : memref<1x8x288xbf16, #tpu.memory_space<vmem>>, vector<1x8x288xbf16>
    %1 = vector.shape_cast %0 : vector<1x8x288xbf16> to vector<8x288xbf16>
    %c0_2 = arith.constant 0 : index
    %c0_3 = arith.constant 0 : index
    %c0_4 = arith.constant 0 : index
    %2 = vector.load %arg2[%c0_2, %c0_3, %c0_4] : memref<1x288x8xbf16, #tpu.memory_space<vmem>>, vector<1x288x8xbf16>
    %3 = vector.shape_cast %2 : vector<1x288x8xbf16> to vector<288x8xbf16>
    %cst = arith.constant dense<0.000000e+00> : vector<8x8xf32>
    %4 = tpu.matmul %1, %3, %cst {dimension_numbers = #tpu.dot_dimension_numbers<[1], [0], [0], [1], [0, 0, 1, 1], [], []>} : vector<8x288xbf16>, vector<288x8xbf16>, vector<8x8xf32> -> vector<8x8xf32>
    %c0_5 = arith.constant 0 : index
    %c0_6 = arith.constant 0 : index
    %c0_7 = arith.constant 0 : index
    %5 = vector.load %arg3[%c0_5, %c0_6, %c0_7] : memref<1x1x8xf32, #tpu.memory_space<vmem>>, vector<1x1x8xf32>
    %6 = vector.shape_cast %5 : vector<1x1x8xf32> to vector<1x8xf32>
    %7 = vector.broadcast %6 : vector<1x8xf32> to vector<8x8xf32>
    %8 = arith.addf %4, %7 : vector<8x8xf32>
    %cst_8 = arith.constant 0.000000e+00 : f32
    %9 = vector.broadcast %cst_8 : f32 to vector<8x8xf32>
    %10 = arith.maximumf %8, %9 : vector<8x8xf32>
    %11 = arith.truncf %10 : vector<8x8xf32> to vector<8x8xbf16>
    %c0_9 = arith.constant 0 : index
    %c0_10 = arith.constant 0 : index
    %c0_11 = arith.constant 0 : index
    %12 = vector.load %arg4[%c0_9, %c0_10, %c0_11] : memref<1x8x32xbf16, #tpu.memory_space<vmem>>, vector<1x8x32xbf16>
    %13 = vector.shape_cast %12 : vector<1x8x32xbf16> to vector<8x32xbf16>
    %cst_12 = arith.constant dense<0.000000e+00> : vector<8x32xf32>
    %14 = tpu.matmul %11, %13, %cst_12 {dimension_numbers = #tpu.dot_dimension_numbers<[1], [0], [0], [1], [0, 0, 1, 1], [], []>} : vector<8x8xbf16>, vector<8x32xbf16>, vector<8x32xf32> -> vector<8x32xf32>
    %c0_13 = arith.constant 0 : index
    %c0_14 = arith.constant 0 : index
    %c0_15 = arith.constant 0 : index
    %15 = vector.load %arg5[%c0_13, %c0_14, %c0_15] : memref<1x1x32xf32, #tpu.memory_space<vmem>>, vector<1x1x32xf32>
    %16 = vector.shape_cast %15 : vector<1x1x32xf32> to vector<1x32xf32>
    %17 = vector.broadcast %16 : vector<1x32xf32> to vector<8x32xf32>
    %18 = arith.addf %14, %17 : vector<8x32xf32>
    %c0_16 = arith.constant 0 : index
    %c0_17 = arith.constant 0 : index
    %c0_18 = arith.constant 0 : index
    %19 = vector.load %arg6[%c0_16, %c0_17, %c0_18] : memref<1x8x32xf32, #tpu.memory_space<vmem>>, vector<1x8x32xf32>
    %20 = vector.shape_cast %19 : vector<1x8x32xf32> to vector<8x32xf32>
    %21 = arith.addf %18, %20 : vector<8x32xf32>
    %cst_19 = arith.constant 0.000000e+00 : f32
    %22 = vector.broadcast %cst_19 : f32 to vector<8x32xf32>
    %23 = arith.maximumf %21, %22 : vector<8x32xf32>
    %c0_20 = arith.constant 0 : index
    %c0_21 = arith.constant 0 : index
    %c0_22 = arith.constant 0 : index
    %24 = vector.load %arg7[%c0_20, %c0_21, %c0_22] : memref<1x8x32xf32, #tpu.memory_space<vmem>>, vector<1x8x32xf32>
    %25 = vector.shape_cast %24 : vector<1x8x32xf32> to vector<8x32xf32>
    %26 = vector.shape_cast %23 : vector<8x32xf32> to vector<1x8x32xf32>
    tpu.vector_store %arg7[%c0_20, %c0_21, %c0_22], %26 {strides = array<i32>} : memref<1x8x32xf32, #tpu.memory_space<vmem>>, vector<1x8x32xf32>,
    return
  }
  func.func @transform_0(%arg0: i32) -> (i32, i32, i32) {
    %c0_i32 = arith.constant 0 : i32
    %c0_i32_0 = arith.constant 0 : i32
    %c0_i32_1 = arith.constant 0 : i32
    return %arg0, %c0_i32, %c0_i32_0 : i32, i32, i32
  }
  func.func @transform_1(%arg0: i32) -> (i32, i32, i32) {
    %c0_i32 = arith.constant 0 : i32
    %c0_i32_0 = arith.constant 0 : i32
    %c0_i32_1 = arith.constant 0 : i32
    return %arg0, %c0_i32, %c0_i32_0 : i32, i32, i32
  }
  func.func @transform_2(%arg0: i32) -> (i32, i32, i32) {
    %c0_i32 = arith.constant 0 : i32
    %c0_i32_0 = arith.constant 0 : i32
    %c0_i32_1 = arith.constant 0 : i32
    return %arg0, %c0_i32, %c0_i32_0 : i32, i32, i32
  }
  func.func @transform_3(%arg0: i32) -> (i32, i32, i32) {
    %c0_i32 = arith.constant 0 : i32
    %c0_i32_0 = arith.constant 0 : i32
    %c0_i32_1 = arith.constant 0 : i32
    return %arg0, %c0_i32, %c0_i32_0 : i32, i32, i32
  }
  func.func @transform_4(%arg0: i32) -> (i32, i32, i32) {
    %c0_i32 = arith.constant 0 : i32
    %c0_i32_0 = arith.constant 0 : i32
    %c0_i32_1 = arith.constant 0 : i32
    return %arg0, %c0_i32, %c0_i32_0 : i32, i32, i32
  }
  func.func @transform_5(%arg0: i32) -> (i32, i32, i32) {
    %c0_i32 = arith.constant 0 : i32
    %c0_i32_0 = arith.constant 0 : i32
    %c0_i32_1 = arith.constant 0 : i32
    return %arg0, %c0_i32, %c0_i32_0 : i32, i32, i32
  }
  func.func @transform_6(%arg0: i32) -> (i32, i32, i32) {
    %c0_i32 = arith.constant 0 : i32
    %c0_i32_0 = arith.constant 0 : i32
    %c0_i32_1 = arith.constant 0 : i32
    return %arg0, %c0_i32, %c0_i32_0 : i32, i32, i32
  }
}

module attributes {stable_mosaic.version = 11 : i64} {
  func.func @_proj_quantize_kernel(%arg0: i32, %arg1: memref<1x8x32xbf16, #tpu.memory_space<vmem>>, %arg2: memref<1x32x16xbf16, #tpu.memory_space<vmem>>, %arg3: memref<1x1x16xf32, #tpu.memory_space<vmem>>, %arg4: memref<1x16x64xf32, #tpu.memory_space<vmem>>, %arg5: memref<1x64x16xf32, #tpu.memory_space<vmem>>, %arg6: memref<1x8x16xf32, #tpu.memory_space<vmem>>, %arg7: memref<1x1x1xf32, #tpu.memory_space<vmem>>) attributes {dimension_semantics = [#tpu.dimension_semantics<parallel>], iteration_bounds = array<i64: 1>, scalar_prefetch = 0 : i64, scratch_operands = 0 : i64, tpu.core_type = #tpu.core_type<tc>, window_params = [{transform_indices = @transform_0, window_bounds = array<i64: 1, 8, 32>}, {transform_indices = @transform_1, window_bounds = array<i64: 1, 32, 16>}, {transform_indices = @transform_2, window_bounds = array<i64: 1, 1, 16>}, {transform_indices = @transform_3, window_bounds = array<i64: 1, 16, 64>}, {transform_indices = @transform_4, window_bounds = array<i64: 1, 64, 16>}, {transform_indices = @transform_5, window_bounds = array<i64: 1, 8, 16>}, {transform_indices = @transform_6, window_bounds = array<i64: 1, 1, 1>}]} {
    %c0 = arith.constant 0 : index
    %c0_0 = arith.constant 0 : index
    %c0_1 = arith.constant 0 : index
    %0 = vector.load %arg1[%c0, %c0_0, %c0_1] : memref<1x8x32xbf16, #tpu.memory_space<vmem>>, vector<1x8x32xbf16>
    %1 = vector.shape_cast %0 : vector<1x8x32xbf16> to vector<8x32xbf16>
    %c0_2 = arith.constant 0 : index
    %c0_3 = arith.constant 0 : index
    %c0_4 = arith.constant 0 : index
    %2 = vector.load %arg2[%c0_2, %c0_3, %c0_4] : memref<1x32x16xbf16, #tpu.memory_space<vmem>>, vector<1x32x16xbf16>
    %3 = vector.shape_cast %2 : vector<1x32x16xbf16> to vector<32x16xbf16>
    %cst = arith.constant dense<0.000000e+00> : vector<8x16xf32>
    %4 = tpu.matmul %1, %3, %cst {dimension_numbers = #tpu.dot_dimension_numbers<[1], [0], [0], [1], [0, 0, 1, 1], [], []>} : vector<8x32xbf16>, vector<32x16xbf16>, vector<8x16xf32> -> vector<8x16xf32>
    %c0_5 = arith.constant 0 : index
    %c0_6 = arith.constant 0 : index
    %c0_7 = arith.constant 0 : index
    %5 = vector.load %arg3[%c0_5, %c0_6, %c0_7] : memref<1x1x16xf32, #tpu.memory_space<vmem>>, vector<1x1x16xf32>
    %6 = vector.shape_cast %5 : vector<1x1x16xf32> to vector<1x16xf32>
    %7 = vector.broadcast %6 : vector<1x16xf32> to vector<8x16xf32>
    %8 = arith.addf %4, %7 : vector<8x16xf32>
    %c0_8 = arith.constant 0 : index
    %c0_9 = arith.constant 0 : index
    %c0_10 = arith.constant 0 : index
    %9 = vector.load %arg4[%c0_8, %c0_9, %c0_10] : memref<1x16x64xf32, #tpu.memory_space<vmem>>, vector<1x16x64xf32>
    %10 = vector.shape_cast %9 : vector<1x16x64xf32> to vector<16x64xf32>
    %11 = arith.mulf %8, %8 : vector<8x16xf32>
    %cst_11 = arith.constant dense<0.000000e+00> : vector<8xf32>
    %12 = vector.multi_reduction <add>, %11, %cst_11 [1] : vector<8x16xf32> to vector<8xf32>
    %13 = vector.shape_cast %12 : vector<8xf32> to vector<8x1xf32>
    %cst_12 = arith.constant dense<0.000000e+00> : vector<8x64xf32>
    %14 = tpu.matmul %8, %10, %cst_12 {dimension_numbers = #tpu.dot_dimension_numbers<[1], [0], [0], [1], [0, 0, 1, 1], [], []>} : vector<8x16xf32>, vector<16x64xf32>, vector<8x64xf32> -> vector<8x64xf32>
    %cst_13 = arith.constant 2.000000e+00 : f32
    %15 = vector.broadcast %cst_13 : f32 to vector<8x64xf32>
    %16 = arith.mulf %15, %14 : vector<8x64xf32>
    %17 = vector.broadcast %13 : vector<8x1xf32> to vector<8x64xf32>
    %18 = arith.subf %17, %16 : vector<8x64xf32>
    %19 = arith.mulf %10, %10 : vector<16x64xf32>
    %cst_14 = arith.constant dense<0.000000e+00> : vector<64xf32>
    %20 = vector.multi_reduction <add>, %19, %cst_14 [0] : vector<16x64xf32> to vector<64xf32>
    %21 = vector.shape_cast %20 : vector<64xf32> to vector<1x64xf32>
    %22 = vector.broadcast %21 : vector<1x64xf32> to vector<8x64xf32>
    %23 = arith.addf %18, %22 : vector<8x64xf32>
    %24 = tpu.iota {dimensions = array<i32: 1>} : vector<8x64xi32>
    %cst_15 = arith.constant dense<0x7F800000> : vector<8xf32>
    %25 = vector.multi_reduction <minimumf>, %23, %cst_15 [1] : vector<8x64xf32> to vector<8xf32>
    %26 = vector.shape_cast %25 : vector<8xf32> to vector<8x1xf32>
    %27 = vector.broadcast %26 : vector<8x1xf32> to vector<8x64xf32>
    %28 = arith.cmpf oeq, %23, %27 : vector<8x64xf32>
    %c64_i32 = arith.constant 64 : i32
    %29 = vector.broadcast %c64_i32 : i32 to vector<8x64xi32>
    %30 = arith.select %28, %24, %29 : vector<8x64xi1>, vector<8x64xi32>
    %cst_16 = arith.constant dense<2147483647> : vector<8xi32>
    %31 = vector.multi_reduction <minsi>, %30, %cst_16 [1] : vector<8x64xi32> to vector<8xi32>
    %32 = vector.shape_cast %31 : vector<8xi32> to vector<8x1xi32>
    %33 = vector.broadcast %32 : vector<8x1xi32> to vector<8x64xi32>
    %34 = arith.cmpi eq, %24, %33 : vector<8x64xi32>
    %35 = arith.extui %34 : vector<8x64xi1> to vector<8x64xi32>
    %36 = arith.sitofp %35 : vector<8x64xi32> to vector<8x64xf32>
    %c0_17 = arith.constant 0 : index
    %c0_18 = arith.constant 0 : index
    %c0_19 = arith.constant 0 : index
    %37 = vector.load %arg5[%c0_17, %c0_18, %c0_19] : memref<1x64x16xf32, #tpu.memory_space<vmem>>, vector<1x64x16xf32>
    %38 = vector.shape_cast %37 : vector<1x64x16xf32> to vector<64x16xf32>
    %cst_20 = arith.constant dense<0.000000e+00> : vector<8x16xf32>
    %39 = tpu.matmul %36, %38, %cst_20 {dimension_numbers = #tpu.dot_dimension_numbers<[1], [0], [0], [1], [0, 0, 1, 1], [], []>} : vector<8x64xf32>, vector<64x16xf32>, vector<8x16xf32> -> vector<8x16xf32>
    %c0_21 = arith.constant 0 : index
    %c0_22 = arith.constant 0 : index
    %c0_23 = arith.constant 0 : index
    %40 = vector.load %arg6[%c0_21, %c0_22, %c0_23] : memref<1x8x16xf32, #tpu.memory_space<vmem>>, vector<1x8x16xf32>
    %41 = vector.shape_cast %40 : vector<1x8x16xf32> to vector<8x16xf32>
    %42 = vector.shape_cast %39 : vector<8x16xf32> to vector<1x8x16xf32>
    tpu.vector_store %arg6[%c0_21, %c0_22, %c0_23], %42 {strides = array<i32>} : memref<1x8x16xf32, #tpu.memory_space<vmem>>, vector<1x8x16xf32>,
    %43 = arith.subf %39, %8 : vector<8x16xf32>
    %44 = arith.mulf %43, %43 : vector<8x16xf32>
    %cst_24 = arith.constant dense<0.000000e+00> : vector<8xf32>
    %45 = vector.multi_reduction <add>, %44, %cst_24 [1] : vector<8x16xf32> to vector<8xf32>
    %46 = vector.shape_cast %45 : vector<8xf32> to vector<8x1xf32>
    %cst_25 = arith.constant dense<0.000000e+00> : vector<1xf32>
    %47 = vector.multi_reduction <add>, %46, %cst_25 [0] : vector<8x1xf32> to vector<1xf32>
    %48 = vector.shape_cast %47 : vector<1xf32> to vector<1x1xf32>
    %cst_26 = arith.constant 1.280000e+02 : f32
    %49 = vector.broadcast %cst_26 : f32 to vector<1x1xf32>
    %50 = arith.divf %48, %49 : vector<1x1xf32>
    %c0_27 = arith.constant 0 : index
    %c0_28 = arith.constant 0 : index
    %c0_29 = arith.constant 0 : index
    %51 = vector.load %arg7[%c0_27, %c0_28, %c0_29] : memref<1x1x1xf32, #tpu.memory_space<vmem>>, vector<1x1x1xf32>
    %52 = vector.shape_cast %51 : vector<1x1x1xf32> to vector<1x1xf32>
    %53 = vector.shape_cast %50 : vector<1x1xf32> to vector<1x1x1xf32>
    tpu.vector_store %arg7[%c0_27, %c0_28, %c0_29], %53 {strides = array<i32>} : memref<1x1x1xf32, #tpu.memory_space<vmem>>, vector<1x1x1xf32>,
    return
  }
  func.func @transform_0(%arg0: i32) -> (i32, i32, i32) {
    %c0_i32 = arith.constant 0 : i32
    %c0_i32_0 = arith.constant 0 : i32
    %c0_i32_1 = arith.constant 0 : i32
    return %arg0, %c0_i32, %c0_i32_0 : i32, i32, i32
  }
  func.func @transform_1(%arg0: i32) -> (i32, i32, i32) {
    %c0_i32 = arith.constant 0 : i32
    %c0_i32_0 = arith.constant 0 : i32
    %c0_i32_1 = arith.constant 0 : i32
    return %arg0, %c0_i32, %c0_i32_0 : i32, i32, i32
  }
  func.func @transform_2(%arg0: i32) -> (i32, i32, i32) {
    %c0_i32 = arith.constant 0 : i32
    %c0_i32_0 = arith.constant 0 : i32
    %c0_i32_1 = arith.constant 0 : i32
    return %arg0, %c0_i32, %c0_i32_0 : i32, i32, i32
  }
  func.func @transform_3(%arg0: i32) -> (i32, i32, i32) {
    %c0_i32 = arith.constant 0 : i32
    %c0_i32_0 = arith.constant 0 : i32
    %c0_i32_1 = arith.constant 0 : i32
    return %arg0, %c0_i32, %c0_i32_0 : i32, i32, i32
  }
  func.func @transform_4(%arg0: i32) -> (i32, i32, i32) {
    %c0_i32 = arith.constant 0 : i32
    %c0_i32_0 = arith.constant 0 : i32
    %c0_i32_1 = arith.constant 0 : i32
    return %arg0, %c0_i32, %c0_i32_0 : i32, i32, i32
  }
  func.func @transform_5(%arg0: i32) -> (i32, i32, i32) {
    %c0_i32 = arith.constant 0 : i32
    %c0_i32_0 = arith.constant 0 : i32
    %c0_i32_1 = arith.constant 0 : i32
    return %arg0, %c0_i32, %c0_i32_0 : i32, i32, i32
  }
  func.func @transform_6(%arg0: i32) -> (i32, i32, i32) {
    %c0_i32 = arith.constant 0 : i32
    %c0_i32_0 = arith.constant 0 : i32
    %c0_i32_1 = arith.constant 0 : i32
    return %arg0, %c0_i32, %c0_i32_0 : i32, i32, i32
  }
}

module attributes {stable_mosaic.version = 11 : i64} {
  func.func @_gmm_kernel(%arg0: i32, %arg1: i32, %arg2: memref<1x18x64xbf16, #tpu.memory_space<vmem>>, %arg3: memref<1x64x64xbf16, #tpu.memory_space<vmem>>, %arg4: memref<1x1x64xf32, #tpu.memory_space<vmem>>, %arg5: memref<1x18x64xf32, #tpu.memory_space<vmem>>) attributes {dimension_semantics = [#tpu.dimension_semantics<parallel>, #tpu.dimension_semantics<parallel>], iteration_bounds = array<i64: 1, 1>, scalar_prefetch = 0 : i64, scratch_operands = 0 : i64, tpu.core_type = #tpu.core_type<tc>, window_params = [{transform_indices = @transform_0, window_bounds = array<i64: 1, 18, 64>}, {transform_indices = @transform_1, window_bounds = array<i64: 1, 64, 64>}, {transform_indices = @transform_2, window_bounds = array<i64: 1, 1, 64>}, {transform_indices = @transform_3, window_bounds = array<i64: 1, 18, 64>}]} {
    %c0 = arith.constant 0 : index
    %c0_0 = arith.constant 0 : index
    %c0_1 = arith.constant 0 : index
    %0 = vector.load %arg2[%c0, %c0_0, %c0_1] : memref<1x18x64xbf16, #tpu.memory_space<vmem>>, vector<1x18x64xbf16>
    %1 = vector.shape_cast %0 : vector<1x18x64xbf16> to vector<18x64xbf16>
    %c0_2 = arith.constant 0 : index
    %c0_3 = arith.constant 0 : index
    %c0_4 = arith.constant 0 : index
    %2 = vector.load %arg3[%c0_2, %c0_3, %c0_4] : memref<1x64x64xbf16, #tpu.memory_space<vmem>>, vector<1x64x64xbf16>
    %3 = vector.shape_cast %2 : vector<1x64x64xbf16> to vector<64x64xbf16>
    %cst = arith.constant dense<0.000000e+00> : vector<18x64xf32>
    %4 = tpu.matmul %1, %3, %cst {dimension_numbers = #tpu.dot_dimension_numbers<[1], [0], [0], [1], [0, 0, 1, 1], [], []>} : vector<18x64xbf16>, vector<64x64xbf16>, vector<18x64xf32> -> vector<18x64xf32>
    %c0_5 = arith.constant 0 : index
    %c0_6 = arith.constant 0 : index
    %c0_7 = arith.constant 0 : index
    %5 = vector.load %arg4[%c0_5, %c0_6, %c0_7] : memref<1x1x64xf32, #tpu.memory_space<vmem>>, vector<1x1x64xf32>
    %6 = vector.shape_cast %5 : vector<1x1x64xf32> to vector<1x64xf32>
    %7 = vector.broadcast %6 : vector<1x64xf32> to vector<18x64xf32>
    %8 = arith.addf %4, %7 : vector<18x64xf32>
    %c0_8 = arith.constant 0 : index
    %c0_9 = arith.constant 0 : index
    %c0_10 = arith.constant 0 : index
    %9 = vector.load %arg5[%c0_8, %c0_9, %c0_10] : memref<1x18x64xf32, #tpu.memory_space<vmem>>, vector<1x18x64xf32>
    %10 = vector.shape_cast %9 : vector<1x18x64xf32> to vector<18x64xf32>
    %11 = vector.shape_cast %8 : vector<18x64xf32> to vector<1x18x64xf32>
    tpu.vector_store %arg5[%c0_8, %c0_9, %c0_10], %11 {strides = array<i32>} : memref<1x18x64xf32, #tpu.memory_space<vmem>>, vector<1x18x64xf32>,
    return
  }
  func.func @transform_0(%arg0: i32, %arg1: i32) -> (i32, i32, i32) {
    %c0_i32 = arith.constant 0 : i32
    %c0_i32_0 = arith.constant 0 : i32
    return %arg0, %arg1, %c0_i32 : i32, i32, i32
  }
  func.func @transform_1(%arg0: i32, %arg1: i32) -> (i32, i32, i32) {
    %c0_i32 = arith.constant 0 : i32
    %c0_i32_0 = arith.constant 0 : i32
    %c0_i32_1 = arith.constant 0 : i32
    return %arg0, %c0_i32, %c0_i32_0 : i32, i32, i32
  }
  func.func @transform_2(%arg0: i32, %arg1: i32) -> (i32, i32, i32) {
    %c0_i32 = arith.constant 0 : i32
    %c0_i32_0 = arith.constant 0 : i32
    %c0_i32_1 = arith.constant 0 : i32
    return %arg0, %c0_i32, %c0_i32_0 : i32, i32, i32
  }
  func.func @transform_3(%arg0: i32, %arg1: i32) -> (i32, i32, i32) {
    %c0_i32 = arith.constant 0 : i32
    %c0_i32_0 = arith.constant 0 : i32
    return %arg0, %arg1, %c0_i32 : i32, i32, i32
  }
}

module attributes {stable_mosaic.version = 11 : i64} {
  func.func @_gmm_kernel(%arg0: i32, %arg1: i32, %arg2: memref<1x18x128xbf16, #tpu.memory_space<vmem>>, %arg3: memref<1x128x64xbf16, #tpu.memory_space<vmem>>, %arg4: memref<1x1x64xf32, #tpu.memory_space<vmem>>, %arg5: memref<1x18x64xf32, #tpu.memory_space<vmem>>) attributes {dimension_semantics = [#tpu.dimension_semantics<parallel>, #tpu.dimension_semantics<parallel>], iteration_bounds = array<i64: 1, 1>, scalar_prefetch = 0 : i64, scratch_operands = 0 : i64, tpu.core_type = #tpu.core_type<tc>, window_params = [{transform_indices = @transform_0, window_bounds = array<i64: 1, 18, 128>}, {transform_indices = @transform_1, window_bounds = array<i64: 1, 128, 64>}, {transform_indices = @transform_2, window_bounds = array<i64: 1, 1, 64>}, {transform_indices = @transform_3, window_bounds = array<i64: 1, 18, 64>}]} {
    %c0 = arith.constant 0 : index
    %c0_0 = arith.constant 0 : index
    %c0_1 = arith.constant 0 : index
    %0 = vector.load %arg2[%c0, %c0_0, %c0_1] : memref<1x18x128xbf16, #tpu.memory_space<vmem>>, vector<1x18x128xbf16>
    %1 = vector.shape_cast %0 : vector<1x18x128xbf16> to vector<18x128xbf16>
    %c0_2 = arith.constant 0 : index
    %c0_3 = arith.constant 0 : index
    %c0_4 = arith.constant 0 : index
    %2 = vector.load %arg3[%c0_2, %c0_3, %c0_4] : memref<1x128x64xbf16, #tpu.memory_space<vmem>>, vector<1x128x64xbf16>
    %3 = vector.shape_cast %2 : vector<1x128x64xbf16> to vector<128x64xbf16>
    %cst = arith.constant dense<0.000000e+00> : vector<18x64xf32>
    %4 = tpu.matmul %1, %3, %cst {dimension_numbers = #tpu.dot_dimension_numbers<[1], [0], [0], [1], [0, 0, 1, 1], [], []>} : vector<18x128xbf16>, vector<128x64xbf16>, vector<18x64xf32> -> vector<18x64xf32>
    %c0_5 = arith.constant 0 : index
    %c0_6 = arith.constant 0 : index
    %c0_7 = arith.constant 0 : index
    %5 = vector.load %arg4[%c0_5, %c0_6, %c0_7] : memref<1x1x64xf32, #tpu.memory_space<vmem>>, vector<1x1x64xf32>
    %6 = vector.shape_cast %5 : vector<1x1x64xf32> to vector<1x64xf32>
    %7 = vector.broadcast %6 : vector<1x64xf32> to vector<18x64xf32>
    %8 = arith.addf %4, %7 : vector<18x64xf32>
    %c0_8 = arith.constant 0 : index
    %c0_9 = arith.constant 0 : index
    %c0_10 = arith.constant 0 : index
    %9 = vector.load %arg5[%c0_8, %c0_9, %c0_10] : memref<1x18x64xf32, #tpu.memory_space<vmem>>, vector<1x18x64xf32>
    %10 = vector.shape_cast %9 : vector<1x18x64xf32> to vector<18x64xf32>
    %11 = vector.shape_cast %8 : vector<18x64xf32> to vector<1x18x64xf32>
    tpu.vector_store %arg5[%c0_8, %c0_9, %c0_10], %11 {strides = array<i32>} : memref<1x18x64xf32, #tpu.memory_space<vmem>>, vector<1x18x64xf32>,
    return
  }
  func.func @transform_0(%arg0: i32, %arg1: i32) -> (i32, i32, i32) {
    %c0_i32 = arith.constant 0 : i32
    %c0_i32_0 = arith.constant 0 : i32
    return %arg0, %arg1, %c0_i32 : i32, i32, i32
  }
  func.func @transform_1(%arg0: i32, %arg1: i32) -> (i32, i32, i32) {
    %c0_i32 = arith.constant 0 : i32
    %c0_i32_0 = arith.constant 0 : i32
    %c0_i32_1 = arith.constant 0 : i32
    return %arg0, %c0_i32, %c0_i32_0 : i32, i32, i32
  }
  func.func @transform_2(%arg0: i32, %arg1: i32) -> (i32, i32, i32) {
    %c0_i32 = arith.constant 0 : i32
    %c0_i32_0 = arith.constant 0 : i32
    %c0_i32_1 = arith.constant 0 : i32
    return %arg0, %c0_i32, %c0_i32_0 : i32, i32, i32
  }
  func.func @transform_3(%arg0: i32, %arg1: i32) -> (i32, i32, i32) {
    %c0_i32 = arith.constant 0 : i32
    %c0_i32_0 = arith.constant 0 : i32
    return %arg0, %arg1, %c0_i32 : i32, i32, i32
  }
}

module attributes {stable_mosaic.version = 11 : i64} {
  func.func @_proj_quantize_kernel(%arg0: i32, %arg1: memref<1x32x48xbf16, #tpu.memory_space<vmem>>, %arg2: memref<1x48x16xbf16, #tpu.memory_space<vmem>>, %arg3: memref<1x1x16xf32, #tpu.memory_space<vmem>>, %arg4: memref<1x16x64xf32, #tpu.memory_space<vmem>>, %arg5: memref<1x64x16xf32, #tpu.memory_space<vmem>>, %arg6: memref<1x32x16xf32, #tpu.memory_space<vmem>>, %arg7: memref<1x1x1xf32, #tpu.memory_space<vmem>>) attributes {dimension_semantics = [#tpu.dimension_semantics<parallel>], iteration_bounds = array<i64: 2>, scalar_prefetch = 0 : i64, scratch_operands = 0 : i64, tpu.core_type = #tpu.core_type<tc>, window_params = [{transform_indices = @transform_0, window_bounds = array<i64: 1, 32, 48>}, {transform_indices = @transform_1, window_bounds = array<i64: 1, 48, 16>}, {transform_indices = @transform_2, window_bounds = array<i64: 1, 1, 16>}, {transform_indices = @transform_3, window_bounds = array<i64: 1, 16, 64>}, {transform_indices = @transform_4, window_bounds = array<i64: 1, 64, 16>}, {transform_indices = @transform_5, window_bounds = array<i64: 1, 32, 16>}, {transform_indices = @transform_6, window_bounds = array<i64: 1, 1, 1>}]} {
    %c0 = arith.constant 0 : index
    %c0_0 = arith.constant 0 : index
    %c0_1 = arith.constant 0 : index
    %0 = vector.load %arg1[%c0, %c0_0, %c0_1] : memref<1x32x48xbf16, #tpu.memory_space<vmem>>, vector<1x32x48xbf16>
    %1 = vector.shape_cast %0 : vector<1x32x48xbf16> to vector<32x48xbf16>
    %c0_2 = arith.constant 0 : index
    %c0_3 = arith.constant 0 : index
    %c0_4 = arith.constant 0 : index
    %2 = vector.load %arg2[%c0_2, %c0_3, %c0_4] : memref<1x48x16xbf16, #tpu.memory_space<vmem>>, vector<1x48x16xbf16>
    %3 = vector.shape_cast %2 : vector<1x48x16xbf16> to vector<48x16xbf16>
    %cst = arith.constant dense<0.000000e+00> : vector<32x16xf32>
    %4 = tpu.matmul %1, %3, %cst {dimension_numbers = #tpu.dot_dimension_numbers<[1], [0], [0], [1], [0, 0, 1, 1], [], []>} : vector<32x48xbf16>, vector<48x16xbf16>, vector<32x16xf32> -> vector<32x16xf32>
    %c0_5 = arith.constant 0 : index
    %c0_6 = arith.constant 0 : index
    %c0_7 = arith.constant 0 : index
    %5 = vector.load %arg3[%c0_5, %c0_6, %c0_7] : memref<1x1x16xf32, #tpu.memory_space<vmem>>, vector<1x1x16xf32>
    %6 = vector.shape_cast %5 : vector<1x1x16xf32> to vector<1x16xf32>
    %7 = vector.broadcast %6 : vector<1x16xf32> to vector<32x16xf32>
    %8 = arith.addf %4, %7 : vector<32x16xf32>
    %c0_8 = arith.constant 0 : index
    %c0_9 = arith.constant 0 : index
    %c0_10 = arith.constant 0 : index
    %9 = vector.load %arg4[%c0_8, %c0_9, %c0_10] : memref<1x16x64xf32, #tpu.memory_space<vmem>>, vector<1x16x64xf32>
    %10 = vector.shape_cast %9 : vector<1x16x64xf32> to vector<16x64xf32>
    %11 = arith.mulf %8, %8 : vector<32x16xf32>
    %cst_11 = arith.constant dense<0.000000e+00> : vector<32xf32>
    %12 = vector.multi_reduction <add>, %11, %cst_11 [1] : vector<32x16xf32> to vector<32xf32>
    %13 = vector.shape_cast %12 : vector<32xf32> to vector<32x1xf32>
    %cst_12 = arith.constant dense<0.000000e+00> : vector<32x64xf32>
    %14 = tpu.matmul %8, %10, %cst_12 {dimension_numbers = #tpu.dot_dimension_numbers<[1], [0], [0], [1], [0, 0, 1, 1], [], []>} : vector<32x16xf32>, vector<16x64xf32>, vector<32x64xf32> -> vector<32x64xf32>
    %cst_13 = arith.constant 2.000000e+00 : f32
    %15 = vector.broadcast %cst_13 : f32 to vector<32x64xf32>
    %16 = arith.mulf %15, %14 : vector<32x64xf32>
    %17 = vector.broadcast %13 : vector<32x1xf32> to vector<32x64xf32>
    %18 = arith.subf %17, %16 : vector<32x64xf32>
    %19 = arith.mulf %10, %10 : vector<16x64xf32>
    %cst_14 = arith.constant dense<0.000000e+00> : vector<64xf32>
    %20 = vector.multi_reduction <add>, %19, %cst_14 [0] : vector<16x64xf32> to vector<64xf32>
    %21 = vector.shape_cast %20 : vector<64xf32> to vector<1x64xf32>
    %22 = vector.broadcast %21 : vector<1x64xf32> to vector<32x64xf32>
    %23 = arith.addf %18, %22 : vector<32x64xf32>
    %24 = tpu.iota {dimensions = array<i32: 1>} : vector<32x64xi32>
    %cst_15 = arith.constant dense<0x7F800000> : vector<32xf32>
    %25 = vector.multi_reduction <minimumf>, %23, %cst_15 [1] : vector<32x64xf32> to vector<32xf32>
    %26 = vector.shape_cast %25 : vector<32xf32> to vector<32x1xf32>
    %27 = vector.broadcast %26 : vector<32x1xf32> to vector<32x64xf32>
    %28 = arith.cmpf oeq, %23, %27 : vector<32x64xf32>
    %c64_i32 = arith.constant 64 : i32
    %29 = vector.broadcast %c64_i32 : i32 to vector<32x64xi32>
    %30 = arith.select %28, %24, %29 : vector<32x64xi1>, vector<32x64xi32>
    %cst_16 = arith.constant dense<2147483647> : vector<32xi32>
    %31 = vector.multi_reduction <minsi>, %30, %cst_16 [1] : vector<32x64xi32> to vector<32xi32>
    %32 = vector.shape_cast %31 : vector<32xi32> to vector<32x1xi32>
    %33 = vector.broadcast %32 : vector<32x1xi32> to vector<32x64xi32>
    %34 = arith.cmpi eq, %24, %33 : vector<32x64xi32>
    %35 = arith.extui %34 : vector<32x64xi1> to vector<32x64xi32>
    %36 = arith.sitofp %35 : vector<32x64xi32> to vector<32x64xf32>
    %c0_17 = arith.constant 0 : index
    %c0_18 = arith.constant 0 : index
    %c0_19 = arith.constant 0 : index
    %37 = vector.load %arg5[%c0_17, %c0_18, %c0_19] : memref<1x64x16xf32, #tpu.memory_space<vmem>>, vector<1x64x16xf32>
    %38 = vector.shape_cast %37 : vector<1x64x16xf32> to vector<64x16xf32>
    %cst_20 = arith.constant dense<0.000000e+00> : vector<32x16xf32>
    %39 = tpu.matmul %36, %38, %cst_20 {dimension_numbers = #tpu.dot_dimension_numbers<[1], [0], [0], [1], [0, 0, 1, 1], [], []>} : vector<32x64xf32>, vector<64x16xf32>, vector<32x16xf32> -> vector<32x16xf32>
    %c0_21 = arith.constant 0 : index
    %c0_22 = arith.constant 0 : index
    %c0_23 = arith.constant 0 : index
    %40 = vector.load %arg6[%c0_21, %c0_22, %c0_23] : memref<1x32x16xf32, #tpu.memory_space<vmem>>, vector<1x32x16xf32>
    %41 = vector.shape_cast %40 : vector<1x32x16xf32> to vector<32x16xf32>
    %42 = vector.shape_cast %39 : vector<32x16xf32> to vector<1x32x16xf32>
    tpu.vector_store %arg6[%c0_21, %c0_22, %c0_23], %42 {strides = array<i32>} : memref<1x32x16xf32, #tpu.memory_space<vmem>>, vector<1x32x16xf32>,
    %43 = arith.subf %39, %8 : vector<32x16xf32>
    %44 = arith.mulf %43, %43 : vector<32x16xf32>
    %cst_24 = arith.constant dense<0.000000e+00> : vector<32xf32>
    %45 = vector.multi_reduction <add>, %44, %cst_24 [1] : vector<32x16xf32> to vector<32xf32>
    %46 = vector.shape_cast %45 : vector<32xf32> to vector<32x1xf32>
    %cst_25 = arith.constant dense<0.000000e+00> : vector<1xf32>
    %47 = vector.multi_reduction <add>, %46, %cst_25 [0] : vector<32x1xf32> to vector<1xf32>
    %48 = vector.shape_cast %47 : vector<1xf32> to vector<1x1xf32>
    %cst_26 = arith.constant 5.120000e+02 : f32
    %49 = vector.broadcast %cst_26 : f32 to vector<1x1xf32>
    %50 = arith.divf %48, %49 : vector<1x1xf32>
    %c0_27 = arith.constant 0 : index
    %c0_28 = arith.constant 0 : index
    %c0_29 = arith.constant 0 : index
    %51 = vector.load %arg7[%c0_27, %c0_28, %c0_29] : memref<1x1x1xf32, #tpu.memory_space<vmem>>, vector<1x1x1xf32>
    %52 = vector.shape_cast %51 : vector<1x1x1xf32> to vector<1x1xf32>
    %53 = vector.shape_cast %50 : vector<1x1xf32> to vector<1x1x1xf32>
    tpu.vector_store %arg7[%c0_27, %c0_28, %c0_29], %53 {strides = array<i32>} : memref<1x1x1xf32, #tpu.memory_space<vmem>>, vector<1x1x1xf32>,
    return
  }
  func.func @transform_0(%arg0: i32) -> (i32, i32, i32) {
    %c0_i32 = arith.constant 0 : i32
    %c0_i32_0 = arith.constant 0 : i32
    %c0_i32_1 = arith.constant 0 : i32
    return %arg0, %c0_i32, %c0_i32_0 : i32, i32, i32
  }
  func.func @transform_1(%arg0: i32) -> (i32, i32, i32) {
    %c0_i32 = arith.constant 0 : i32
    %c0_i32_0 = arith.constant 0 : i32
    %c0_i32_1 = arith.constant 0 : i32
    return %arg0, %c0_i32, %c0_i32_0 : i32, i32, i32
  }
  func.func @transform_2(%arg0: i32) -> (i32, i32, i32) {
    %c0_i32 = arith.constant 0 : i32
    %c0_i32_0 = arith.constant 0 : i32
    %c0_i32_1 = arith.constant 0 : i32
    return %arg0, %c0_i32, %c0_i32_0 : i32, i32, i32
  }
  func.func @transform_3(%arg0: i32) -> (i32, i32, i32) {
    %c0_i32 = arith.constant 0 : i32
    %c0_i32_0 = arith.constant 0 : i32
    %c0_i32_1 = arith.constant 0 : i32
    return %arg0, %c0_i32, %c0_i32_0 : i32, i32, i32
  }
  func.func @transform_4(%arg0: i32) -> (i32, i32, i32) {
    %c0_i32 = arith.constant 0 : i32
    %c0_i32_0 = arith.constant 0 : i32
    %c0_i32_1 = arith.constant 0 : i32
    return %arg0, %c0_i32, %c0_i32_0 : i32, i32, i32
  }
  func.func @transform_5(%arg0: i32) -> (i32, i32, i32) {
    %c0_i32 = arith.constant 0 : i32
    %c0_i32_0 = arith.constant 0 : i32
    %c0_i32_1 = arith.constant 0 : i32
    return %arg0, %c0_i32, %c0_i32_0 : i32, i32, i32
  }
  func.func @transform_6(%arg0: i32) -> (i32, i32, i32) {
    %c0_i32 = arith.constant 0 : i32
    %c0_i32_0 = arith.constant 0 : i32
    %c0_i32_1 = arith.constant 0 : i32
    return %arg0, %c0_i32, %c0_i32_0 : i32, i32, i32
  }
}

module attributes {stable_mosaic.version = 11 : i64} {
  func.func @_gmm_kernel(%arg0: i32, %arg1: i32, %arg2: memref<1x50x128xbf16, #tpu.memory_space<vmem>>, %arg3: memref<1x128x64xbf16, #tpu.memory_space<vmem>>, %arg4: memref<1x1x64xf32, #tpu.memory_space<vmem>>, %arg5: memref<1x50x64xf32, #tpu.memory_space<vmem>>) attributes {dimension_semantics = [#tpu.dimension_semantics<parallel>, #tpu.dimension_semantics<parallel>], iteration_bounds = array<i64: 2, 1>, scalar_prefetch = 0 : i64, scratch_operands = 0 : i64, tpu.core_type = #tpu.core_type<tc>, window_params = [{transform_indices = @transform_0, window_bounds = array<i64: 1, 50, 128>}, {transform_indices = @transform_1, window_bounds = array<i64: 1, 128, 64>}, {transform_indices = @transform_2, window_bounds = array<i64: 1, 1, 64>}, {transform_indices = @transform_3, window_bounds = array<i64: 1, 50, 64>}]} {
    %c0 = arith.constant 0 : index
    %c0_0 = arith.constant 0 : index
    %c0_1 = arith.constant 0 : index
    %0 = vector.load %arg2[%c0, %c0_0, %c0_1] : memref<1x50x128xbf16, #tpu.memory_space<vmem>>, vector<1x50x128xbf16>
    %1 = vector.shape_cast %0 : vector<1x50x128xbf16> to vector<50x128xbf16>
    %c0_2 = arith.constant 0 : index
    %c0_3 = arith.constant 0 : index
    %c0_4 = arith.constant 0 : index
    %2 = vector.load %arg3[%c0_2, %c0_3, %c0_4] : memref<1x128x64xbf16, #tpu.memory_space<vmem>>, vector<1x128x64xbf16>
    %3 = vector.shape_cast %2 : vector<1x128x64xbf16> to vector<128x64xbf16>
    %cst = arith.constant dense<0.000000e+00> : vector<50x64xf32>
    %4 = tpu.matmul %1, %3, %cst {dimension_numbers = #tpu.dot_dimension_numbers<[1], [0], [0], [1], [0, 0, 1, 1], [], []>} : vector<50x128xbf16>, vector<128x64xbf16>, vector<50x64xf32> -> vector<50x64xf32>
    %c0_5 = arith.constant 0 : index
    %c0_6 = arith.constant 0 : index
    %c0_7 = arith.constant 0 : index
    %5 = vector.load %arg4[%c0_5, %c0_6, %c0_7] : memref<1x1x64xf32, #tpu.memory_space<vmem>>, vector<1x1x64xf32>
    %6 = vector.shape_cast %5 : vector<1x1x64xf32> to vector<1x64xf32>
    %7 = vector.broadcast %6 : vector<1x64xf32> to vector<50x64xf32>
    %8 = arith.addf %4, %7 : vector<50x64xf32>
    %cst_8 = arith.constant 0.000000e+00 : f32
    %9 = vector.broadcast %cst_8 : f32 to vector<50x64xf32>
    %10 = arith.maximumf %8, %9 : vector<50x64xf32>
    %c0_9 = arith.constant 0 : index
    %c0_10 = arith.constant 0 : index
    %c0_11 = arith.constant 0 : index
    %11 = vector.load %arg5[%c0_9, %c0_10, %c0_11] : memref<1x50x64xf32, #tpu.memory_space<vmem>>, vector<1x50x64xf32>
    %12 = vector.shape_cast %11 : vector<1x50x64xf32> to vector<50x64xf32>
    %13 = vector.shape_cast %10 : vector<50x64xf32> to vector<1x50x64xf32>
    tpu.vector_store %arg5[%c0_9, %c0_10, %c0_11], %13 {strides = array<i32>} : memref<1x50x64xf32, #tpu.memory_space<vmem>>, vector<1x50x64xf32>,
    return
  }
  func.func @transform_0(%arg0: i32, %arg1: i32) -> (i32, i32, i32) {
    %c0_i32 = arith.constant 0 : i32
    %c0_i32_0 = arith.constant 0 : i32
    return %arg0, %arg1, %c0_i32 : i32, i32, i32
  }
  func.func @transform_1(%arg0: i32, %arg1: i32) -> (i32, i32, i32) {
    %c0_i32 = arith.constant 0 : i32
    %c0_i32_0 = arith.constant 0 : i32
    %c0_i32_1 = arith.constant 0 : i32
    return %arg0, %c0_i32, %c0_i32_0 : i32, i32, i32
  }
  func.func @transform_2(%arg0: i32, %arg1: i32) -> (i32, i32, i32) {
    %c0_i32 = arith.constant 0 : i32
    %c0_i32_0 = arith.constant 0 : i32
    %c0_i32_1 = arith.constant 0 : i32
    return %arg0, %c0_i32, %c0_i32_0 : i32, i32, i32
  }
  func.func @transform_3(%arg0: i32, %arg1: i32) -> (i32, i32, i32) {
    %c0_i32 = arith.constant 0 : i32
    %c0_i32_0 = arith.constant 0 : i32
    return %arg0, %arg1, %c0_i32 : i32, i32, i32
  }
}

module attributes {stable_mosaic.version = 11 : i64} {
  func.func @_gmm_kernel(%arg0: i32, %arg1: i32, %arg2: memref<1x162x64xbf16, #tpu.memory_space<vmem>>, %arg3: memref<1x64x12xbf16, #tpu.memory_space<vmem>>, %arg4: memref<1x1x12xf32, #tpu.memory_space<vmem>>, %arg5: memref<1x162x12xf32, #tpu.memory_space<vmem>>) attributes {dimension_semantics = [#tpu.dimension_semantics<parallel>, #tpu.dimension_semantics<parallel>], iteration_bounds = array<i64: 2, 1>, scalar_prefetch = 0 : i64, scratch_operands = 0 : i64, tpu.core_type = #tpu.core_type<tc>, window_params = [{transform_indices = @transform_0, window_bounds = array<i64: 1, 162, 64>}, {transform_indices = @transform_1, window_bounds = array<i64: 1, 64, 12>}, {transform_indices = @transform_2, window_bounds = array<i64: 1, 1, 12>}, {transform_indices = @transform_3, window_bounds = array<i64: 1, 162, 12>}]} {
    %c0 = arith.constant 0 : index
    %c0_0 = arith.constant 0 : index
    %c0_1 = arith.constant 0 : index
    %0 = vector.load %arg2[%c0, %c0_0, %c0_1] : memref<1x162x64xbf16, #tpu.memory_space<vmem>>, vector<1x162x64xbf16>
    %1 = vector.shape_cast %0 : vector<1x162x64xbf16> to vector<162x64xbf16>
    %c0_2 = arith.constant 0 : index
    %c0_3 = arith.constant 0 : index
    %c0_4 = arith.constant 0 : index
    %2 = vector.load %arg3[%c0_2, %c0_3, %c0_4] : memref<1x64x12xbf16, #tpu.memory_space<vmem>>, vector<1x64x12xbf16>
    %3 = vector.shape_cast %2 : vector<1x64x12xbf16> to vector<64x12xbf16>
    %cst = arith.constant dense<0.000000e+00> : vector<162x12xf32>
    %4 = tpu.matmul %1, %3, %cst {dimension_numbers = #tpu.dot_dimension_numbers<[1], [0], [0], [1], [0, 0, 1, 1], [], []>} : vector<162x64xbf16>, vector<64x12xbf16>, vector<162x12xf32> -> vector<162x12xf32>
    %c0_5 = arith.constant 0 : index
    %c0_6 = arith.constant 0 : index
    %c0_7 = arith.constant 0 : index
    %5 = vector.load %arg4[%c0_5, %c0_6, %c0_7] : memref<1x1x12xf32, #tpu.memory_space<vmem>>, vector<1x1x12xf32>
    %6 = vector.shape_cast %5 : vector<1x1x12xf32> to vector<1x12xf32>
    %7 = vector.broadcast %6 : vector<1x12xf32> to vector<162x12xf32>
    %8 = arith.addf %4, %7 : vector<162x12xf32>
    %c0_8 = arith.constant 0 : index
    %c0_9 = arith.constant 0 : index
    %c0_10 = arith.constant 0 : index
    %9 = vector.load %arg5[%c0_8, %c0_9, %c0_10] : memref<1x162x12xf32, #tpu.memory_space<vmem>>, vector<1x162x12xf32>
    %10 = vector.shape_cast %9 : vector<1x162x12xf32> to vector<162x12xf32>
    %11 = vector.shape_cast %8 : vector<162x12xf32> to vector<1x162x12xf32>
    tpu.vector_store %arg5[%c0_8, %c0_9, %c0_10], %11 {strides = array<i32>} : memref<1x162x12xf32, #tpu.memory_space<vmem>>, vector<1x162x12xf32>,
    return
  }
  func.func @transform_0(%arg0: i32, %arg1: i32) -> (i32, i32, i32) {
    %c0_i32 = arith.constant 0 : i32
    %c0_i32_0 = arith.constant 0 : i32
    return %arg0, %arg1, %c0_i32 : i32, i32, i32
  }
  func.func @transform_1(%arg0: i32, %arg1: i32) -> (i32, i32, i32) {
    %c0_i32 = arith.constant 0 : i32
    %c0_i32_0 = arith.constant 0 : i32
    %c0_i32_1 = arith.constant 0 : i32
    return %arg0, %c0_i32, %c0_i32_0 : i32, i32, i32
  }
  func.func @transform_2(%arg0: i32, %arg1: i32) -> (i32, i32, i32) {
    %c0_i32 = arith.constant 0 : i32
    %c0_i32_0 = arith.constant 0 : i32
    %c0_i32_1 = arith.constant 0 : i32
    return %arg0, %c0_i32, %c0_i32_0 : i32, i32, i32
  }
  func.func @transform_3(%arg0: i32, %arg1: i32) -> (i32, i32, i32) {
    %c0_i32 = arith.constant 0 : i32
    %c0_i32_0 = arith.constant 0 : i32
    return %arg0, %arg1, %c0_i32 : i32, i32, i32
  }
}

</mosaic_0001>

<bundles_post_ra>
// kernel: unif_model_forward.21
= control target key start
LH: loop header
LB: loop body
LE: loop exit
PB: predicated region body
PF: predicated region fallthrough
CT: control target
= control target key end

     0   :  { %s748_s12 = smov 0   ;;  %s750_s13 = smov 0   ;;  %s845_s0 = inlined_call_operand.vmem [shape: bf16[2,128,48], index: 0, kind: input, shape index: {}]   ;;  %s846_s1 = inlined_call_operand.vmem [shape: bf16[2,48,16], index: 1, kind: input, shape index: {}]   ;;  %s847_s2 = inlined_call_operand.vmem [shape: f32[2,1,16], index: 2, kind: input, shape index: {}]   ;;  %s848_s3 = inlined_call_operand.vmem [shape: f32[2,128,16], index: 3, kind: output, shape index: {}]  }
   0x1   :  { %s752_s14 = smov 0  }
   0x2 LB: > { %s25_s15 = sadd.s32 1, %s722_s13  ;;  %p599_p0 = scmp.ge.s32.totalorder %s726_s14, 1  ;;  %s726_s14 = sphi %s752_s14, %s13_s14   ;;  %s722_s13 = sphi %s750_s13, %s850_s13   ;;  %s718_s12 = sphi %s748_s12, %s849_s12  }
   0x3   : > { %p27_p1 = scmp.ge.s32.totalorder %s25_s15, 2  ;;  %p176_p2 = scmp.lt.s32.totalorder %s726_s14, 3 }
   0x5   : > { %s852_s15 = smov (%p27_p1, %s25_s15), 0  ;;  %p177_p3 = pnand %p599_p0, %p176_p2 }
   0x6   : > { %p217_p4 = scmp.lt.s32.totalorder (!%p177_p3), %s718_s12, 1  ;;  %vm332_vm0 = vcmask (!%p177_p3), 392192   ;;  %vm470_vm1 = vcmask (!%p177_p3), 130048  }
   0x7   : > { %180 = sbr.rel (%p177_p3) target bundleno = 259 (0x103), region = 32 }
   0xe   : > { %s854_s12 = smov (!%p217_p4, %s718_s12), 1 }
   0xf   : > { %s627_s16 = sshll.u32 %s854_s12, 6  ;;  %s668_s17 = smul.u32 24, %s854_s12 }
  0x10   : > { %s773_s20 = scalar_lea.vmem %s845_s0, %s627_s16  ;;  %s233_s26 = scalar_lea.vmem %s847_s2, %s854_s12 }
  0x11   : > { %s230_s23 = scalar_lea.vmem %s846_s1, %s668_s17  ;;  %v696_v0 = vld [vmem:[%s773_s20] sm:$0xff]   ;;  %v698_v5 = vld [vmem:[%s773_s20 + $0x8] sm:$0xff]   ;;  %v700_v7 = vld [vmem:[%s773_s20 + $0x10] sm:$0xff]   ;;  %s628_s27 = sshll.u32 %s854_s12, 7 }
  0x12   : > { %v693_v1 = vld [vmem:[%s230_s23] sm:$0xff]   ;;  %v694_v2 = vld [vmem:[%s230_s23 + $0x8] sm:$0xff]   ;;  %646 = vmatprep.mubr.msk.bf16.mxu0 %vm332_vm0, %v696_v0  ;;  %v695_v3 = vld [vmem:[%s230_s23 + $0x10] sm:$0xff]   ;;  %s802_s30 = scalar_lea.vmem %s848_s3, %s628_s27 }
  0x13   : > { %640 = vmatprep.subr.bf16.mxu0 %v693_v1  ;;  %662 = vmatprep.subr.bf16.mxu1 %v693_v1  ;;  %v697_v4 = vld [vmem:[%s773_s20 + $0x20] sm:$0xff]   ;;  %v699_v6 = vld [vmem:[%s773_s20 + $0x28] sm:$0xff]   ;;  %v701_v8 = vld [vmem:[%s773_s20 + $0x30] sm:$0xff]  }
  0x14   : > { %641 = vmatpush3.bf16.msra.mxu0 %v693_v1  ;;  %665 = vmatpush3.bf16.msra.mxu1 %v693_v1  ;;  %v702_v9 = vld [vmem:[%s773_s20 + $0x18] sm:$0xff]   ;;  %v605_v11 = vld [vmem:[%s233_s26] ss:$0 sm:$0xff] }
  0x15   : > { %642 = vmatprep.subr.bf16.mxu0 %v694_v2  ;;  %663 = vmatprep.subr.bf16.mxu1 %v694_v2  ;;  %v703_v10 = vld [vmem:[%s773_s20 + $0x38] sm:$0xff]  }
  0x16   : > { %654 = vmatprep.mubr.msk.bf16.mxu1 %vm332_vm0, %v697_v4 }
  0x18   : > { %643 = vmatpush3.bf16.msra.mxu0 %v694_v2  ;;  %666 = vmatpush3.bf16.msra.mxu1 %v694_v2 }
  0x19   : > { %644 = vmatprep.subr.bf16.mxu0 %v695_v3  ;;  %664 = vmatprep.subr.bf16.mxu1 %v695_v3 }
  0x1c   : > { %645 = vmatpush3.bf16.msra.mxu0 %v695_v3  ;;  %667 = vmatpush3.bf16.msra.mxu1 %v695_v3 }
  0x1f   : > { %647 = vmatmul.mubr.msk.bf16.vlgmr.msra.gmra.mrb[0].mxu0 %vm332_vm0, %v698_v5  ;;  %655 = vmatmul.mubr.msk.bf16.vlgmr.msra.gmra.mrb[0].mxu1 %vm332_vm0, %v699_v6 }
  0x20   : > { %650 = vmatprep.mubr.msk.bf16.mxu0 %vm332_vm0, %v700_v7  ;;  %658 = vmatprep.mubr.msk.bf16.mxu1 %vm332_vm0, %v701_v8 }
  0x27   : > { %651 = vmatmul.mubr.msk.bf16.gmra.mrb[4].mxu0 %vm332_vm0, %v702_v9  ;;  %659 = vmatmul.mubr.msk.bf16.gmra.mrb[4].mxu1 %vm332_vm0, %v703_v10 }
  0xf2   : > { %v648_v12 = vpop.f32.mrb[0].mxu0  ;;  %v656_v13 = vpop.f32.mrb[0].mxu1 }
  0xf3   : > { %v400_v14 = vadd.f32 %v648_v12, %v605_v11  ;;  %v432_v15 = vadd.f32 %v656_v13, %v605_v11  ;;  %v391_v16 = vpop.f32.mrb[1].mxu0  ;;  %v423_v17 = vpop.f32.mrb[1].mxu1 }
  0xf4   : > { %v392_v18 = vadd.f32 %v605_v11, %v391_v16  ;;  %v424_v19 = vadd.f32 %v605_v11, %v423_v17  ;;  %v649_v20 = vpop.f32.mrb[2].mxu0  ;;  %v657_v21 = vpop.f32.mrb[2].mxu1 }
  0xf5   : > { %v456_v22 = vmax.f32 %v400_v14, 0.0  ;;  %v464_v23 = vmax.f32 %v432_v15, 0.0  ;;  %v403_v24 = vadd.f32 %v649_v20, %v605_v11  ;;  %v435_v25 = vadd.f32 %v657_v21, %v605_v11  ;;  %v394_v26 = vpop.f32.mrb[3].mxu0  ;;  %v426_v27 = vpop.f32.mrb[3].mxu1 }
  0xf6   : > { %v454_v28 = vmax.f32 %v392_v18, 0.0  ;;  %v462_v29 = vmax.f32 %v424_v19, 0.0  ;;  %v395_v30 = vadd.f32 %v605_v11, %v394_v26  ;;  %v427_v31 = vadd.f32 %v605_v11, %v426_v27 }
  0xf7   : > { %473 = vst.msk [vmem:[%s802_s30 + $0x10] sm:$0xff] %vm470_vm1, %v456_v22  ;;  %481 = vst.msk [vmem:[%s802_s30 + $0x50] sm:$0xff] %vm470_vm1, %v464_v23  ;;  %v457_v32 = vmax.f32 %v403_v24, 0.0  ;;  %v465_v33 = vmax.f32 %v435_v25, 0.0 }
  0xf8   : > { %471 = vst.msk [vmem:[%s802_s30] sm:$0xff] %vm470_vm1, %v454_v28  ;;  %479 = vst.msk [vmem:[%s802_s30 + $0x40] sm:$0xff] %vm470_vm1, %v462_v29  ;;  %v455_v34 = vmax.f32 %v395_v30, 0.0  ;;  %v463_v35 = vmax.f32 %v427_v31, 0.0 }
  0xf9   : > { %474 = vst.msk [vmem:[%s802_s30 + $0x18] sm:$0xff] %vm470_vm1, %v457_v32  ;;  %482 = vst.msk [vmem:[%s802_s30 + $0x58] sm:$0xff] %vm470_vm1, %v465_v33 }
  0xfa   : > { %472 = vst.msk [vmem:[%s802_s30 + $0x8] sm:$0xff] %vm470_vm1, %v455_v34  ;;  %480 = vst.msk [vmem:[%s802_s30 + $0x48] sm:$0xff] %vm470_vm1, %v463_v35  ;;  %v652_v36 = vpop.f32.mrb[4].mxu0  ;;  %v660_v37 = vpop.f32.mrb[4].mxu1 }
  0xfb   : > { %v416_v38 = vadd.f32 %v652_v36, %v605_v11  ;;  %v448_v39 = vadd.f32 %v660_v37, %v605_v11  ;;  %v407_v40 = vpop.f32.mrb[5].mxu0  ;;  %v439_v41 = vpop.f32.mrb[5].mxu1 }
  0xfc   : > { %v408_v42 = vadd.f32 %v605_v11, %v407_v40  ;;  %v440_v43 = vadd.f32 %v605_v11, %v439_v41  ;;  %v653_v44 = vpop.f32.mrb[6].mxu0  ;;  %v661_v45 = vpop.f32.mrb[6].mxu1 }
  0xfd   : > { %v460_v46 = vmax.f32 %v416_v38, 0.0  ;;  %v468_v47 = vmax.f32 %v448_v39, 0.0  ;;  %v419_v48 = vadd.f32 %v653_v44, %v605_v11  ;;  %v451_v49 = vadd.f32 %v661_v45, %v605_v11  ;;  %v410_v50 = vpop.f32.mrb[7].mxu0  ;;  %v442_v51 = vpop.f32.mrb[7].mxu1 }
  0xfe   : > { %v458_v52 = vmax.f32 %v408_v42, 0.0  ;;  %v466_v53 = vmax.f32 %v440_v43, 0.0  ;;  %v411_v54 = vadd.f32 %v605_v11, %v410_v50  ;;  %v443_v55 = vadd.f32 %v605_v11, %v442_v51 }
  0xff   : > { %477 = vst.msk [vmem:[%s802_s30 + $0x30] sm:$0xff] %vm470_vm1, %v460_v46  ;;  %485 = vst.msk [vmem:[%s802_s30 + $0x70] sm:$0xff] %vm470_vm1, %v468_v47  ;;  %v461_v56 = vmax.f32 %v419_v48, 0.0  ;;  %v469_v57 = vmax.f32 %v451_v49, 0.0 }
 0x100   : > { %475 = vst.msk [vmem:[%s802_s30 + $0x20] sm:$0xff] %vm470_vm1, %v458_v52  ;;  %483 = vst.msk [vmem:[%s802_s30 + $0x60] sm:$0xff] %vm470_vm1, %v466_v53  ;;  %v459_v58 = vmax.f32 %v411_v54, 0.0  ;;  %v467_v59 = vmax.f32 %v443_v55, 0.0 }
 0x101   : > { %478 = vst.msk [vmem:[%s802_s30 + $0x38] sm:$0xff] %vm470_vm1, %v461_v56  ;;  %486 = vst.msk [vmem:[%s802_s30 + $0x78] sm:$0xff] %vm470_vm1, %v469_v57 }
 0x102   : > { %476 = vst.msk [vmem:[%s802_s30 + $0x28] sm:$0xff] %vm470_vm1, %v459_v58  ;;  %484 = vst.msk [vmem:[%s802_s30 + $0x68] sm:$0xff] %vm470_vm1, %v467_v59 }
 0x103 PF: > { %s13_s14 = sadd.s32 1, %s726_s14   ;;  %s849_s12 = smov %s722_s13 }
 0x104   : > { %p10_p5 = scmp.ge.s32.totalorder %s13_s14, 4   ;;  %s850_s13 = smov %s852_s15 }
 0x106   :  { %12 = sbr.rel (!%p10_p5) target bundleno = 2 (0x2), region = 68 }

// kernel: unif_model_forward.22
= control target key start
LH: loop header
LB: loop body
LE: loop exit
PB: predicated region body
PF: predicated region fallthrough
CT: control target
= control target key end

     0   :  { %s747_s12 = smov 0   ;;  %s749_s13 = smov 0   ;;  %s813_s0 = inlined_call_operand.vmem [shape: bf16[2,32,256], index: 0, kind: input, shape index: {}]   ;;  %s814_s1 = inlined_call_operand.vmem [shape: bf16[2,256,32], index: 1, kind: input, shape index: {}]   ;;  %s815_s2 = inlined_call_operand.vmem [shape: f32[2,1,32], index: 2, kind: input, shape index: {}]   ;;  %s816_s3 = inlined_call_operand.vmem [shape: f32[2,32,32], index: 3, kind: output, shape index: {}]  }
   0x1   :  { %s751_s14 = smov 0  }
   0x2 LB: > { %s25_s15 = sadd.s32 1, %s721_s13  ;;  %p580_p0 = scmp.ge.s32.totalorder %s725_s14, 1  ;;  %s725_s14 = sphi %s751_s14, %s13_s14   ;;  %s721_s13 = sphi %s749_s13, %s818_s13   ;;  %s717_s12 = sphi %s747_s12, %s817_s12  }
   0x3   : > { %p27_p1 = scmp.ge.s32.totalorder %s25_s15, 2  ;;  %p177_p2 = scmp.lt.s32.totalorder %s725_s14, 3 }
   0x5   : > { %s820_s15 = smov (%p27_p1, %s25_s15), 0  ;;  %p178_p3 = pnand %p580_p0, %p177_p2 }
   0x6   : > { %p219_p4 = scmp.lt.s32.totalorder (!%p178_p3), %s717_s12, 1  ;;  %vm460_vm0 = vcmask (!%p178_p3), 261120  }
   0x7   : > { %181 = sbr.rel (%p178_p3) target bundleno = 272 (0x110), region = 32 }
   0xe   : > { %s822_s12 = smov (!%p219_p4, %s717_s12), 1 }
   0xf   : > { %s611_s16 = sshll.u32 %s822_s12, 7  ;;  %s610_s20 = sshll.u32 %s822_s12, 5 }
  0x10   : > { %s771_s19 = scalar_lea.vmem %s814_s1, %s611_s16  ;;  %s227_s23 = scalar_lea.vmem %s813_s0, %s610_s20 }
  0x11   : > { %v681_v0 = vld [vmem:[%s771_s19 + $0x40] sm:$0xff]   ;;  %v683_v2 = vld [vmem:[%s771_s19 + $0x48] sm:$0xff]   ;;  %v685_v4 = vld [vmem:[%s771_s19 + $0x50] sm:$0xff]   ;;  %s236_s26 = scalar_lea.vmem %s815_s2, %s822_s12  ;;  %s245_s29 = scalar_lea.vmem %s816_s3, %s610_s20 }
  0x12   : > { %v682_v1 = vld [vmem:[%s771_s19] sm:$0xff]   ;;  %613 = vmatprep.subr.bf16.mxu0 %v681_v0  ;;  %641 = vmatprep.subr.bf16.mxu1 %v681_v0  ;;  %v684_v3 = vld [vmem:[%s771_s19 + $0x8] sm:$0xff]   ;;  %v686_v5 = vld [vmem:[%s771_s19 + $0x10] sm:$0xff]  }
  0x13   : > { %614 = vmatpush3.bf16.msra.mxu0 %v682_v1  ;;  %649 = vmatpush3.bf16.msra.mxu1 %v682_v1  ;;  %v687_v6 = vld [vmem:[%s771_s19 + $0x58] sm:$0xff]   ;;  %v689_v8 = vld [vmem:[%s771_s19 + $0x60] sm:$0xff]   ;;  %v691_v10 = vld [vmem:[%s771_s19 + $0x68] sm:$0xff]  }
  0x14   : > { %615 = vmatprep.subr.bf16.mxu0 %v683_v2  ;;  %642 = vmatprep.subr.bf16.mxu1 %v683_v2  ;;  %v688_v7 = vld [vmem:[%s771_s19 + $0x18] sm:$0xff]   ;;  %v690_v9 = vld [vmem:[%s771_s19 + $0x20] sm:$0xff]   ;;  %v692_v13 = vld [vmem:[%s771_s19 + $0x28] sm:$0xff]  }
  0x15   : > { %v699_v11 = vld [vmem:[%s227_s23 + $0x4] ss:$8 sps:$4 sm:$0xff]   ;;  %v702_v12 = vld [vmem:[%s227_s23 + $0x14] ss:$8 sps:$4 sm:$0xff]   ;;  %v697_v18 = vld [vmem:[%s227_s23] ss:$8 sps:$4 sm:$0xff]  }
  0x16   : > { %v693_v14 = vld [vmem:[%s771_s19 + $0x70] sm:$0xff]   ;;  %439 = vmatprep.mubr.bf16.mxu0 %v699_v11  ;;  %447 = vmatprep.mubr.bf16.mxu1 %v702_v12  ;;  %v695_v16 = vld [vmem:[%s771_s19 + $0x78] sm:$0xff]   ;;  %v587_v22 = vld [vmem:[%s236_s26] ss:$0 sm:$0xff] }
  0x17   : > { %616 = vmatpush3.bf16.msra.mxu0 %v684_v3  ;;  %650 = vmatpush3.bf16.msra.mxu1 %v684_v3  ;;  %v694_v15 = vld [vmem:[%s771_s19 + $0x30] sm:$0xff]   ;;  %v696_v17 = vld [vmem:[%s771_s19 + $0x38] sm:$0xff]  }
  0x18   : > { %617 = vmatprep.subr.bf16.mxu0 %v685_v4  ;;  %643 = vmatprep.subr.bf16.mxu1 %v685_v4  ;;  %v700_v19 = vld [vmem:[%s227_s23 + $0x10] ss:$8 sps:$4 sm:$0xff]  }
  0x1b   : > { %618 = vmatpush3.bf16.msra.mxu0 %v686_v5  ;;  %651 = vmatpush3.bf16.msra.mxu1 %v686_v5 }
  0x1c   : > { %619 = vmatprep.subr.bf16.mxu0 %v687_v6  ;;  %644 = vmatprep.subr.bf16.mxu1 %v687_v6 }
  0x1f   : > { %620 = vmatpush3.bf16.msra.mxu0 %v688_v7  ;;  %652 = vmatpush3.bf16.msra.mxu1 %v688_v7 }
  0x20   : > { %621 = vmatprep.subr.bf16.mxu0 %v689_v8  ;;  %645 = vmatprep.subr.bf16.mxu1 %v689_v8 }
  0x23   : > { %622 = vmatpush3.bf16.msra.mxu0 %v690_v9  ;;  %653 = vmatpush3.bf16.msra.mxu1 %v690_v9 }
  0x24   : > { %623 = vmatprep.subr.bf16.mxu0 %v691_v10  ;;  %646 = vmatprep.subr.bf16.mxu1 %v691_v10 }
  0x27   : > { %624 = vmatpush3.bf16.msra.mxu0 %v692_v13  ;;  %654 = vmatpush3.bf16.msra.mxu1 %v692_v13 }
  0x28   : > { %625 = vmatprep.subr.bf16.mxu0 %v693_v14  ;;  %647 = vmatprep.subr.bf16.mxu1 %v693_v14 }
  0x2b   : > { %626 = vmatpush3.bf16.msra.mxu0 %v694_v15  ;;  %655 = vmatpush3.bf16.msra.mxu1 %v694_v15 }
  0x2c   : > { %627 = vmatprep.subr.bf16.mxu0 %v695_v16  ;;  %648 = vmatprep.subr.bf16.mxu1 %v695_v16 }
  0x2f   : > { %628 = vmatpush3.bf16.msra.mxu0 %v696_v17  ;;  %656 = vmatpush3.bf16.msra.mxu1 %v696_v17 }
  0x32   : > { %440 = vmatmul.mubr.bf16.vlgmr.msra.gmra.mrb[0].mxu0 %v697_v18  ;;  %448 = vmatmul.mubr.bf16.vlgmr.msra.gmra.mrb[0].mxu1 %v700_v19 }
 0x105   : > { %v629_v20 = vpop.f32.mrb[0].mxu0  ;;  %v635_v21 = vpop.f32.mrb[0].mxu1 }
 0x106   : > { %v630_v23 = vpop.f32.mrb[1].mxu0  ;;  %v636_v24 = vpop.f32.mrb[1].mxu1 }
 0x107   : > { %v631_v25 = vadd.f32 %v630_v23, %v629_v20  ;;  %v637_v26 = vadd.f32 %v636_v24, %v635_v21  ;;  %v632_v27 = vpop.f32.mrb[2].mxu0  ;;  %v638_v28 = vpop.f32.mrb[2].mxu1 }
 0x108   : > { %v633_v29 = vpop.f32.mrb[3].mxu0  ;;  %v639_v30 = vpop.f32.mrb[3].mxu1 }
 0x109   : > { %v442_v31 = vadd.f32 %v631_v25, %v587_v22  ;;  %v450_v32 = vadd.f32 %v637_v26, %v587_v22  ;;  %v634_v33 = vadd.f32 %v633_v29, %v632_v27  ;;  %v640_v34 = vadd.f32 %v639_v30, %v638_v28 }
 0x10b   : > { %v456_v35 = vmax.f32 %v442_v31, 0.0  ;;  %v458_v36 = vmax.f32 %v450_v32, 0.0  ;;  %v445_v37 = vadd.f32 %v634_v33, %v587_v22  ;;  %v453_v38 = vadd.f32 %v640_v34, %v587_v22 }
 0x10d   : > { %461 = vst.msk [vmem:[%s245_s29] sm:$0xff] %vm460_vm0, %v456_v35  ;;  %463 = vst.msk [vmem:[%s245_s29 + $0x10] sm:$0xff] %vm460_vm0, %v458_v36  ;;  %v457_v39 = vmax.f32 %v445_v37, 0.0  ;;  %v459_v40 = vmax.f32 %v453_v38, 0.0 }
 0x10f   : > { %462 = vst.msk [vmem:[%s245_s29 + $0x8] sm:$0xff] %vm460_vm0, %v457_v39  ;;  %464 = vst.msk [vmem:[%s245_s29 + $0x18] sm:$0xff] %vm460_vm0, %v459_v40 }
 0x110 PF: > { %s13_s14 = sadd.s32 1, %s725_s14   ;;  %s817_s12 = smov %s721_s13 }
 0x111   : > { %p10_p5 = scmp.ge.s32.totalorder %s13_s14, 4   ;;  %s818_s13 = smov %s820_s15 }
 0x113   :  { %12 = sbr.rel (!%p10_p5) target bundleno = 2 (0x2), region = 68 }

// kernel: unif_model_forward.23
= control target key start
LH: loop header
LB: loop body
LE: loop exit
PB: predicated region body
PF: predicated region fallthrough
CT: control target
= control target key end

     0   :  { %s832_s12 = smov 0   ;;  %s834_s13 = smov 0   ;;  %s911_s0 = inlined_call_operand.vmem [shape: bf16[2,32,288], index: 0, kind: input, shape index: {}]   ;;  %s912_s1 = inlined_call_operand.vmem [shape: bf16[2,288,32], index: 1, kind: input, shape index: {}]   ;;  %s913_s2 = inlined_call_operand.vmem [shape: f32[2,1,32], index: 2, kind: input, shape index: {}]   ;;  %s914_s3 = inlined_call_operand.vmem [shape: f32[2,32,32], index: 3, kind: output, shape index: {}]  }
   0x1   :  { %s836_s14 = smov 0  }
   0x2 LB: > { %s25_s15 = sadd.s32 1, %s806_s13  ;;  %p661_p0 = scmp.ge.s32.totalorder %s810_s14, 1  ;;  %s810_s14 = sphi %s836_s14, %s13_s14   ;;  %s806_s13 = sphi %s834_s13, %s916_s13   ;;  %s802_s12 = sphi %s832_s12, %s915_s12  }
   0x3   : > { %p27_p1 = scmp.ge.s32.totalorder %s25_s15, 2  ;;  %p177_p2 = scmp.lt.s32.totalorder %s810_s14, 3 }
   0x5   : > { %s918_s15 = smov (%p27_p1, %s25_s15), 0  ;;  %p178_p3 = pnand %p661_p0, %p177_p2 }
   0x6   : > { %p219_p4 = scmp.lt.s32.totalorder (!%p178_p3), %s802_s12, 1  ;;  %vm437_vm0 = vcmask (!%p178_p3), 261120  }
   0x7   : > { %181 = sbr.rel (%p178_p3) target bundleno = 281 (0x119), region = 32 }
   0xe   : > { %s920_s12 = smov (!%p219_p4, %s802_s12), 1 }
   0xf   : > { %s737_s16 = smul.u32 144, %s920_s12  ;;  %s236_s26 = scalar_lea.vmem %s913_s2, %s920_s12 }
  0x10   : > { %s736_s20 = smul.u32 48, %s920_s12  ;;  %v666_v30 = vld [vmem:[%s236_s26] ss:$0 sm:$0xff]  ;;  %s695_s27 = sshll.u32 %s920_s12, 5 }
  0x11   : > { %s856_s19 = scalar_lea.vmem %s912_s1, %s737_s16  ;;  %s245_s30 = scalar_lea.vmem %s914_s3, %s695_s27 }
  0x12   : > { %v762_v0 = vld [vmem:[%s856_s19 + $0x40] sm:$0xff]   ;;  %v764_v2 = vld [vmem:[%s856_s19 + $0x48] sm:$0xff]   ;;  %v766_v4 = vld [vmem:[%s856_s19 + $0x50] sm:$0xff]   ;;  %s873_s23 = scalar_lea.vmem %s911_s0, %s736_s20 }
  0x13   : > { %v763_v1 = vld [vmem:[%s856_s19] sm:$0xff]   ;;  %696 = vmatprep.subr.bf16.mxu0 %v762_v0  ;;  %v765_v3 = vld [vmem:[%s856_s19 + $0x8] sm:$0xff]   ;;  %v767_v5 = vld [vmem:[%s856_s19 + $0x10] sm:$0xff]  }
  0x14   : > { %697 = vmatpush3.bf16.msra.mxu0 %v763_v1  ;;  %v768_v6 = vld [vmem:[%s856_s19 + $0x58] sm:$0xff]   ;;  %v770_v8 = vld [vmem:[%s856_s19 + $0x60] sm:$0xff]   ;;  %v772_v11 = vld [vmem:[%s856_s19 + $0x68] sm:$0xff]  }
  0x15   : > { %698 = vmatprep.subr.bf16.mxu0 %v764_v2  ;;  %v769_v7 = vld [vmem:[%s856_s19 + $0x18] sm:$0xff]   ;;  %v771_v9 = vld [vmem:[%s856_s19 + $0x20] sm:$0xff]   ;;  %v773_v12 = vld [vmem:[%s856_s19 + $0x28] sm:$0xff]  }
  0x16   : > { %v777_v10 = vld [vmem:[%s856_s19 + $0x80] sm:$0xff]   ;;  %v774_v13 = vld [vmem:[%s856_s19 + $0x70] sm:$0xff]   ;;  %v782_v15 = vld [vmem:[%s856_s19 + $0x88] sm:$0xff]  }
  0x17   : > { %728 = vmatprep.subr.bf16.mxu1 %v777_v10  ;;  %v781_v14 = vld [vmem:[%s873_s23 + $0x4] ss:$12 sps:$4 sm:$0xff]   ;;  %v783_v16 = vld [vmem:[%s873_s23 + $0x8] ss:$12 sps:$4 sm:$0xff]   ;;  %v784_v17 = vld [vmem:[%s873_s23 + $0x20] ss:$12 sps:$4 sm:$0xff]  }
  0x18   : > { %699 = vmatpush3.bf16.msra.mxu0 %v765_v3  ;;  %729 = vmatpush3.bf16.msra.mxu1 %v777_v10  ;;  %v775_v18 = vld [vmem:[%s856_s19 + $0x30] sm:$0xff]   ;;  %v776_v19 = vld [vmem:[%s856_s19 + $0x78] sm:$0xff]   ;;  %v779_v21 = vld [vmem:[%s873_s23] ss:$12 sps:$4 sm:$0xff]  }
  0x19   : > { %700 = vmatprep.subr.bf16.mxu0 %v766_v4  ;;  %476 = vmatprep.mubr.bf16.mxu0 %v781_v14  ;;  %v778_v20 = vld [vmem:[%s856_s19 + $0x38] sm:$0xff]  }
  0x1a   : > { %730 = vmatprep.subr.bf16.mxu1 %v782_v15  ;;  %732 = vmatprep.mubr.msk.bf16.mxu1 %vm437_vm0, %v783_v16  ;;  %v785_v22 = vld [vmem:[%s873_s23 + $0x1c] ss:$12 sps:$4 sm:$0xff]   ;;  %v787_v23 = vld [vmem:[%s873_s23 + $0x18] ss:$12 sps:$4 sm:$0xff]  }
  0x1c   : > { %701 = vmatpush3.bf16.msra.mxu0 %v767_v5  ;;  %731 = vmatpush3.bf16.msra.mxu1 %v782_v15 }
  0x1d   : > { %702 = vmatprep.subr.bf16.mxu0 %v768_v6 }
  0x1f   : > { %733 = vmatmul.mubr.msk.bf16.vlgmr.msra.gmra.mrb[0].mxu1 %vm437_vm0, %v784_v17 }
  0x20   : > { %703 = vmatpush3.bf16.msra.mxu0 %v769_v7 }
  0x21   : > { %704 = vmatprep.subr.bf16.mxu0 %v770_v8 }
  0x24   : > { %705 = vmatpush3.bf16.msra.mxu0 %v771_v9 }
  0x25   : > { %706 = vmatprep.subr.bf16.mxu0 %v772_v11 }
  0x28   : > { %707 = vmatpush3.bf16.msra.mxu0 %v773_v12 }
  0x29   : > { %708 = vmatprep.subr.bf16.mxu0 %v774_v13 }
  0x2c   : > { %709 = vmatpush3.bf16.msra.mxu0 %v775_v18 }
  0x2d   : > { %710 = vmatprep.subr.bf16.mxu0 %v776_v19 }
  0x30   : > { %711 = vmatpush3.bf16.msra.mxu0 %v778_v20 }
  0x33   : > { %477 = vmatmul.mubr.bf16.vlgmr.msra.gmra.mrb[0].mxu0 %v779_v21 }
  0x34   : > { %484 = vmatprep.mubr.bf16.mxu0 %v785_v22 }
  0x3b   : > { %485 = vmatmul.mubr.bf16.gmra.mrb[4].mxu0 %v787_v23 }
  0xf2   : > { %v734_v24 = vpop.f32.mrb[0].mxu1 }
  0xf3   : > { %v527_v25 = vpop.f32.mrb[1].mxu1 }
  0xf4   : > { %v735_v26 = vpop.f32.mrb[2].mxu1 }
  0xf5   : > { %v530_v27 = vpop.f32.mrb[3].mxu1 }
 0x106   : > { %v712_v28 = vpop.f32.mrb[0].mxu0 }
 0x107   : > { %v713_v29 = vpop.f32.mrb[1].mxu0 }
 0x108   : > { %v714_v31 = vadd.f32 %v713_v29, %v712_v28  ;;  %v715_v32 = vpop.f32.mrb[2].mxu0 }
 0x109   : > { %v716_v33 = vpop.f32.mrb[3].mxu0 }
 0x10a   : > { %v717_v34 = vadd.f32 %v716_v33, %v715_v32  ;;  %v479_v35 = vadd.f32 %v714_v31, %v666_v30 }
 0x10c   : > { %v528_v36 = vadd.f32 %v527_v25, %v479_v35  ;;  %v482_v37 = vadd.f32 %v717_v34, %v666_v30 }
 0x10e   : > { %542 = vst.msk [vmem:[%s245_s30] sm:$0xff] %vm437_vm0, %v528_v36  ;;  %v531_v38 = vadd.f32 %v530_v27, %v482_v37  ;;  %v718_v39 = vpop.f32.mrb[4].mxu0 }
 0x10f   : > { %v719_v40 = vpop.f32.mrb[5].mxu0 }
 0x110   : > { %543 = vst.msk [vmem:[%s245_s30 + $0x8] sm:$0xff] %vm437_vm0, %v531_v38  ;;  %v720_v41 = vadd.f32 %v719_v40, %v718_v39  ;;  %v721_v42 = vpop.f32.mrb[6].mxu0 }
 0x111   : > { %v722_v43 = vpop.f32.mrb[7].mxu0 }
 0x112   : > { %v487_v44 = vadd.f32 %v720_v41, %v666_v30  ;;  %v723_v45 = vadd.f32 %v722_v43, %v721_v42 }
 0x114   : > { %v536_v46 = vadd.f32 %v734_v24, %v487_v44  ;;  %v490_v47 = vadd.f32 %v723_v45, %v666_v30 }
 0x116   : > { %544 = vst.msk [vmem:[%s245_s30 + $0x10] sm:$0xff] %vm437_vm0, %v536_v46  ;;  %v539_v48 = vadd.f32 %v735_v26, %v490_v47 }
 0x118   : > { %545 = vst.msk [vmem:[%s245_s30 + $0x18] sm:$0xff] %vm437_vm0, %v539_v48 }
 0x119 PF: > { %s13_s14 = sadd.s32 1, %s810_s14   ;;  %s915_s12 = smov %s806_s13 }
 0x11a   : > { %p10_p5 = scmp.ge.s32.totalorder %s13_s14, 4   ;;  %s916_s13 = smov %s918_s15 }
 0x11c   :  { %12 = sbr.rel (!%p10_p5) target bundleno = 2 (0x2), region = 68 }

// kernel: unif_model_forward.24
= control target key start
LH: loop header
LB: loop body
LE: loop exit
PB: predicated region body
PF: predicated region fallthrough
CT: control target
= control target key end

     0   :  { %s1002_s21 = smov 0   ;;  %s1076_s0 = inlined_call_operand.vmem [shape: bf16[2,32,288], index: 0, kind: input, shape index: {}]   ;;  %s1077_s1 = inlined_call_operand.vmem [shape: bf16[2,288,8], index: 1, kind: input, shape index: {}]   ;;  %s1078_s2 = inlined_call_operand.vmem [shape: f32[2,1,8], index: 2, kind: input, shape index: {}]   ;;  %s1079_s3 = inlined_call_operand.vmem [shape: bf16[2,8,32], index: 3, kind: input, shape index: {}]   ;;  %s1080_s4 = inlined_call_operand.vmem [shape: f32[2,1,32], index: 4, kind: input, shape index: {}]   ;;  %s1081_s5 = inlined_call_operand.vmem [shape: f32[2,32,32], index: 5, kind: input, shape index: {}]   ;;  %s1082_s6 = inlined_call_operand.vmem [shape: f32[2,32,32], index: 6, kind: output, shape index: {}]  }
   0x1 LB: > { %s827_s22 = sadd.s32 4294967295, %s965_s21   ;;  %p831_p0 = scmp.ge.s32.totalorder %s965_s21, 1  ;;  %s965_s21 = sphi %s1002_s21, %s16_s21  }
   0x2   : > { %p257_p1 = scmp.lt.s32.totalorder %s965_s21, 3 }
   0x4   : > { %p258_p2 = pnand %p831_p0, %p257_p1 }
   0x5   : > { %p307_p3 = scmp.lt.s32.totalorder (!%p258_p2), %s827_s22, 1  ;;  %vm527_vm0 = vcmask (!%p258_p2), 261120   ;;  %vm653_vm1 = vcmask (!%p258_p2), 1043456   ;;  %vm646_vm2 = vcmask (!%p258_p2), 64512  }
   0x6   : > { %261 = sbr.rel (%p258_p2) target bundleno = 503 (0x1f7), region = 44 }
   0xd   : > { %s1084_s22 = smov (!%p307_p3, %s827_s22), 1 }
   0xe   : > { %s924_s23 = smul.u32 144, %s1084_s22  ;;  %s834_s7 = sshll.u32 %s1084_s22, 2 }
   0xf   : > { %s923_s27 = smul.u32 48, %s1084_s22  ;;  %s323_s10 = scalar_lea.vmem %s1079_s3, %s834_s7 }
  0x10   : > { %s1016_s26 = scalar_lea.vmem %s1077_s1, %s924_s23  ;;  %v638_v24 = vld [vmem:[%s323_s10] sm:$0xf]  ;;  %s319_s13 = scalar_lea.vmem %s1078_s2, %s1084_s22 }
  0x11   : > { %v933_v0 = vld [vmem:[%s1016_s26 + $0x40] sm:$0xff]   ;;  %v935_v2 = vld [vmem:[%s1016_s26 + $0x48] sm:$0xff]   ;;  %v937_v4 = vld [vmem:[%s1016_s26 + $0x50] sm:$0xff]   ;;  %s1033_s30 = scalar_lea.vmem %s1076_s0, %s923_s27  ;;  %v655_v25 = vsel %vm653_vm1, %v638_v24, 0  ;;  %s871_s14 = sshll.u32 %s1084_s22, 5 }
  0x12   : > { %v934_v1 = vld [vmem:[%s1016_s26] sm:$0xff]   ;;  %873 = vmatprep.subr.bf16.mxu0 %v933_v0  ;;  %v936_v3 = vld [vmem:[%s1016_s26 + $0x8] sm:$0xff]   ;;  %v938_v5 = vld [vmem:[%s1016_s26 + $0x10] sm:$0xff]   ;;  %s326_s17 = scalar_lea.vmem %s1080_s4, %s1084_s22  ;;  %s331_s20 = scalar_lea.vmem %s1081_s5, %s871_s14 }
  0x13   : > { %874 = vmatpush3.bf16.msra.mxu0 %v934_v1  ;;  %v939_v6 = vld [vmem:[%s1016_s26 + $0x58] sm:$0xff]   ;;  %v941_v8 = vld [vmem:[%s1016_s26 + $0x60] sm:$0xff]   ;;  %v943_v11 = vld [vmem:[%s1016_s26 + $0x68] sm:$0xff]   ;;  %s336_s25 = scalar_lea.vmem %s1082_s6, %s871_s14 }
  0x14   : > { %875 = vmatprep.subr.bf16.mxu0 %v935_v2  ;;  %v940_v7 = vld [vmem:[%s1016_s26 + $0x18] sm:$0xff]   ;;  %v942_v9 = vld [vmem:[%s1016_s26 + $0x20] sm:$0xff]   ;;  %v944_v12 = vld [vmem:[%s1016_s26 + $0x28] sm:$0xff]  }
  0x15   : > { %v948_v10 = vld [vmem:[%s1016_s26 + $0x80] sm:$0xff]   ;;  %v945_v13 = vld [vmem:[%s1016_s26 + $0x70] sm:$0xff]   ;;  %v953_v15 = vld [vmem:[%s1016_s26 + $0x88] sm:$0xff]  }
  0x16   : > { %908 = vmatprep.subr.bf16.mxu1 %v948_v10  ;;  %v952_v14 = vld [vmem:[%s1033_s30 + $0x4] ss:$12 sps:$4 sm:$0xff]   ;;  %v954_v16 = vld [vmem:[%s1033_s30 + $0x8] ss:$12 sps:$4 sm:$0xff]   ;;  %v955_v17 = vld [vmem:[%s1033_s30 + $0x20] ss:$12 sps:$4 sm:$0xff]  }
  0x17   : > { %876 = vmatpush3.bf16.msra.mxu0 %v936_v3  ;;  %909 = vmatpush3.bf16.msra.mxu1 %v948_v10  ;;  %v946_v18 = vld [vmem:[%s1016_s26 + $0x30] sm:$0xff]   ;;  %v947_v19 = vld [vmem:[%s1016_s26 + $0x78] sm:$0xff]   ;;  %v950_v21 = vld [vmem:[%s1033_s30] ss:$12 sps:$4 sm:$0xff]  }
  0x18   : > { %877 = vmatprep.subr.bf16.mxu0 %v937_v4  ;;  %566 = vmatprep.mubr.bf16.mxu0 %v952_v14  ;;  %v949_v20 = vld [vmem:[%s1016_s26 + $0x38] sm:$0xff]   ;;  %v839_v32 = vld [vmem:[%s319_s13] ss:$0 sm:$0xff]  ;;  %v708_v59 = vld [vmem:[%s331_s20 + $0x10] sm:$0xff] }
  0x19   : > { %910 = vmatprep.subr.bf16.mxu1 %v953_v15  ;;  %912 = vmatprep.mubr.msk.bf16.mxu1 %vm527_vm0, %v954_v16  ;;  %v956_v22 = vld [vmem:[%s1033_s30 + $0x1c] ss:$12 sps:$4 sm:$0xff]   ;;  %v958_v23 = vld [vmem:[%s1033_s30 + $0x18] ss:$12 sps:$4 sm:$0xff]   ;;  %v866_v57 = vld [vmem:[%s326_s17] ss:$0 sm:$0xff] }
  0x1a   : > { %v706_v62 = vld [vmem:[%s331_s20] sm:$0xff]  ;;  %v709_v1 = vld [vmem:[%s331_s20 + $0x18] sm:$0xff] }
  0x1b   : > { %878 = vmatpush3.bf16.msra.mxu0 %v938_v5  ;;  %911 = vmatpush3.bf16.msra.mxu1 %v953_v15  ;;  %v707_v5 = vld [vmem:[%s331_s20 + $0x8] sm:$0xff] }
  0x1c   : > { %879 = vmatprep.subr.bf16.mxu0 %v939_v6  ;;  %922 = vmatprep.subr.msk.bf16.mxu1 %vm653_vm1, %v638_v24 }
  0x1e   : > { %913 = vmatmul.mubr.msk.bf16.vlgmr.msra.gmra.mrb[0].mxu1 %vm527_vm0, %v955_v17 }
  0x1f   : > { %880 = vmatpush3.bf16.msra.mxu0 %v940_v7  ;;  %917 = vmatpush3.bf16.msra.mxu1 %v655_v25 }
  0x20   : > { %881 = vmatprep.subr.bf16.mxu0 %v941_v8 }
  0x23   : > { %882 = vmatpush3.bf16.msra.mxu0 %v942_v9 }
  0x24   : > { %883 = vmatprep.subr.bf16.mxu0 %v943_v11 }
  0x27   : > { %884 = vmatpush3.bf16.msra.mxu0 %v944_v12 }
  0x28   : > { %885 = vmatprep.subr.bf16.mxu0 %v945_v13 }
  0x2b   : > { %886 = vmatpush3.bf16.msra.mxu0 %v946_v18 }
  0x2c   : > { %887 = vmatprep.subr.bf16.mxu0 %v947_v19 }
  0x2f   : > { %888 = vmatpush3.bf16.msra.mxu0 %v949_v20 }
  0x32   : > { %567 = vmatmul.mubr.bf16.vlgmr.msra.gmra.mrb[0].mxu0 %v950_v21 }
  0x33   : > { %574 = vmatprep.mubr.bf16.mxu0 %v956_v22 }
  0x3a   : > { %575 = vmatmul.mubr.bf16.gmra.mrb[4].mxu0 %v958_v23 }
  0xf1   : > { %v914_v26 = vpop.f32.mrb[0].mxu1 }
  0xf2   : > { %v617_v27 = vpop.f32.mrb[1].mxu1 }
  0xf3   : > { %v915_v28 = vpop.f32.mrb[2].mxu1 }
  0xf4   : > { %v620_v29 = vpop.f32.mrb[3].mxu1 }
 0x105   : > { %v889_v30 = vpop.f32.mrb[0].mxu0 }
 0x106   : > { %v890_v31 = vpop.f32.mrb[1].mxu0 }
 0x107   : > { %v891_v33 = vadd.f32 %v890_v31, %v889_v30  ;;  %v892_v34 = vpop.f32.mrb[2].mxu0 }
 0x108   : > { %v893_v35 = vpop.f32.mrb[3].mxu0 }
 0x109   : > { %v894_v36 = vadd.f32 %v893_v35, %v892_v34  ;;  %v569_v37 = vadd.f32 %v891_v33, %v839_v32 }
 0x10b   : > { %v618_v38 = vadd.f32 %v617_v27, %v569_v37  ;;  %v572_v39 = vadd.f32 %v894_v36, %v839_v32 }
 0x10d   : > { %v621_v40 = vadd.f32 %v620_v29, %v572_v39  ;;  %v895_v41 = vpop.f32.mrb[4].mxu0  ;;  %v632_v43 = vmax.f32 %v618_v38, 0.0 }
 0x10e   : > { %v896_v42 = vpop.f32.mrb[5].mxu0 }
 0x10f   : > { %v633_v44 = vmax.f32 %v621_v40, 0.0  ;;  %v897_v45 = vadd.f32 %v896_v42, %v895_v41  ;;  %v898_v46 = vpop.f32.mrb[6].mxu0 }
 0x110   : > { %v899_v47 = vpop.f32.mrb[7].mxu0 }
 0x111   : > { %v636_v48 = vpack.c.bf16 %v633_v44, %v632_v43  ;;  %v577_v49 = vadd.f32 %v897_v45, %v839_v32  ;;  %v900_v50 = vadd.f32 %v899_v47, %v898_v46 }
 0x113   : > { %v626_v51 = vadd.f32 %v914_v26, %v577_v49  ;;  %v580_v52 = vadd.f32 %v900_v50, %v839_v32  ;;  %918 = vmatprep.mubr.msk.bf16.mxu1 %vm646_vm2, %v636_v48 }
 0x115   : > { %v629_v53 = vadd.f32 %v915_v28, %v580_v52  ;;  %v634_v54 = vmax.f32 %v626_v51, 0.0 }
 0x117   : > { %v635_v55 = vmax.f32 %v629_v53, 0.0 }
 0x119   : > { %v637_v56 = vpack.c.bf16 %v635_v55, %v634_v54 }
 0x11b   : > { %919 = vmatmul.mubr.msk.bf16.vlgmr.msra.gmra.mrb[4].mxu1 %vm646_vm2, %v637_v56 }
 0x1ee   : > { %v920_v58 = vpop.f32.mrb[4].mxu1 }
 0x1ef   : > { %v700_v60 = vadd.f32 %v920_v58, %v866_v57  ;;  %v691_v61 = vpop.f32.mrb[5].mxu1 }
 0x1f0   : > { %v692_v63 = vadd.f32 %v866_v57, %v691_v61  ;;  %v921_v0 = vpop.f32.mrb[6].mxu1 }
 0x1f1   : > { %v712_v2 = vadd.f32 %v708_v59, %v700_v60  ;;  %v703_v3 = vadd.f32 %v921_v0, %v866_v57  ;;  %v694_v4 = vpop.f32.mrb[7].mxu1 }
 0x1f2   : > { %v710_v6 = vadd.f32 %v706_v62, %v692_v63  ;;  %v695_v7 = vadd.f32 %v866_v57, %v694_v4 }
 0x1f3   : > { %716 = vst.msk [vmem:[%s336_s25 + $0x10] sm:$0xff] %vm527_vm0, %v712_v2  ;;  %v713_v8 = vadd.f32 %v709_v1, %v703_v3 }
 0x1f4   : > { %714 = vst.msk [vmem:[%s336_s25] sm:$0xff] %vm527_vm0, %v710_v6  ;;  %v711_v9 = vadd.f32 %v707_v5, %v695_v7 }
 0x1f5   : > { %717 = vst.msk [vmem:[%s336_s25 + $0x18] sm:$0xff] %vm527_vm0, %v713_v8 }
 0x1f6   : > { %715 = vst.msk [vmem:[%s336_s25 + $0x8] sm:$0xff] %vm527_vm0, %v711_v9 }
 0x1f7 PF: > { %s16_s21 = sadd.s32 1, %s965_s21  }
 0x1f8   : > { %p13_p4 = scmp.ge.s32.totalorder %s16_s21, 4  }
 0x1fa   :  { %15 = sbr.rel (!%p13_p4) target bundleno = 1 (0x1), region = 89 }

// kernel: unif_model_forward.25
= control target key start
LH: loop header
LB: loop body
LE: loop exit
PB: predicated region body
PF: predicated region fallthrough
CT: control target
= control target key end

     0   :  { %s1006_s21 = smov 0   ;;  %s1080_s0 = inlined_call_operand.vmem [shape: bf16[2,32,288], index: 0, kind: input, shape index: {}]   ;;  %s1081_s1 = inlined_call_operand.vmem [shape: bf16[2,288,8], index: 1, kind: input, shape index: {}]   ;;  %s1082_s2 = inlined_call_operand.vmem [shape: f32[2,1,8], index: 2, kind: input, shape index: {}]   ;;  %s1083_s3 = inlined_call_operand.vmem [shape: bf16[2,8,32], index: 3, kind: input, shape index: {}]   ;;  %s1084_s4 = inlined_call_operand.vmem [shape: f32[2,1,32], index: 4, kind: input, shape index: {}]   ;;  %s1085_s5 = inlined_call_operand.vmem [shape: f32[2,32,32], index: 5, kind: input, shape index: {}]   ;;  %s1086_s6 = inlined_call_operand.vmem [shape: f32[2,32,32], index: 6, kind: output, shape index: {}]  }
   0x1 LB: > { %s831_s22 = sadd.s32 4294967295, %s969_s21   ;;  %p835_p0 = scmp.ge.s32.totalorder %s969_s21, 1  ;;  %s969_s21 = sphi %s1006_s21, %s16_s21  }
   0x2   : > { %p257_p1 = scmp.lt.s32.totalorder %s969_s21, 3 }
   0x4   : > { %p258_p2 = pnand %p835_p0, %p257_p1 }
   0x5   : > { %p307_p3 = scmp.lt.s32.totalorder (!%p258_p2), %s831_s22, 1  ;;  %vm527_vm0 = vcmask (!%p258_p2), 261120   ;;  %vm653_vm1 = vcmask (!%p258_p2), 1043456   ;;  %vm646_vm2 = vcmask (!%p258_p2), 64512  }
   0x6   : > { %261 = sbr.rel (%p258_p2) target bundleno = 505 (0x1f9), region = 44 }
   0xd   : > { %s1088_s22 = smov (!%p307_p3, %s831_s22), 1 }
   0xe   : > { %s928_s23 = smul.u32 144, %s1088_s22  ;;  %s838_s7 = sshll.u32 %s1088_s22, 2 }
   0xf   : > { %s927_s27 = smul.u32 48, %s1088_s22  ;;  %s323_s10 = scalar_lea.vmem %s1083_s3, %s838_s7 }
  0x10   : > { %s1020_s26 = scalar_lea.vmem %s1081_s1, %s928_s23  ;;  %v638_v24 = vld [vmem:[%s323_s10] sm:$0xf]  ;;  %s319_s13 = scalar_lea.vmem %s1082_s2, %s1088_s22 }
  0x11   : > { %v937_v0 = vld [vmem:[%s1020_s26 + $0x40] sm:$0xff]   ;;  %v939_v2 = vld [vmem:[%s1020_s26 + $0x48] sm:$0xff]   ;;  %v941_v4 = vld [vmem:[%s1020_s26 + $0x50] sm:$0xff]   ;;  %s1037_s30 = scalar_lea.vmem %s1080_s0, %s927_s27  ;;  %v655_v25 = vsel %vm653_vm1, %v638_v24, 0  ;;  %s875_s14 = sshll.u32 %s1088_s22, 5 }
  0x12   : > { %v938_v1 = vld [vmem:[%s1020_s26] sm:$0xff]   ;;  %877 = vmatprep.subr.bf16.mxu0 %v937_v0  ;;  %v940_v3 = vld [vmem:[%s1020_s26 + $0x8] sm:$0xff]   ;;  %v942_v5 = vld [vmem:[%s1020_s26 + $0x10] sm:$0xff]   ;;  %s326_s17 = scalar_lea.vmem %s1084_s4, %s1088_s22  ;;  %s331_s20 = scalar_lea.vmem %s1085_s5, %s875_s14 }
  0x13   : > { %878 = vmatpush3.bf16.msra.mxu0 %v938_v1  ;;  %v943_v6 = vld [vmem:[%s1020_s26 + $0x58] sm:$0xff]   ;;  %v945_v8 = vld [vmem:[%s1020_s26 + $0x60] sm:$0xff]   ;;  %v947_v11 = vld [vmem:[%s1020_s26 + $0x68] sm:$0xff]   ;;  %s336_s22 = scalar_lea.vmem %s1086_s6, %s875_s14 }
  0x14   : > { %879 = vmatprep.subr.bf16.mxu0 %v939_v2  ;;  %v944_v7 = vld [vmem:[%s1020_s26 + $0x18] sm:$0xff]   ;;  %v946_v9 = vld [vmem:[%s1020_s26 + $0x20] sm:$0xff]   ;;  %v948_v12 = vld [vmem:[%s1020_s26 + $0x28] sm:$0xff]  }
  0x15   : > { %v952_v10 = vld [vmem:[%s1020_s26 + $0x80] sm:$0xff]   ;;  %v949_v13 = vld [vmem:[%s1020_s26 + $0x70] sm:$0xff]   ;;  %v957_v15 = vld [vmem:[%s1020_s26 + $0x88] sm:$0xff]  }
  0x16   : > { %912 = vmatprep.subr.bf16.mxu1 %v952_v10  ;;  %v956_v14 = vld [vmem:[%s1037_s30 + $0x4] ss:$12 sps:$4 sm:$0xff]   ;;  %v958_v16 = vld [vmem:[%s1037_s30 + $0x8] ss:$12 sps:$4 sm:$0xff]   ;;  %v959_v17 = vld [vmem:[%s1037_s30 + $0x20] ss:$12 sps:$4 sm:$0xff]  }
  0x17   : > { %880 = vmatpush3.bf16.msra.mxu0 %v940_v3  ;;  %913 = vmatpush3.bf16.msra.mxu1 %v952_v10  ;;  %v950_v18 = vld [vmem:[%s1020_s26 + $0x30] sm:$0xff]   ;;  %v951_v19 = vld [vmem:[%s1020_s26 + $0x78] sm:$0xff]   ;;  %v954_v21 = vld [vmem:[%s1037_s30] ss:$12 sps:$4 sm:$0xff]  }
  0x18   : > { %881 = vmatprep.subr.bf16.mxu0 %v941_v4  ;;  %566 = vmatprep.mubr.bf16.mxu0 %v956_v14  ;;  %v953_v20 = vld [vmem:[%s1020_s26 + $0x38] sm:$0xff]   ;;  %v843_v32 = vld [vmem:[%s319_s13] ss:$0 sm:$0xff]  ;;  %v708_v59 = vld [vmem:[%s331_s20 + $0x10] sm:$0xff] }
  0x19   : > { %914 = vmatprep.subr.bf16.mxu1 %v957_v15  ;;  %916 = vmatprep.mubr.msk.bf16.mxu1 %vm527_vm0, %v958_v16  ;;  %v960_v22 = vld [vmem:[%s1037_s30 + $0x1c] ss:$12 sps:$4 sm:$0xff]   ;;  %v962_v23 = vld [vmem:[%s1037_s30 + $0x18] ss:$12 sps:$4 sm:$0xff]   ;;  %v870_v57 = vld [vmem:[%s326_s17] ss:$0 sm:$0xff] }
  0x1a   : > { %v706_v62 = vld [vmem:[%s331_s20] sm:$0xff]  ;;  %v709_v1 = vld [vmem:[%s331_s20 + $0x18] sm:$0xff] }
  0x1b   : > { %882 = vmatpush3.bf16.msra.mxu0 %v942_v5  ;;  %915 = vmatpush3.bf16.msra.mxu1 %v957_v15  ;;  %v707_v5 = vld [vmem:[%s331_s20 + $0x8] sm:$0xff] }
  0x1c   : > { %883 = vmatprep.subr.bf16.mxu0 %v943_v6  ;;  %926 = vmatprep.subr.msk.bf16.mxu1 %vm653_vm1, %v638_v24 }
  0x1e   : > { %917 = vmatmul.mubr.msk.bf16.vlgmr.msra.gmra.mrb[0].mxu1 %vm527_vm0, %v959_v17 }
  0x1f   : > { %884 = vmatpush3.bf16.msra.mxu0 %v944_v7  ;;  %921 = vmatpush3.bf16.msra.mxu1 %v655_v25 }
  0x20   : > { %885 = vmatprep.subr.bf16.mxu0 %v945_v8 }
  0x23   : > { %886 = vmatpush3.bf16.msra.mxu0 %v946_v9 }
  0x24   : > { %887 = vmatprep.subr.bf16.mxu0 %v947_v11 }
  0x27   : > { %888 = vmatpush3.bf16.msra.mxu0 %v948_v12 }
  0x28   : > { %889 = vmatprep.subr.bf16.mxu0 %v949_v13 }
  0x2b   : > { %890 = vmatpush3.bf16.msra.mxu0 %v950_v18 }
  0x2c   : > { %891 = vmatprep.subr.bf16.mxu0 %v951_v19 }
  0x2f   : > { %892 = vmatpush3.bf16.msra.mxu0 %v953_v20 }
  0x32   : > { %567 = vmatmul.mubr.bf16.vlgmr.msra.gmra.mrb[0].mxu0 %v954_v21 }
  0x33   : > { %574 = vmatprep.mubr.bf16.mxu0 %v960_v22 }
  0x3a   : > { %575 = vmatmul.mubr.bf16.gmra.mrb[4].mxu0 %v962_v23 }
  0xf1   : > { %v918_v26 = vpop.f32.mrb[0].mxu1 }
  0xf2   : > { %v617_v27 = vpop.f32.mrb[1].mxu1 }
  0xf3   : > { %v919_v28 = vpop.f32.mrb[2].mxu1 }
  0xf4   : > { %v620_v29 = vpop.f32.mrb[3].mxu1 }
 0x105   : > { %v893_v30 = vpop.f32.mrb[0].mxu0 }
 0x106   : > { %v894_v31 = vpop.f32.mrb[1].mxu0 }
 0x107   : > { %v895_v33 = vadd.f32 %v894_v31, %v893_v30  ;;  %v896_v34 = vpop.f32.mrb[2].mxu0 }
 0x108   : > { %v897_v35 = vpop.f32.mrb[3].mxu0 }
 0x109   : > { %v898_v36 = vadd.f32 %v897_v35, %v896_v34  ;;  %v569_v37 = vadd.f32 %v895_v33, %v843_v32 }
 0x10b   : > { %v618_v38 = vadd.f32 %v617_v27, %v569_v37  ;;  %v572_v39 = vadd.f32 %v898_v36, %v843_v32 }
 0x10d   : > { %v621_v40 = vadd.f32 %v620_v29, %v572_v39  ;;  %v899_v41 = vpop.f32.mrb[4].mxu0  ;;  %v632_v43 = vmax.f32 %v618_v38, 0.0 }
 0x10e   : > { %v900_v42 = vpop.f32.mrb[5].mxu0 }
 0x10f   : > { %v633_v44 = vmax.f32 %v621_v40, 0.0  ;;  %v901_v45 = vadd.f32 %v900_v42, %v899_v41  ;;  %v902_v46 = vpop.f32.mrb[6].mxu0 }
 0x110   : > { %v903_v47 = vpop.f32.mrb[7].mxu0 }
 0x111   : > { %v636_v48 = vpack.c.bf16 %v633_v44, %v632_v43  ;;  %v577_v49 = vadd.f32 %v901_v45, %v843_v32  ;;  %v904_v50 = vadd.f32 %v903_v47, %v902_v46 }
 0x113   : > { %v626_v51 = vadd.f32 %v918_v26, %v577_v49  ;;  %v580_v52 = vadd.f32 %v904_v50, %v843_v32  ;;  %922 = vmatprep.mubr.msk.bf16.mxu1 %vm646_vm2, %v636_v48 }
 0x115   : > { %v629_v53 = vadd.f32 %v919_v28, %v580_v52  ;;  %v634_v54 = vmax.f32 %v626_v51, 0.0 }
 0x117   : > { %v635_v55 = vmax.f32 %v629_v53, 0.0 }
 0x119   : > { %v637_v56 = vpack.c.bf16 %v635_v55, %v634_v54 }
 0x11b   : > { %923 = vmatmul.mubr.msk.bf16.vlgmr.msra.gmra.mrb[4].mxu1 %vm646_vm2, %v637_v56 }
 0x1ee   : > { %v924_v58 = vpop.f32.mrb[4].mxu1 }
 0x1ef   : > { %v700_v60 = vadd.f32 %v924_v58, %v870_v57  ;;  %v691_v61 = vpop.f32.mrb[5].mxu1 }
 0x1f0   : > { %v692_v63 = vadd.f32 %v870_v57, %v691_v61  ;;  %v925_v0 = vpop.f32.mrb[6].mxu1 }
 0x1f1   : > { %v712_v2 = vadd.f32 %v708_v59, %v700_v60  ;;  %v703_v3 = vadd.f32 %v925_v0, %v870_v57  ;;  %v694_v4 = vpop.f32.mrb[7].mxu1 }
 0x1f2   : > { %v710_v6 = vadd.f32 %v706_v62, %v692_v63  ;;  %v695_v7 = vadd.f32 %v870_v57, %v694_v4 }
 0x1f3   : > { %v716_v8 = vmax.f32 %v712_v2, 0.0  ;;  %v713_v9 = vadd.f32 %v709_v1, %v703_v3 }
 0x1f4   : > { %v714_v10 = vmax.f32 %v710_v6, 0.0  ;;  %v711_v11 = vadd.f32 %v707_v5, %v695_v7 }
 0x1f5   : > { %720 = vst.msk [vmem:[%s336_s22 + $0x10] sm:$0xff] %vm527_vm0, %v716_v8  ;;  %v717_v12 = vmax.f32 %v713_v9, 0.0 }
 0x1f6   : > { %718 = vst.msk [vmem:[%s336_s22] sm:$0xff] %vm527_vm0, %v714_v10  ;;  %v715_v13 = vmax.f32 %v711_v11, 0.0 }
 0x1f7   : > { %721 = vst.msk [vmem:[%s336_s22 + $0x18] sm:$0xff] %vm527_vm0, %v717_v12 }
 0x1f8   : > { %719 = vst.msk [vmem:[%s336_s22 + $0x8] sm:$0xff] %vm527_vm0, %v715_v13 }
 0x1f9 PF: > { %s16_s21 = sadd.s32 1, %s969_s21  }
 0x1fa   : > { %p13_p4 = scmp.ge.s32.totalorder %s16_s21, 4  }
 0x1fc   :  { %15 = sbr.rel (!%p13_p4) target bundleno = 1 (0x1), region = 89 }

// kernel: unif_model_forward.26
= control target key start
LH: loop header
LB: loop body
LE: loop exit
PB: predicated region body
PF: predicated region fallthrough
CT: control target
= control target key end

     0   :  { %vm727_vm0 = vcmask 130048   ;;  %s1196_s1 = inlined_call_operand.vmem [shape: bf16[1,1024,16], index: 1, kind: input, shape index: {}]   ;;  %s1197_s0 = inlined_call_operand.vmem [shape: bf16[1,8,1024], index: 0, kind: input, shape index: {}]   ;;  %s1198_s2 = inlined_call_operand.vmem [shape: f32[1,1,16], index: 2, kind: input, shape index: {}]   ;;  %s1199_s3 = inlined_call_operand.vmem [shape: f32[1,8,16], index: 3, kind: output, shape index: {}]  }
   0x1   :  { %v894_v0 = vld [vmem:[%s1196_s1 + $0x40] sm:$0xff]   ;;  %v898_v4 = vld [vmem:[%s1196_s1 + $0x48] sm:$0xff]   ;;  %v902_v8 = vld [vmem:[%s1196_s1 + $0x50] sm:$0xff]  }
   0x2   :  { %v895_v1 = vld [vmem:[%s1196_s1 + $0xc0] sm:$0xff]   ;;  %806 = vmatprep.subr.bf16.mxu0 %v894_v0  ;;  %v899_v5 = vld [vmem:[%s1196_s1 + $0xc8] sm:$0xff]   ;;  %v903_v9 = vld [vmem:[%s1196_s1 + $0xd0] sm:$0xff]  }
   0x3   :  { %v896_v2 = vld [vmem:[%s1196_s1] sm:$0xff]   ;;  %828 = vmatprep.subr.bf16.mxu1 %v895_v1  ;;  %v900_v6 = vld [vmem:[%s1196_s1 + $0x8] sm:$0xff]   ;;  %v904_v10 = vld [vmem:[%s1196_s1 + $0x10] sm:$0xff]  }
   0x4   :  { %v897_v3 = vld [vmem:[%s1196_s1 + $0x80] sm:$0xff]   ;;  %807 = vmatpush3.bf16.msra.mxu0 %v896_v2  ;;  %v901_v7 = vld [vmem:[%s1196_s1 + $0x88] sm:$0xff]   ;;  %v905_v11 = vld [vmem:[%s1196_s1 + $0x90] sm:$0xff]  }
   0x5   :  { %829 = vmatpush3.bf16.msra.mxu1 %v897_v3  ;;  %808 = vmatprep.subr.bf16.mxu0 %v898_v4  ;;  %v906_v12 = vld [vmem:[%s1196_s1 + $0x58] sm:$0xff]   ;;  %v910_v16 = vld [vmem:[%s1196_s1 + $0x60] sm:$0xff]   ;;  %v914_v20 = vld [vmem:[%s1196_s1 + $0x68] sm:$0xff]  }
   0x6   :  { %830 = vmatprep.subr.bf16.mxu1 %v899_v5  ;;  %v907_v13 = vld [vmem:[%s1196_s1 + $0xd8] sm:$0xff]   ;;  %v911_v17 = vld [vmem:[%s1196_s1 + $0xe0] sm:$0xff]   ;;  %v915_v21 = vld [vmem:[%s1196_s1 + $0xe8] sm:$0xff]  }
   0x7   :  { %v908_v14 = vld [vmem:[%s1196_s1 + $0x18] sm:$0xff]   ;;  %v912_v18 = vld [vmem:[%s1196_s1 + $0x20] sm:$0xff]   ;;  %v916_v22 = vld [vmem:[%s1196_s1 + $0x28] sm:$0xff]  }
   0x8   :  { %809 = vmatpush3.bf16.msra.mxu0 %v900_v6  ;;  %v909_v15 = vld [vmem:[%s1196_s1 + $0x98] sm:$0xff]   ;;  %v913_v19 = vld [vmem:[%s1196_s1 + $0xa0] sm:$0xff]   ;;  %v917_v23 = vld [vmem:[%s1196_s1 + $0xa8] sm:$0xff]  }
   0x9   :  { %831 = vmatpush3.bf16.msra.mxu1 %v901_v7  ;;  %810 = vmatprep.subr.bf16.mxu0 %v902_v8  ;;  %v918_v24 = vld [vmem:[%s1196_s1 + $0x70] sm:$0xff]   ;;  %v922_v28 = vld [vmem:[%s1196_s1 + $0x78] sm:$0xff]   ;;  %v15_v32 = vld [vmem:[%s1197_s0] sm:$0xff] }
   0xa   :  { %832 = vmatprep.subr.bf16.mxu1 %v903_v9  ;;  %v919_v25 = vld [vmem:[%s1196_s1 + $0xf0] sm:$0xff]   ;;  %v923_v29 = vld [vmem:[%s1196_s1 + $0xf8] sm:$0xff]   ;;  %v16_v33 = vld [vmem:[%s1197_s0 + $0x8] sm:$0xff]  ;;  %v734_v34 = vcombine.low %v15_v32, %v15_v32  ;;  %v735_v35 = vcombine.high %v15_v32, %v15_v32 }
   0xb   :  { %v920_v26 = vld [vmem:[%s1196_s1 + $0x30] sm:$0xff]   ;;  %v924_v30 = vld [vmem:[%s1196_s1 + $0x38] sm:$0xff]   ;;  %v736_v36 = vcombine.low %v16_v33, %v16_v33  ;;  %v737_v37 = vcombine.high %v16_v33, %v16_v33  ;;  %v930_v38 = vld [vmem:[%s1196_s1 + $0x140] sm:$0xff]  }
   0xc   :  { %811 = vmatpush3.bf16.msra.mxu0 %v904_v10  ;;  %v921_v27 = vld [vmem:[%s1196_s1 + $0xb0] sm:$0xff]   ;;  %v925_v31 = vld [vmem:[%s1196_s1 + $0xb8] sm:$0xff]   ;;  %v931_v39 = vld [vmem:[%s1196_s1 + $0x1c0] sm:$0xff]   ;;  %598 = vmatprep.mubr.bf16.mxu0 %v735_v35 }
   0xd   :  { %833 = vmatpush3.bf16.msra.mxu1 %v905_v11  ;;  %812 = vmatprep.subr.bf16.mxu0 %v906_v12  ;;  %v932_v40 = vld [vmem:[%s1196_s1 + $0x100] sm:$0xff]   ;;  %v934_v42 = vld [vmem:[%s1196_s1 + $0x148] sm:$0xff]   ;;  %v938_v46 = vld [vmem:[%s1196_s1 + $0x150] sm:$0xff]  }
   0xe   :  { %834 = vmatprep.subr.bf16.mxu1 %v907_v13  ;;  %638 = vmatprep.mubr.bf16.mxu1 %v737_v37  ;;  %v933_v41 = vld [vmem:[%s1196_s1 + $0x180] sm:$0xff]   ;;  %v935_v43 = vld [vmem:[%s1196_s1 + $0x1c8] sm:$0xff]   ;;  %v939_v47 = vld [vmem:[%s1196_s1 + $0x1d0] sm:$0xff]  }
   0xf   :  { %v936_v44 = vld [vmem:[%s1196_s1 + $0x108] sm:$0xff]   ;;  %v940_v48 = vld [vmem:[%s1196_s1 + $0x110] sm:$0xff]   ;;  %v942_v50 = vld [vmem:[%s1196_s1 + $0x158] sm:$0xff]  }
  0x10   :  { %813 = vmatpush3.bf16.msra.mxu0 %v908_v14  ;;  %v937_v45 = vld [vmem:[%s1196_s1 + $0x188] sm:$0xff]   ;;  %v941_v49 = vld [vmem:[%s1196_s1 + $0x190] sm:$0xff]   ;;  %v943_v51 = vld [vmem:[%s1196_s1 + $0x1d8] sm:$0xff]  }
  0x11   :  { %835 = vmatpush3.bf16.msra.mxu1 %v909_v15  ;;  %814 = vmatprep.subr.bf16.mxu0 %v910_v16  ;;  %v944_v52 = vld [vmem:[%s1196_s1 + $0x118] sm:$0xff]   ;;  %v946_v54 = vld [vmem:[%s1196_s1 + $0x160] sm:$0xff]   ;;  %v950_v58 = vld [vmem:[%s1196_s1 + $0x168] sm:$0xff]  }
  0x12   :  { %836 = vmatprep.subr.bf16.mxu1 %v911_v17  ;;  %v945_v53 = vld [vmem:[%s1196_s1 + $0x198] sm:$0xff]   ;;  %v947_v55 = vld [vmem:[%s1196_s1 + $0x1e0] sm:$0xff]   ;;  %v951_v59 = vld [vmem:[%s1196_s1 + $0x1e8] sm:$0xff]  }
  0x13   :  { %v948_v56 = vld [vmem:[%s1196_s1 + $0x120] sm:$0xff]   ;;  %v952_v60 = vld [vmem:[%s1196_s1 + $0x128] sm:$0xff]   ;;  %v954_v62 = vld [vmem:[%s1196_s1 + $0x170] sm:$0xff]  }
  0x14   :  { %815 = vmatpush3.bf16.msra.mxu0 %v912_v18  ;;  %v949_v57 = vld [vmem:[%s1196_s1 + $0x1a0] sm:$0xff]   ;;  %v953_v61 = vld [vmem:[%s1196_s1 + $0x1a8] sm:$0xff]   ;;  %v955_v63 = vld [vmem:[%s1196_s1 + $0x1f0] sm:$0xff]  }
  0x15   :  { %837 = vmatpush3.bf16.msra.mxu1 %v913_v19  ;;  %816 = vmatprep.subr.bf16.mxu0 %v914_v20  ;;  %v956_v0 = vld [vmem:[%s1196_s1 + $0x130] sm:$0xff]   ;;  %v958_v2 = vld [vmem:[%s1196_s1 + $0x178] sm:$0xff]   ;;  %v733_v14 = vld [vmem:[%s1198_s2] ss:$0 sm:$0xff] }
  0x16   :  { %838 = vmatprep.subr.bf16.mxu1 %v915_v21  ;;  %v957_v1 = vld [vmem:[%s1196_s1 + $0x1b0] sm:$0xff]   ;;  %v959_v3 = vld [vmem:[%s1196_s1 + $0x1f8] sm:$0xff]  }
  0x17   :  { %v960_v4 = vld [vmem:[%s1196_s1 + $0x138] sm:$0xff]   ;;  %v17_v6 = vld [vmem:[%s1197_s0 + $0x10] sm:$0xff] }
  0x18   :  { %817 = vmatpush3.bf16.msra.mxu0 %v916_v22  ;;  %v961_v5 = vld [vmem:[%s1196_s1 + $0x1b8] sm:$0xff]   ;;  %v738_v7 = vcombine.low %v17_v6, %v17_v6  ;;  %v739_v8 = vcombine.high %v17_v6, %v17_v6 }
  0x19   :  { %839 = vmatpush3.bf16.msra.mxu1 %v917_v23  ;;  %818 = vmatprep.subr.bf16.mxu0 %v918_v24  ;;  %v18_v9 = vld [vmem:[%s1197_s0 + $0x18] sm:$0xff] }
  0x1a   :  { %840 = vmatprep.subr.bf16.mxu1 %v919_v25  ;;  %v740_v10 = vcombine.low %v18_v9, %v18_v9  ;;  %v741_v11 = vcombine.high %v18_v9, %v18_v9 }
  0x1c   :  { %819 = vmatpush3.bf16.msra.mxu0 %v920_v26 }
  0x1d   :  { %841 = vmatpush3.bf16.msra.mxu1 %v921_v27  ;;  %820 = vmatprep.subr.bf16.mxu0 %v922_v28 }
  0x1e   :  { %842 = vmatprep.subr.bf16.mxu1 %v923_v29 }
  0x20   :  { %821 = vmatpush3.bf16.msra.mxu0 %v924_v30 }
  0x21   :  { %843 = vmatpush3.bf16.msra.mxu1 %v925_v31  ;;  %850 = vmatprep.subr.bf16.mxu0 %v930_v38 }
  0x22   :  { %872 = vmatprep.subr.bf16.mxu1 %v931_v39 }
  0x23   :  { %599 = vmatmul.mubr.bf16.vlgmr.msra.gmra.mrb[0].mxu0 %v734_v34 }
  0x24   :  { %639 = vmatmul.mubr.bf16.vlgmr.msra.gmra.mrb[0].mxu1 %v736_v36  ;;  %851 = vmatpush3.bf16.msra.mxu0 %v932_v40 }
  0x25   :  { %873 = vmatpush3.bf16.msra.mxu1 %v933_v41  ;;  %852 = vmatprep.subr.bf16.mxu0 %v934_v42 }
  0x26   :  { %874 = vmatprep.subr.bf16.mxu1 %v935_v43  ;;  %678 = vmatprep.mubr.bf16.mxu0 %v739_v8 }
  0x27   :  { %718 = vmatprep.mubr.bf16.mxu1 %v741_v11 }
  0x28   :  { %853 = vmatpush3.bf16.msra.mxu0 %v936_v44 }
  0x29   :  { %875 = vmatpush3.bf16.msra.mxu1 %v937_v45  ;;  %854 = vmatprep.subr.bf16.mxu0 %v938_v46 }
  0x2a   :  { %876 = vmatprep.subr.bf16.mxu1 %v939_v47 }
  0x2c   :  { %855 = vmatpush3.bf16.msra.mxu0 %v940_v48 }
  0x2d   :  { %877 = vmatpush3.bf16.msra.mxu1 %v941_v49  ;;  %856 = vmatprep.subr.bf16.mxu0 %v942_v50 }
  0x2e   :  { %878 = vmatprep.subr.bf16.mxu1 %v943_v51 }
  0x30   :  { %857 = vmatpush3.bf16.msra.mxu0 %v944_v52 }
  0x31   :  { %879 = vmatpush3.bf16.msra.mxu1 %v945_v53  ;;  %858 = vmatprep.subr.bf16.mxu0 %v946_v54 }
  0x32   :  { %880 = vmatprep.subr.bf16.mxu1 %v947_v55 }
  0x34   :  { %859 = vmatpush3.bf16.msra.mxu0 %v948_v56 }
  0x35   :  { %881 = vmatpush3.bf16.msra.mxu1 %v949_v57  ;;  %860 = vmatprep.subr.bf16.mxu0 %v950_v58 }
  0x36   :  { %882 = vmatprep.subr.bf16.mxu1 %v951_v59 }
  0x38   :  { %861 = vmatpush3.bf16.msra.mxu0 %v952_v60 }
  0x39   :  { %883 = vmatpush3.bf16.msra.mxu1 %v953_v61  ;;  %862 = vmatprep.subr.bf16.mxu0 %v954_v62 }
  0x3a   :  { %884 = vmatprep.subr.bf16.mxu1 %v955_v63 }
  0x3c   :  { %863 = vmatpush3.bf16.msra.mxu0 %v956_v0 }
  0x3d   :  { %885 = vmatpush3.bf16.msra.mxu1 %v957_v1  ;;  %864 = vmatprep.subr.bf16.mxu0 %v958_v2 }
  0x3e   :  { %886 = vmatprep.subr.bf16.mxu1 %v959_v3 }
  0x40   :  { %865 = vmatpush3.bf16.msra.mxu0 %v960_v4 }
  0x41   :  { %887 = vmatpush3.bf16.msra.mxu1 %v961_v5 }
  0x43   :  { %679 = vmatmul.mubr.bf16.vlgmr.msra.gmra.mrb[4].mxu0 %v738_v7 }
  0x44   :  { %719 = vmatmul.mubr.bf16.vlgmr.msra.gmra.mrb[4].mxu1 %v740_v10 }
  0xf6   :  { %v822_v12 = vpop.f32.mrb[0].mxu0 }
  0xf7   :  { %v844_v13 = vpop.f32.mrb[0].mxu1  ;;  %v823_v15 = vpop.f32.mrb[1].mxu0 }
  0xf8   :  { %v845_v16 = vpop.f32.mrb[1].mxu1  ;;  %v824_v17 = vadd.f32 %v823_v15, %v822_v12  ;;  %v825_v19 = vpop.f32.mrb[2].mxu0 }
  0xf9   :  { %v846_v18 = vadd.f32 %v845_v16, %v844_v13  ;;  %v847_v20 = vpop.f32.mrb[2].mxu1  ;;  %v826_v21 = vpop.f32.mrb[3].mxu0 }
  0xfa   :  { %v848_v22 = vpop.f32.mrb[3].mxu1  ;;  %v601_v23 = vadd.f32 %v824_v17, %v733_v14 }
  0xfc   :  { %v641_v24 = vadd.f32 %v846_v18, %v601_v23 }
 0x116   :  { %v866_v25 = vpop.f32.mrb[4].mxu0 }
 0x117   :  { %v888_v26 = vpop.f32.mrb[4].mxu1  ;;  %v867_v27 = vpop.f32.mrb[5].mxu0 }
 0x118   :  { %v889_v28 = vpop.f32.mrb[5].mxu1  ;;  %v868_v29 = vadd.f32 %v867_v27, %v866_v25  ;;  %v869_v31 = vpop.f32.mrb[6].mxu0 }
 0x119   :  { %v890_v30 = vadd.f32 %v889_v28, %v888_v26  ;;  %v891_v32 = vpop.f32.mrb[6].mxu1  ;;  %v870_v33 = vpop.f32.mrb[7].mxu0 }
 0x11a   :  { %v892_v34 = vpop.f32.mrb[7].mxu1  ;;  %v681_v35 = vadd.f32 %v868_v29, %v641_v24 }
 0x11c   :  { %v721_v36 = vadd.f32 %v890_v30, %v681_v35 }
 0x11e   :  { %v726_v37 = vmax.f32 %v721_v36, 0.0 }
 0x120   :  { %728 = vst.msk [vmem:[%s1199_s3] sm:$0xff] %vm727_vm0, %v726_v37 }

// kernel: unif_model_forward.27
= control target key start
LH: loop header
LB: loop body
LE: loop exit
PB: predicated region body
PF: predicated region fallthrough
CT: control target
= control target key end

     0   :  { %v176_v0 = vmov 0   ;;  %vm101_vm0 = vcmask 130048   ;;  %vm145_vm1 = vcmask 261120   ;;  %s233_s1 = inlined_call_operand.vmem [shape: bf16[1,144,32], index: 1, kind: input, shape index: {}]   ;;  %s234_s0 = inlined_call_operand.vmem [shape: bf16[1,8,144], index: 0, kind: input, shape index: {}]   ;;  %s235_s2 = inlined_call_operand.vmem [shape: f32[1,1,32], index: 2, kind: input, shape index: {}]   ;;  %s236_s3 = inlined_call_operand.vmem [shape: f32[1,8,32], index: 3, kind: output, shape index: {}]  }
   0x1   :  { %105 = vmatprep.subr.bf16.mxu0 %v176_v0  ;;  %v165_v1 = vld [vmem:[%s233_s1] sm:$0xff]   ;;  %v166_v2 = vld [vmem:[%s233_s1 + $0x8] sm:$0xff]   ;;  %v167_v3 = vld [vmem:[%s233_s1 + $0x10] sm:$0xff]  }
   0x2   :  { %106 = vmatpush1.bf16.msra.mxu0 %v165_v1  ;;  %v15_v4 = vld [vmem:[%s234_s0] sm:$0xff]  ;;  %v168_v5 = vld [vmem:[%s233_s1 + $0x18] sm:$0xff]   ;;  %v170_v8 = vld [vmem:[%s233_s1 + $0x28] sm:$0xff]  }
   0x3   :  { %107 = vmatprep.subr.bf16.mxu0 %v176_v0  ;;  %v153_v6 = vcombine.high %v15_v4, %v15_v4  ;;  %v169_v7 = vld [vmem:[%s233_s1 + $0x20] sm:$0xff]   ;;  %v171_v9 = vld [vmem:[%s233_s1 + $0x30] sm:$0xff]   ;;  %v172_v10 = vld [vmem:[%s233_s1 + $0x38] sm:$0xff]   ;;  %v152_v12 = vcombine.low %v15_v4, %v15_v4 }
   0x4   :  { %v173_v11 = vld [vmem:[%s233_s1 + $0x40] sm:$0xff]  }
   0x5   :  { %163 = vmatprep.mubr.msk.bf16.mxu0 %vm101_vm0, %v153_v6  ;;  %v151_v13 = vld [vmem:[%s235_s2] ss:$0 sm:$0xff] }
   0x6   :  { %108 = vmatpush1.bf16.msra.mxu0 %v166_v2 }
   0x7   :  { %109 = vmatprep.subr.bf16.mxu0 %v176_v0 }
   0xa   :  { %110 = vmatpush1.bf16.msra.mxu0 %v167_v3 }
   0xb   :  { %111 = vmatprep.subr.bf16.mxu0 %v176_v0 }
   0xe   :  { %112 = vmatpush1.bf16.msra.mxu0 %v168_v5 }
   0xf   :  { %113 = vmatprep.subr.bf16.mxu0 %v176_v0 }
  0x12   :  { %114 = vmatpush1.bf16.msra.mxu0 %v169_v7 }
  0x13   :  { %115 = vmatprep.subr.bf16.mxu0 %v176_v0 }
  0x16   :  { %116 = vmatpush1.bf16.msra.mxu0 %v170_v8 }
  0x17   :  { %117 = vmatprep.subr.bf16.mxu0 %v176_v0 }
  0x1a   :  { %118 = vmatpush1.bf16.msra.mxu0 %v171_v9 }
  0x1b   :  { %119 = vmatprep.subr.bf16.mxu0 %v176_v0 }
  0x1e   :  { %120 = vmatpush1.bf16.msra.mxu0 %v172_v10 }
  0x1f   :  { %121 = vmatprep.subr.bf16.mxu0 %v176_v0 }
  0x22   :  { %122 = vmatpush1.bf16.msra.mxu0 %v173_v11 }
  0x25   :  { %138 = vmatmul.mubr.bf16.vlgmr.msra.gmra.mrb[0].mxu0 %v152_v12 }
  0xf8   :  { %v139_v14 = vpop.f32.mrb[0].mxu0 }
  0xf9   :  { %v140_v15 = vadd.f32 %v151_v13, %v139_v14  ;;  %v141_v16 = vpop.f32.mrb[1].mxu0 }
  0xfa   :  { %v142_v17 = vpop.f32.mrb[2].mxu0 }
  0xfb   :  { %146 = vst.msk [vmem:[%s236_s3] sm:$0xff] %vm145_vm1, %v140_v15  ;;  %v143_v18 = vpop.f32.mrb[3].mxu0 }

// kernel: unif_model_forward.28
= control target key start
LH: loop header
LB: loop body
LE: loop exit
PB: predicated region body
PF: predicated region fallthrough
CT: control target
= control target key end

     0   :  { %v425_v1 = vmov 0.0   ;;  %vm426_vm0 = vmmov 0   ;;  %vm187_vm1 = vcmask 261120   ;;  %vm285_vm2 = vcmask 1043456   ;;  %s541_s1 = inlined_call_operand.vmem [shape: bf16[1,288,8], index: 1, kind: input, shape index: {}]   ;;  %s542_s0 = inlined_call_operand.vmem [shape: bf16[1,8,288], index: 0, kind: input, shape index: {}]   ;;  %s543_s3 = inlined_call_operand.vmem [shape: bf16[1,8,32], index: 3, kind: input, shape index: {}]   ;;  %s544_s2 = inlined_call_operand.vmem [shape: f32[1,1,8], index: 2, kind: input, shape index: {}]   ;;  %s545_s4 = inlined_call_operand.vmem [shape: f32[1,1,32], index: 4, kind: input, shape index: {}]   ;;  %s546_s5 = inlined_call_operand.vmem [shape: f32[1,8,32], index: 5, kind: input, shape index: {}]   ;;  %s547_s6 = inlined_call_operand.vmem [shape: f32[1,8,32], index: 6, kind: output, shape index: {}]  }
   0x1   :  { %v404_v0 = vld [vmem:[%s541_s1 + $0x40] sm:$0xff]   ;;  %388 = vmatprep.subr.bf16.mxu1 %v425_v1  ;;  %392 = vmatprep.mubr.msk.bf16.mxu1 %vm426_vm0, %v425_v1  ;;  %v406_v3 = vld [vmem:[%s541_s1 + $0x48] sm:$0xff]   ;;  %v408_v5 = vld [vmem:[%s541_s1 + $0x50] sm:$0xff]   ;;  %vm281_vm3 = vcmask 64512  }
   0x2   :  { %v405_v2 = vld [vmem:[%s541_s1] sm:$0xff]   ;;  %361 = vmatprep.subr.bf16.mxu0 %v404_v0  ;;  %v407_v4 = vld [vmem:[%s541_s1 + $0x8] sm:$0xff]   ;;  %v409_v6 = vld [vmem:[%s541_s1 + $0x10] sm:$0xff]  }
   0x3   :  { %362 = vmatpush3.bf16.msra.mxu0 %v405_v2  ;;  %v410_v7 = vld [vmem:[%s541_s1 + $0x58] sm:$0xff]   ;;  %v412_v9 = vld [vmem:[%s541_s1 + $0x60] sm:$0xff]   ;;  %v414_v12 = vld [vmem:[%s541_s1 + $0x68] sm:$0xff]  }
   0x4   :  { %363 = vmatprep.subr.bf16.mxu0 %v406_v3  ;;  %v411_v8 = vld [vmem:[%s541_s1 + $0x18] sm:$0xff]   ;;  %v418_v10 = vld [vmem:[%s541_s1 + $0x80] sm:$0xff]   ;;  %v424_v15 = vld [vmem:[%s541_s1 + $0x88] sm:$0xff]  }
   0x5   :  { %v413_v11 = vld [vmem:[%s541_s1 + $0x20] sm:$0xff]   ;;  %389 = vmatpush3.bf16.msra.mxu1 %v418_v10  ;;  %v415_v16 = vld [vmem:[%s541_s1 + $0x28] sm:$0xff]   ;;  %v416_v17 = vld [vmem:[%s541_s1 + $0x70] sm:$0xff]  }
   0x6   :  { %390 = vmatprep.subr.bf16.mxu1 %v425_v1  ;;  %v24_v13 = vld [vmem:[%s542_s0] sm:$0xff]  ;;  %v423_v18 = vld [vmem:[%s542_s0 + $0x8] ss:$0 sps:$4 sm:$0xff]   ;;  %v417_v19 = vld [vmem:[%s541_s1 + $0x30] sm:$0xff]  }
   0x7   :  { %364 = vmatpush3.bf16.msra.mxu0 %v407_v4  ;;  %v338_v14 = vcombine.high %v24_v13, %v24_v13  ;;  %v419_v20 = vld [vmem:[%s541_s1 + $0x78] sm:$0xff]   ;;  %v337_v22 = vcombine.low %v24_v13, %v24_v13  ;;  %v273_v23 = vld [vmem:[%s543_s3] sm:$0xf] }
   0x8   :  { %365 = vmatprep.subr.bf16.mxu0 %v408_v5  ;;  %v420_v21 = vld [vmem:[%s541_s1 + $0x38] sm:$0xff]   ;;  %v287_v24 = vsel %vm285_vm2, %v273_v23, 0  ;;  %v336_v31 = vld [vmem:[%s544_s2] ss:$0 sm:$0xff] }
   0x9   :  { %223 = vmatprep.mubr.bf16.mxu0 %v338_v14  ;;  %391 = vmatpush3.bf16.msra.mxu1 %v424_v15  ;;  %v359_v39 = vld [vmem:[%s545_s4] ss:$0 sm:$0xff] }
   0xa   :  { %396 = vmatprep.subr.bf16.mxu1 %v425_v1  ;;  %v329_v41 = vld [vmem:[%s546_s5] sm:$0xff] }
   0xb   :  { %366 = vmatpush3.bf16.msra.mxu0 %v409_v6 }
   0xc   :  { %367 = vmatprep.subr.bf16.mxu0 %v410_v7  ;;  %393 = vmatmul.mubr.msk.bf16.vlgmr.msra.gmra.mrb[0].mxu1 %vm187_vm1, %v423_v18 }
   0xd   :  { %398 = vmatprep.mubr.msk.bf16.mxu1 %vm426_vm0, %v425_v1  ;;  %397 = vmatpush3.bf16.msra.mxu1 %v287_v24 }
   0xf   :  { %368 = vmatpush3.bf16.msra.mxu0 %v411_v8 }
  0x10   :  { %369 = vmatprep.subr.bf16.mxu0 %v412_v9 }
  0x13   :  { %370 = vmatpush3.bf16.msra.mxu0 %v413_v11 }
  0x14   :  { %371 = vmatprep.subr.bf16.mxu0 %v414_v12 }
  0x17   :  { %372 = vmatpush3.bf16.msra.mxu0 %v415_v16 }
  0x18   :  { %373 = vmatprep.subr.bf16.mxu0 %v416_v17 }
  0x1b   :  { %374 = vmatpush3.bf16.msra.mxu0 %v417_v19 }
  0x1c   :  { %375 = vmatprep.subr.bf16.mxu0 %v419_v20 }
  0x1f   :  { %376 = vmatpush3.bf16.msra.mxu0 %v420_v21 }
  0x22   :  { %224 = vmatmul.mubr.bf16.vlgmr.msra.gmra.mrb[0].mxu0 %v337_v22 }
  0xdf   :  { %v265_v25 = vpop.f32.mrb[0].mxu1 }
  0xe0   :  { %v394_v26 = vpop.f32.mrb[1].mxu1 }
  0xe1   :  { %v268_v27 = vpop.f32.mrb[2].mxu1 }
  0xe2   :  { %v395_v28 = vpop.f32.mrb[3].mxu1 }
  0xf5   :  { %v377_v29 = vpop.f32.mrb[0].mxu0 }
  0xf6   :  { %v378_v30 = vpop.f32.mrb[1].mxu0 }
  0xf7   :  { %v379_v32 = vadd.f32 %v378_v30, %v377_v29  ;;  %v380_v33 = vpop.f32.mrb[2].mxu0 }
  0xf8   :  { %v381_v34 = vpop.f32.mrb[3].mxu0 }
  0xf9   :  { %v226_v35 = vadd.f32 %v379_v32, %v336_v31 }
  0xfb   :  { %v266_v36 = vadd.f32 %v265_v25, %v226_v35 }
  0xfd   :  { %v271_v37 = vmax.f32 %v266_v36, 0.0 }
  0xff   :  { %v272_v38 = vpack.c.bf16 %v271_v37, %v271_v37 }
 0x101   :  { %399 = vmatmul.mubr.msk.bf16.vlgmr.msra.gmra.mrb[4].mxu1 %vm281_vm3, %v272_v38 }
 0x1d4   :  { %v323_v40 = vpop.f32.mrb[4].mxu1 }
 0x1d5   :  { %v324_v42 = vadd.f32 %v359_v39, %v323_v40  ;;  %v400_v43 = vpop.f32.mrb[5].mxu1 }
 0x1d6   :  { %v326_v44 = vpop.f32.mrb[6].mxu1 }
 0x1d7   :  { %v330_v45 = vadd.f32 %v329_v41, %v324_v42  ;;  %v401_v46 = vpop.f32.mrb[7].mxu1 }
 0x1d9   :  { %331 = vst.msk [vmem:[%s547_s6] sm:$0xff] %vm187_vm1, %v330_v45 }

// kernel: unif_model_forward.29
= control target key start
LH: loop header
LB: loop body
LE: loop exit
PB: predicated region body
PF: predicated region fallthrough
CT: control target
= control target key end

     0   :  { %v426_v1 = vmov 0.0   ;;  %vm427_vm0 = vmmov 0   ;;  %vm187_vm1 = vcmask 261120   ;;  %vm285_vm2 = vcmask 1043456   ;;  %s542_s1 = inlined_call_operand.vmem [shape: bf16[1,288,8], index: 1, kind: input, shape index: {}]   ;;  %s543_s0 = inlined_call_operand.vmem [shape: bf16[1,8,288], index: 0, kind: input, shape index: {}]   ;;  %s544_s3 = inlined_call_operand.vmem [shape: bf16[1,8,32], index: 3, kind: input, shape index: {}]   ;;  %s545_s2 = inlined_call_operand.vmem [shape: f32[1,1,8], index: 2, kind: input, shape index: {}]   ;;  %s546_s4 = inlined_call_operand.vmem [shape: f32[1,1,32], index: 4, kind: input, shape index: {}]   ;;  %s547_s5 = inlined_call_operand.vmem [shape: f32[1,8,32], index: 5, kind: input, shape index: {}]   ;;  %s548_s6 = inlined_call_operand.vmem [shape: f32[1,8,32], index: 6, kind: output, shape index: {}]  }
   0x1   :  { %v405_v0 = vld [vmem:[%s542_s1 + $0x40] sm:$0xff]   ;;  %389 = vmatprep.subr.bf16.mxu1 %v426_v1  ;;  %393 = vmatprep.mubr.msk.bf16.mxu1 %vm427_vm0, %v426_v1  ;;  %v407_v3 = vld [vmem:[%s542_s1 + $0x48] sm:$0xff]   ;;  %v409_v5 = vld [vmem:[%s542_s1 + $0x50] sm:$0xff]   ;;  %vm281_vm3 = vcmask 64512  }
   0x2   :  { %v406_v2 = vld [vmem:[%s542_s1] sm:$0xff]   ;;  %362 = vmatprep.subr.bf16.mxu0 %v405_v0  ;;  %v408_v4 = vld [vmem:[%s542_s1 + $0x8] sm:$0xff]   ;;  %v410_v6 = vld [vmem:[%s542_s1 + $0x10] sm:$0xff]  }
   0x3   :  { %363 = vmatpush3.bf16.msra.mxu0 %v406_v2  ;;  %v411_v7 = vld [vmem:[%s542_s1 + $0x58] sm:$0xff]   ;;  %v413_v9 = vld [vmem:[%s542_s1 + $0x60] sm:$0xff]   ;;  %v415_v12 = vld [vmem:[%s542_s1 + $0x68] sm:$0xff]  }
   0x4   :  { %364 = vmatprep.subr.bf16.mxu0 %v407_v3  ;;  %v412_v8 = vld [vmem:[%s542_s1 + $0x18] sm:$0xff]   ;;  %v419_v10 = vld [vmem:[%s542_s1 + $0x80] sm:$0xff]   ;;  %v425_v15 = vld [vmem:[%s542_s1 + $0x88] sm:$0xff]  }
   0x5   :  { %v414_v11 = vld [vmem:[%s542_s1 + $0x20] sm:$0xff]   ;;  %390 = vmatpush3.bf16.msra.mxu1 %v419_v10  ;;  %v416_v16 = vld [vmem:[%s542_s1 + $0x28] sm:$0xff]   ;;  %v417_v17 = vld [vmem:[%s542_s1 + $0x70] sm:$0xff]  }
   0x6   :  { %391 = vmatprep.subr.bf16.mxu1 %v426_v1  ;;  %v24_v13 = vld [vmem:[%s543_s0] sm:$0xff]  ;;  %v424_v18 = vld [vmem:[%s543_s0 + $0x8] ss:$0 sps:$4 sm:$0xff]   ;;  %v418_v19 = vld [vmem:[%s542_s1 + $0x30] sm:$0xff]  }
   0x7   :  { %365 = vmatpush3.bf16.msra.mxu0 %v408_v4  ;;  %v339_v14 = vcombine.high %v24_v13, %v24_v13  ;;  %v420_v20 = vld [vmem:[%s542_s1 + $0x78] sm:$0xff]   ;;  %v338_v22 = vcombine.low %v24_v13, %v24_v13  ;;  %v273_v23 = vld [vmem:[%s544_s3] sm:$0xf] }
   0x8   :  { %366 = vmatprep.subr.bf16.mxu0 %v409_v5  ;;  %v421_v21 = vld [vmem:[%s542_s1 + $0x38] sm:$0xff]   ;;  %v287_v24 = vsel %vm285_vm2, %v273_v23, 0  ;;  %v337_v31 = vld [vmem:[%s545_s2] ss:$0 sm:$0xff] }
   0x9   :  { %223 = vmatprep.mubr.bf16.mxu0 %v339_v14  ;;  %392 = vmatpush3.bf16.msra.mxu1 %v425_v15  ;;  %v360_v39 = vld [vmem:[%s546_s4] ss:$0 sm:$0xff] }
   0xa   :  { %397 = vmatprep.subr.bf16.mxu1 %v426_v1  ;;  %v329_v41 = vld [vmem:[%s547_s5] sm:$0xff] }
   0xb   :  { %367 = vmatpush3.bf16.msra.mxu0 %v410_v6 }
   0xc   :  { %368 = vmatprep.subr.bf16.mxu0 %v411_v7  ;;  %394 = vmatmul.mubr.msk.bf16.vlgmr.msra.gmra.mrb[0].mxu1 %vm187_vm1, %v424_v18 }
   0xd   :  { %399 = vmatprep.mubr.msk.bf16.mxu1 %vm427_vm0, %v426_v1  ;;  %398 = vmatpush3.bf16.msra.mxu1 %v287_v24 }
   0xf   :  { %369 = vmatpush3.bf16.msra.mxu0 %v412_v8 }
  0x10   :  { %370 = vmatprep.subr.bf16.mxu0 %v413_v9 }
  0x13   :  { %371 = vmatpush3.bf16.msra.mxu0 %v414_v11 }
  0x14   :  { %372 = vmatprep.subr.bf16.mxu0 %v415_v12 }
  0x17   :  { %373 = vmatpush3.bf16.msra.mxu0 %v416_v16 }
  0x18   :  { %374 = vmatprep.subr.bf16.mxu0 %v417_v17 }
  0x1b   :  { %375 = vmatpush3.bf16.msra.mxu0 %v418_v19 }
  0x1c   :  { %376 = vmatprep.subr.bf16.mxu0 %v420_v20 }
  0x1f   :  { %377 = vmatpush3.bf16.msra.mxu0 %v421_v21 }
  0x22   :  { %224 = vmatmul.mubr.bf16.vlgmr.msra.gmra.mrb[0].mxu0 %v338_v22 }
  0xdf   :  { %v265_v25 = vpop.f32.mrb[0].mxu1 }
  0xe0   :  { %v395_v26 = vpop.f32.mrb[1].mxu1 }
  0xe1   :  { %v268_v27 = vpop.f32.mrb[2].mxu1 }
  0xe2   :  { %v396_v28 = vpop.f32.mrb[3].mxu1 }
  0xf5   :  { %v378_v29 = vpop.f32.mrb[0].mxu0 }
  0xf6   :  { %v379_v30 = vpop.f32.mrb[1].mxu0 }
  0xf7   :  { %v380_v32 = vadd.f32 %v379_v30, %v378_v29  ;;  %v381_v33 = vpop.f32.mrb[2].mxu0 }
  0xf8   :  { %v382_v34 = vpop.f32.mrb[3].mxu0 }
  0xf9   :  { %v226_v35 = vadd.f32 %v380_v32, %v337_v31 }
  0xfb   :  { %v266_v36 = vadd.f32 %v265_v25, %v226_v35 }
  0xfd   :  { %v271_v37 = vmax.f32 %v266_v36, 0.0 }
  0xff   :  { %v272_v38 = vpack.c.bf16 %v271_v37, %v271_v37 }
 0x101   :  { %400 = vmatmul.mubr.msk.bf16.vlgmr.msra.gmra.mrb[4].mxu1 %vm281_vm3, %v272_v38 }
 0x1d4   :  { %v323_v40 = vpop.f32.mrb[4].mxu1 }
 0x1d5   :  { %v324_v42 = vadd.f32 %v360_v39, %v323_v40  ;;  %v401_v43 = vpop.f32.mrb[5].mxu1 }
 0x1d6   :  { %v326_v44 = vpop.f32.mrb[6].mxu1 }
 0x1d7   :  { %v330_v45 = vadd.f32 %v329_v41, %v324_v42  ;;  %v402_v46 = vpop.f32.mrb[7].mxu1 }
 0x1d9   :  { %v331_v47 = vmax.f32 %v330_v45, 0.0 }
 0x1db   :  { %332 = vst.msk [vmem:[%s548_s6] sm:$0xff] %vm187_vm1, %v331_v47 }

// kernel: unif_model_forward.36
= control target key start
LH: loop header
LB: loop body
LE: loop exit
PB: predicated region body
PF: predicated region fallthrough
CT: control target
= control target key end

     0   :  { %vm65_vm0 = vcmask 523264   ;;  %vm122_vm1 = vcmask 517120   ;;  %s215_s1 = inlined_call_operand.vmem [shape: bf16[1,64,64], index: 1, kind: input, shape index: {}]   ;;  %s216_s0 = inlined_call_operand.vmem [shape: bf16[1,18,64], index: 0, kind: input, shape index: {}]   ;;  %s217_s2 = inlined_call_operand.vmem [shape: f32[1,1,64], index: 2, kind: input, shape index: {}]   ;;  %s218_s3 = inlined_call_operand.vmem [shape: f32[1,18,64], index: 3, kind: output, shape index: {}]  }
   0x1   :  { %v155_v0 = vld [vmem:[%s215_s1] sm:$0xff]   ;;  %v156_v1 = vld [vmem:[%s215_s1 + $0x8] sm:$0xff]   ;;  %v157_v2 = vld [vmem:[%s215_s1 + $0x10] sm:$0xff]  }
   0x2   :  { %143 = vmatprep.subr.bf16.mxu0 %v155_v0  ;;  %v159_v3 = vld [vmem:[%s216_s0] sm:$0xff]   ;;  %v158_v4 = vld [vmem:[%s215_s1 + $0x18] sm:$0xff]   ;;  %v160_v5 = vld [vmem:[%s216_s0 + $0x8] ss:$0 sps:$4 sm:$0x11]  }
   0x3   :  { %144 = vmatpush3.bf16.msra.mxu0 %v155_v0  ;;  %151 = vmatprep.mubr.msk.bf16.mxu0 %vm65_vm0, %v159_v3  ;;  %v128_v6 = vld [vmem:[%s217_s2] ss:$0 sm:$0xff] }
   0x4   :  { %145 = vmatprep.subr.bf16.mxu0 %v156_v1 }
   0x7   :  { %146 = vmatpush3.bf16.msra.mxu0 %v156_v1 }
   0x8   :  { %147 = vmatprep.subr.bf16.mxu0 %v157_v2 }
   0xb   :  { %148 = vmatpush3.bf16.msra.mxu0 %v157_v2 }
   0xc   :  { %149 = vmatprep.subr.bf16.mxu0 %v158_v4 }
   0xf   :  { %150 = vmatpush3.bf16.msra.mxu0 %v158_v4 }
  0x12   :  { %152 = vmatmul.mubr.msk.bf16.vlgmr.msra.gmra.mrb[0].mxu0 %vm65_vm0, %v160_v5 }
  0xe5   :  { %v153_v7 = vpop.f32.mrb[0].mxu0 }
  0xe6   :  { %v115_v8 = vadd.f32 %v153_v7, %v128_v6  ;;  %v106_v9 = vpop.f32.mrb[1].mxu0 }
  0xe7   :  { %v107_v10 = vadd.f32 %v128_v6, %v106_v9  ;;  %v154_v11 = vpop.f32.mrb[2].mxu0 }
  0xe8   :  { %123 = vst.msk [vmem:[%s218_s3 + $0x10] sm:$0x3] %vm122_vm1, %v115_v8  ;;  %v109_v12 = vpop.f32.mrb[3].mxu0 }
  0xe9   :  { %120 = vst.msk [vmem:[%s218_s3] sm:$0xff] %vm65_vm0, %v107_v10  ;;  %v110_v13 = vadd.f32 %v128_v6, %v109_v12 }
  0xeb   :  { %121 = vst.msk [vmem:[%s218_s3 + $0x8] sm:$0xff] %vm65_vm0, %v110_v13 }

// kernel: unif_model_forward.30
= control target key start
LH: loop header
LB: loop body
LE: loop exit
PB: predicated region body
PF: predicated region fallthrough
CT: control target
= control target key end

     0   :  { %v428_v1 = vmov 0.0   ;;  %vm429_vm0 = vmmov 0   ;;  %v430_v5 = vmov 0.0|0.0   ;;  %s553_s0 = inlined_call_operand.vmem [shape: bf16[1,8,32], index: 0, kind: input, shape index: {}]   ;;  %s554_s1 = inlined_call_operand.vmem [shape: bf16[1,32,16], index: 1, kind: input, shape index: {}]   ;;  %s555_s2 = inlined_call_operand.vmem [shape: f32[1,1,16], index: 2, kind: input, shape index: {}]   ;;  %s556_s3 = inlined_call_operand.vmem [shape: f32[1,16,64], index: 3, kind: input, shape index: {}]   ;;  %s557_s4 = inlined_call_operand.vmem [shape: f32[1,64,16], index: 4, kind: input, shape index: {}]   ;;  %s558_s5 = inlined_call_operand.vmem [shape: f32[1,8,16], index: 5, kind: output, shape index: {0}]   ;;  %s559_s6 = inlined_call_operand.hbm [shape: f32[1,1,1], index: 6, kind: output, shape index: {1}]  }
   0x1   :  { %v402_v0 = vld [vmem:[%s554_s1] sm:$0xff]   ;;  %349 = vmatprep.subr.bf16.mxu0 %v428_v1  ;;  %v403_v2 = vld [vmem:[%s554_s1 + $0x8] sm:$0xff]   ;;  %353 = vmatprep.mubr.msk.bf16.mxu0 %vm429_vm0, %v428_v1 }
   0x2   :  { %350 = vmatpush3.bf16.msra.mxu0 %v402_v0  ;;  %v92_v3 = vld [vmem:[%s556_s3] sm:$0xff]  ;;  %v93_v4 = vld [vmem:[%s556_s3 + $0x8] sm:$0xff]  ;;  %386 = vmatprep.subr.bf16.mxu1 %v430_v5 }
   0x3   :  { %351 = vmatprep.subr.bf16.mxu0 %v428_v1 }
   0x4   :  { %12 = vsyncpa [#allocation3], 0  ;;  %380 = vmatprep.mubr.msk.f32.mxu1 %vm429_vm0, %v428_v1  ;;  %v24_v6 = vld [vmem:[%s553_s0] sm:$0xf]  ;;  %vm48_vm1 = vcmask 261120   ;;  %v384_v7 = vpack.c.bf16 %v93_v4, %v92_v3  ;;  %vm95_vm2 = vcmask 130048   ;;  %v174_v16 = vmul.f32 %v92_v3, %v92_v3 }
   0x5   :  { %v327_v8 = vld [vmem:[%s555_s2] ss:$0 sm:$0xff]  ;;  %v175_v17 = vmul.f32 %v93_v4, %v93_v4  ;;  %vm176_vm3 = vcmask 523264   ;;  %v187_v34 = vlaneseq  ;;  %v213_v42 = vld [vmem:[%s557_s4 + $0x8] sm:$0xff]  ;;  %v214_v43 = vld [vmem:[%s557_s4 + $0x10] sm:$0xff]  ;;  %vm307_vm7 = vcmask 0  }
   0x6   :  { %352 = vmatpush3.bf16.msra.mxu0 %v403_v2  ;;  %v177_v18 = vsel %vm176_vm3, %v174_v16, 0.0  ;;  %v212_v41 = vld [vmem:[%s557_s4] sm:$0xff]  ;;  %v215_v45 = vld [vmem:[%s557_s4 + $0x18] sm:$0xff]  ;;  %v217_v48 = vld [vmem:[%s557_s4 + $0x28] sm:$0xff] }
   0x7   :  { %383 = vmatprep.subr.bf16.mxu0 %v430_v5  ;;  %v178_v19 = vsel %vm176_vm3, %v175_v17, 0.0  ;;  %v188_v35 = vand.u32 127, %v187_v34  ;;  %v387_v44 = vpack.c.bf16 %v213_v42, %v212_v41  ;;  %v390_v46 = vpack.c.bf16 %v215_v45, %v214_v43  ;;  %v216_v47 = vld [vmem:[%s557_s4 + $0x20] sm:$0xff]  ;;  %v218_v54 = vld [vmem:[%s557_s4 + $0x30] sm:$0xff]  ;;  %v219_v55 = vld [vmem:[%s557_s4 + $0x38] sm:$0xff]  ;;  %s431_s4 = smov [#allocation2]  }
   0x8   :  { %v179_v20 = vadd.f32 %v178_v19, %v177_v18  ;;  %v393_v49 = vpack.c.bf16 %v217_v48, %v216_v47  ;;  %v396_v56 = vpack.c.bf16 %v219_v55, %v218_v54  ;;  %s317_s23 = sshll.u32 %s431_s4, 4  ;;  %s318_s23 = int_to_ptr.vmem [resolvable:$true] %s317_s23 }
   0x9   :  { %354 = vmatmul.mubr.msk.bf16.vlgmr.msra.gmra.mrb[0].mxu0 %vm48_vm1, %v24_v6  ;;  %388 = vmatpush3.bf16.msra.mxu1 %v387_v44  ;;  %s408_s24 = scalar_lea.vmem %s318_s23, 32  ;;  %p409_p1 = scmp.lt.s32.totalorder %s318_s23, %s318_s23 }
   0xa   :  { %385 = vmatpush3.bf16.msra.mxu0 %v384_v7  ;;  %361 = vmatprep.mubr.msk.f32.mxu0 %vm429_vm0, %v428_v1  ;;  %v180_v21 = vrot.slane %v179_v20, 4 }
   0xb   :  { %389 = vmatprep.subr.bf16.mxu1 %v430_v5 }
   0xc   :  { %v181_v22 = vadd.f32 %v180_v21, %v179_v20 }
   0xd   :  { %391 = vmatpush3.bf16.msra.mxu1 %v390_v46 }
   0xe   :  { %v182_v23 = vrot.slane %v181_v22, 2  ;;  %392 = vmatprep.subr.bf16.mxu1 %v430_v5 }
  0x10   :  { %v183_v24 = vadd.f32 %v182_v23, %v181_v22 }
  0x11   :  { %394 = vmatpush3.bf16.msra.mxu1 %v393_v49 }
  0x12   :  { %v184_v25 = vrot.slane %v183_v24, 1  ;;  %395 = vmatprep.subr.bf16.mxu1 %v430_v5 }
  0x14   :  { %v185_v29 = vadd.f32 %v184_v25, %v183_v24 }
  0x15   :  { %397 = vmatpush3.bf16.msra.mxu1 %v396_v56 }
  0xdc   :  { %v86_v9 = vpop.f32.mrb[0].mxu0 }
  0xdd   :  { %v495_v10 = vadd.f32 %v327_v8, %v86_v9  ;;  %v355_v11 = vpop.f32.mrb[1].mxu0 }
  0xde   :  { %v89_v12 = vpop.f32.mrb[2].mxu0 }
  0xdf   :  { %v356_v13 = vpop.f32.mrb[3].mxu0  ;;  %362 = vmatmul.mubr.msk.f32.vlgmr.msra.gmra.mrb[4].mxu0 %vm95_vm2, %v495_v10  ;;  %v94_v14 = vmul.f32 %v495_v10, %v495_v10 }
  0xe1   :  { %v96_v15 = vsel %vm95_vm2, %v94_v14, 0.0 }
  0xe2   :  { %97 = vadd.xlane.f32.xlu0 %v96_v15 }
 0x16f   :  { %v98_v30 = vpop.xlane.xlu0 %97 }
 0x1b2   :  { %v168_v26 = vpop.f32.mrb[4].mxu0 }
 0x1b3   :  { %v172_v27 = vmul.f32 2.0, %v168_v26  ;;  %v363_v28 = vpop.f32.mrb[5].mxu0 }
 0x1b5   :  { %v173_v31 = vsub.f32 %v98_v30, %v172_v27 }
 0x1b7   :  { %v186_v32 = vadd.f32 %v185_v29, %v173_v31 }
 0x1b9   :  { %v189_v33 = vsel %vm176_vm3, %v186_v32, inf }
 0x1ba   :  { %190 = vmin.xlane.f32.xlu0 %v189_v33 }
 0x247   :  { %v191_v36 = vpop.xlane.xlu0 %190 }
 0x248   :  { %vm192_vm4 = vcmp.eq.f32.partialorder %v186_v32, %v191_v36 }
 0x249   :  { %v193_v37 = vsel %vm192_vm4, %v188_v35, 64 }
 0x24a   :  { %v194_v38 = vsel %vm176_vm3, %v193_v37, 2147483647 }
 0x24b   :  { %v196_v39 = vshra.s32 %v194_v38, 16  ;;  %v195_v50 = vand.u32 65535, %v194_v38 }
 0x24d   :  { %v198_v40 = vcvt.s32.f32 %v196_v39  ;;  %v197_v52 = vcvt.s32.f32 %v195_v50 }
 0x24f   :  { %199 = vmin.xlane.f32.xlu1 %v198_v40 }
 0x2dc   :  { %v200_v51 = vpop.xlane.xlu1 %199 }
 0x2dd   :  { %vm201_vm5 = vcmp.eq.f32.partialorder %v198_v40, %v200_v51  ;;  %v206_v57 = vcvt.f32.s32 %v200_v51 }
 0x2de   :  { %v202_v53 = vsel %vm201_vm5, %v197_v52, inf }
 0x2df   :  { %203 = vmin.xlane.f32.xlu1 %v202_v53  ;;  %v207_v59 = vshll.u32 %v206_v57, 16 }
 0x36c   :  { %v204_v58 = vpop.xlane.xlu1 %203 }
 0x36d   :  { %v205_v60 = vcvt.f32.s32 %v204_v58 }
 0x36f   :  { %v208_v61 = vadd.s32 %v207_v59, %v205_v60 }
 0x371   :  { %vm209_vm6 = vcmp.eq.s32.totalorder %v188_v35, %v208_v61 }
 0x372   :  { %v332_v62 = vsel %vm209_vm6, 1.0, %v428_v1 }
 0x373   :  { %381 = vmatmul.mubr.msk.f32.vlgmr.msra.gmra.mrb[0].mxu1 %vm176_vm3, %v332_v62 }
 0x446   :  { %v289_v63 = vpop.f32.mrb[0].mxu1 }
 0x447   :  { %293 = vst.msk [vmem:[%s558_s5] sm:$0xff] %vm95_vm2, %v289_v63  ;;  %v294_v0 = vsub.f32 %v289_v63, %v495_v10  ;;  %v382_v2 = vpop.f32.mrb[1].mxu1  ;;  %s404_s5 = scalar_lea.vmem %s318_s23, 16 }
 0x448   :  { %p405_p0 = scmp.ne.s32.totalorder %s318_s23, %s404_s5  ;;  %p410_p2 = scmp.lt.s32.totalorder %s408_s24, %s404_s5 }
 0x449   :  { %v295_v3 = vmul.f32 %v294_v0, %v294_v0 }
 0x44a   :  { %p411_p3 = por %p410_p2, %p409_p1 }
 0x44b   :  { %v296_v4 = vsel %vm95_vm2, %v295_v3, 0.0 }
 0x44c   :  { %297 = vadd.xlane.f32.xlu0 %v296_v4  ;;  %p412_p4 = pnand %p411_p3, %p405_p0 }
 0x4d9   :  { %v298_v5 = vpop.xlane.xlu0 %297 }
 0x4da   :  { %v299_v6 = vrot.slane %v298_v5, 4 }
 0x4dc   :  { %v300_v7 = vadd.f32 %v299_v6, %v298_v5 }
 0x4de   :  { %v301_v8 = vrot.slane %v300_v7, 2 }
 0x4e0   :  { %v302_v1 = vadd.f32 %v301_v8, %v300_v7 }
 0x4e2   :  { %v303_v9 = vrot.slane %v302_v1, 1 }
 0x4e4   :  { %v304_v11 = vadd.f32 %v303_v9, %v302_v1 }
 0x4e6   :  { %v306_v12 = vmul.f32 0.0078125, %v304_v11 }
 0x4e8   :  { %308 = vst.msk [vmem:[#allocation2] sm:$0x1] %vm307_vm7, %v306_v12 }
 0x4e9   :  { %415 = shalt.err (!%p412_p4)
}
 0x4ea   :  { %s416_s27 = scalar_lea.hbm %s559_s6, 16 }
 0x4eb   :  { %p417_p5 = scmp.ne.s32.totalorder %s559_s6, %s416_s27  ;;  %p420_p6 = scmp.lt.u32.totalorder %s416_s27, %s559_s6 }
 0x4ed   :  { %p422_p7 = pnand %p420_p6, %p417_p5 }
 0x4ef   :  { %425 = shalt.err (!%p422_p7)
}
 0x4f0   :  { %320 = dma.vmem_to_hbm [thread:$0]  %s318_s23, 16, %s559_s6, [#allocation3]  }
 0x4f1   :  { %426 = dma.done.wait [#allocation3], 16  }
 0x4f2   :  { %427 = vsyncadd [#allocation3], 4294967280 }
 0x4f3   :  { %326 = vsyncpa [#allocation3], 1 }

// kernel: unif_model_forward.34
= control target key start
LH: loop header
LB: loop body
LE: loop exit
PB: predicated region body
PF: predicated region fallthrough
CT: control target
= control target key end

     0   :  { %vm150_vm0 = vcmask 517120   ;;  %vm147_vm1 = vcmask 523264   ;;  %s269_s1 = inlined_call_operand.vmem [shape: bf16[1,128,64], index: 1, kind: input, shape index: {}]   ;;  %s270_s0 = inlined_call_operand.vmem [shape: bf16[1,18,128], index: 0, kind: input, shape index: {}]   ;;  %s271_s2 = inlined_call_operand.vmem [shape: f32[1,1,64], index: 2, kind: input, shape index: {}]   ;;  %s272_s3 = inlined_call_operand.vmem [shape: f32[1,18,64], index: 3, kind: output, shape index: {}]  }
   0x1   :  { %v197_v0 = vld [vmem:[%s269_s1] sm:$0xff]   ;;  %v198_v1 = vld [vmem:[%s269_s1 + $0x8] sm:$0xff]   ;;  %v199_v2 = vld [vmem:[%s269_s1 + $0x10] sm:$0xff]  }
   0x2   :  { %177 = vmatprep.subr.bf16.mxu0 %v197_v0  ;;  %v200_v3 = vld [vmem:[%s269_s1 + $0x18] sm:$0xff]   ;;  %v205_v4 = vld [vmem:[%s270_s0] sm:$0xff]   ;;  %v202_v6 = vld [vmem:[%s269_s1 + $0x28] sm:$0xff]  }
   0x3   :  { %178 = vmatpush3.bf16.msra.mxu0 %v197_v0  ;;  %193 = vmatprep.mubr.bf16.mxu0 %v205_v4  ;;  %v201_v5 = vld [vmem:[%s269_s1 + $0x20] sm:$0xff]   ;;  %v203_v7 = vld [vmem:[%s269_s1 + $0x30] sm:$0xff]   ;;  %v204_v8 = vld [vmem:[%s269_s1 + $0x38] sm:$0xff]  }
   0x4   :  { %179 = vmatprep.subr.bf16.mxu0 %v198_v1  ;;  %v206_v9 = vld [vmem:[%s270_s0 + $0x8] ss:$0 sps:$4 sm:$0x11]   ;;  %v156_v10 = vld [vmem:[%s271_s2] ss:$0 sm:$0xff] }
   0x7   :  { %180 = vmatpush3.bf16.msra.mxu0 %v198_v1 }
   0x8   :  { %181 = vmatprep.subr.bf16.mxu0 %v199_v2 }
   0xb   :  { %182 = vmatpush3.bf16.msra.mxu0 %v199_v2 }
   0xc   :  { %183 = vmatprep.subr.bf16.mxu0 %v200_v3 }
   0xf   :  { %184 = vmatpush3.bf16.msra.mxu0 %v200_v3 }
  0x10   :  { %185 = vmatprep.subr.bf16.mxu0 %v201_v5 }
  0x13   :  { %186 = vmatpush3.bf16.msra.mxu0 %v201_v5 }
  0x14   :  { %187 = vmatprep.subr.bf16.mxu0 %v202_v6 }
  0x17   :  { %188 = vmatpush3.bf16.msra.mxu0 %v202_v6 }
  0x18   :  { %189 = vmatprep.subr.bf16.mxu0 %v203_v7 }
  0x1b   :  { %190 = vmatpush3.bf16.msra.mxu0 %v203_v7 }
  0x1c   :  { %191 = vmatprep.subr.bf16.mxu0 %v204_v8 }
  0x1f   :  { %192 = vmatpush3.bf16.msra.mxu0 %v204_v8 }
  0x22   :  { %194 = vmatmul.mubr.bf16.vlgmr.msra.gmra.mrb[0].mxu0 %v206_v9 }
  0xf5   :  { %v195_v11 = vpop.f32.mrb[0].mxu0 }
  0xf6   :  { %v142_v12 = vadd.f32 %v195_v11, %v156_v10  ;;  %v133_v13 = vpop.f32.mrb[1].mxu0 }
  0xf7   :  { %v134_v14 = vadd.f32 %v156_v10, %v133_v13  ;;  %v196_v15 = vpop.f32.mrb[2].mxu0 }
  0xf8   :  { %151 = vst.msk [vmem:[%s272_s3 + $0x10] sm:$0x3] %vm150_vm0, %v142_v12  ;;  %v136_v16 = vpop.f32.mrb[3].mxu0 }
  0xf9   :  { %148 = vst.msk [vmem:[%s272_s3] sm:$0xff] %vm147_vm1, %v134_v14  ;;  %v137_v17 = vadd.f32 %v156_v10, %v136_v16 }
  0xfb   :  { %149 = vst.msk [vmem:[%s272_s3 + $0x8] sm:$0xff] %vm147_vm1, %v137_v17 }

// kernel: unif_model_forward.35
= control target key start
LH: loop header
LB: loop body
LE: loop exit
PB: predicated region body
PF: predicated region fallthrough
CT: control target
= control target key end

     0   :  { %s1122_s21 = smov 0   ;;  %s1236_s0 = inlined_call_operand.vmem [shape: bf16[2,32,48], index: 0, kind: input, shape index: {}]   ;;  %s1237_s1 = inlined_call_operand.vmem [shape: bf16[2,48,16], index: 1, kind: input, shape index: {}]   ;;  %s1238_s2 = inlined_call_operand.vmem [shape: f32[2,1,16], index: 2, kind: input, shape index: {}]   ;;  %s1239_s3 = inlined_call_operand.vmem [shape: f32[2,16,64], index: 3, kind: input, shape index: {}]   ;;  %s1240_s4 = inlined_call_operand.vmem [shape: f32[2,64,16], index: 4, kind: input, shape index: {}]   ;;  %s1241_s5 = inlined_call_operand.vmem [shape: f32[2,32,16], index: 5, kind: output, shape index: {0}]   ;;  %s1242_s6 = inlined_call_operand.vmem [shape: f32[2,1,1], index: 6, kind: output, shape index: {1}]  }
   0x1 LB: > { %s938_s22 = sadd.s32 4294967295, %s1084_s21   ;;  %p942_p0 = scmp.ge.s32.totalorder %s1084_s21, 1  ;;  %s1084_s21 = sphi %s1122_s21, %s17_s21  }
   0x2   : > { %p253_p1 = scmp.lt.s32.totalorder %s1084_s21, 3 }
   0x4   : > { %p254_p2 = pnand %p942_p0, %p253_p1 }
   0x5   : > { %p304_p3 = scmp.lt.s32.totalorder (!%p254_p2), %s938_s22, 1  ;;  %vm381_vm0 = vcmask (!%p254_p2), 392192   ;;  %vm563_vm1 = vcmask (!%p254_p2), 523264   ;;  %vm443_vm2 = vcmask (!%p254_p2), 130048   ;;  %v577_v60 = vlaneseq (!%p254_p2) }
   0x6   : > { %257 = sbr.rel (%p254_p2) target bundleno = 1292 (0x50c), region = 40  ;;  %vm811_vm15 = vcmask (!%p254_p2), 0  }
   0x7   : > { %v1181_v61 = vand.u32 (!%p254_p2), 127, %v577_v60 }
   0xd   : > { %s1244_s22 = smov (!%p304_p3, %s938_s22), 1 }
   0xe   : > { %s1063_s23 = smul.u32 24, %s1244_s22  ;;  %s974_s24 = sshll.u32 %s1244_s22, 4 }
   0xf   : > { %s308_s27 = scalar_lea.vmem %s1236_s0, %s974_s24  ;;  %s321_s9 = scalar_lea.vmem %s1239_s3, %s974_s24 }
  0x10   : > { %s313_s30 = scalar_lea.vmem %s1237_s1, %s1063_s23  ;;  %v1076_v0 = vld [vmem:[%s308_s27] sm:$0xff]   ;;  %v1077_v4 = vld [vmem:[%s308_s27 + $0x8] sm:$0xff]   ;;  %s316_s12 = scalar_lea.vmem %s1238_s2, %s1244_s22 }
  0x11   : > { %v1073_v1 = vld [vmem:[%s313_s30] sm:$0xff]   ;;  %v1074_v2 = vld [vmem:[%s313_s30 + $0x8] sm:$0xff]   ;;  %1007 = vmatprep.mubr.msk.bf16.mxu0 %vm381_vm0, %v1076_v0  ;;  %v1075_v3 = vld [vmem:[%s313_s30 + $0x10] sm:$0xff]   ;;  %s976_s13 = sshll.u32 %s1244_s22, 6  ;;  %s977_s17 = sshll.u32 %s1244_s22, 5 }
  0x12   : > { %1001 = vmatprep.subr.bf16.mxu0 %v1073_v1  ;;  %v437_v5 = vld [vmem:[%s321_s9] sm:$0xff]  ;;  %v438_v6 = vld [vmem:[%s321_s9 + $0x8] sm:$0xff]  ;;  %s1195_s16 = scalar_lea.vmem %s1240_s4, %s976_s13  ;;  %s331_s20 = scalar_lea.vmem %s1241_s5, %s977_s17 }
  0x13   : > { %1002 = vmatpush3.bf16.msra.mxu0 %v1073_v1  ;;  %v1043_v7 = vpack.c.bf16 %v438_v6, %v437_v5  ;;  %v561_v8 = vmul.f32 %v437_v5, %v437_v5  ;;  %v562_v9 = vmul.f32 %v438_v6, %v438_v6  ;;  %v952_v13 = vld [vmem:[%s316_s12] ss:$0 sm:$0xff]  ;;  %s334_s25 = scalar_lea.vmem %s1242_s6, %s1244_s22 }
  0x14   : > { %1003 = vmatprep.subr.bf16.mxu0 %v1074_v2 }
  0x15   : > { %1044 = vmatprep.subr.bf16.mxu1 %v1043_v7  ;;  %v564_v10 = vsel %vm563_vm1, %v561_v8, 0.0  ;;  %v565_v11 = vsel %vm563_vm1, %v562_v9, 0.0 }
  0x16   : > { %1046 = vmatpush3.bf16.msra.mxu1 %v1043_v7  ;;  %v566_v12 = vadd.f32 %v565_v11, %v564_v10 }
  0x17   : > { %1004 = vmatpush3.bf16.msra.mxu0 %v1074_v2 }
  0x18   : > { %1005 = vmatprep.subr.bf16.mxu0 %v1075_v3  ;;  %v567_v30 = vrot.slane %v566_v12, 4 }
  0x1a   : > { %v568_v31 = vadd.f32 %v567_v30, %v566_v12 }
  0x1b   : > { %1006 = vmatpush3.bf16.msra.mxu0 %v1075_v3 }
  0x1c   : > { %v569_v32 = vrot.slane %v568_v31, 2 }
  0x1e   : > { %1008 = vmatmul.mubr.msk.bf16.vlgmr.msra.gmra.mrb[0].mxu0 %vm381_vm0, %v1077_v4  ;;  %v570_v33 = vadd.f32 %v569_v32, %v568_v31 }
  0x20   : > { %v571_v35 = vrot.slane %v570_v33, 1 }
  0x22   : > { %v572_v40 = vadd.f32 %v571_v35, %v570_v33 }
  0xf1   : > { %v1009_v14 = vpop.f32.mrb[0].mxu0 }
  0xf2   : > { %v1149_v15 = vadd.f32 %v1009_v14, %v952_v13  ;;  %v422_v16 = vpop.f32.mrb[1].mxu0 }
  0xf3   : > { %v1151_v17 = vadd.f32 %v952_v13, %v422_v16  ;;  %v1010_v18 = vpop.f32.mrb[2].mxu0 }
  0xf4   : > { %v1153_v19 = vadd.f32 %v1010_v18, %v952_v13  ;;  %v425_v20 = vpop.f32.mrb[3].mxu0  ;;  %v441_v21 = vmul.f32 %v1149_v15, %v1149_v15 }
  0xf5   : > { %v1157_v22 = vadd.f32 %v952_v13, %v425_v20  ;;  %1015 = vmatprep.mubr.msk.f32.mxu1 %vm443_vm2, %v1151_v17  ;;  %v439_v23 = vmul.f32 %v1151_v17, %v1151_v17 }
  0xf6   : > { %v450_v24 = vsel %vm443_vm2, %v441_v21, 0.0  ;;  %v442_v25 = vmul.f32 %v1153_v19, %v1153_v19  ;;  %v671_v21 = vld [vmem:[%s1195_s16] sm:$0xff] }
  0xf7   : > { %451 = vadd.xlane.f32.xlu1 %v450_v24  ;;  %1016 = vmatmul.mubr.msk.f32.vlgmr.msra.gmra.mrb[0].mxu1 %vm443_vm2, %v1157_v22  ;;  %v444_v26 = vsel %vm443_vm2, %v439_v23, 0.0  ;;  %v440_v27 = vmul.f32 %v1157_v22, %v1157_v22  ;;  %v672_v23 = vld [vmem:[%s1195_s16 + $0x8] sm:$0xff]  ;;  %v673_v24 = vld [vmem:[%s1195_s16 + $0x10] sm:$0xff] }
  0xf8   : > { %1018 = vmatprep.mubr.msk.f32.mxu1 %vm443_vm2, %v1149_v15  ;;  %445 = vadd.xlane.f32.xlu0 %v444_v26  ;;  %v453_v28 = vsel %vm443_vm2, %v442_v25, 0.0  ;;  %v1047_v25 = vpack.c.bf16 %v672_v23, %v671_v21  ;;  %v674_v26 = vld [vmem:[%s1195_s16 + $0x18] sm:$0xff] }
  0xf9   : > { %v447_v29 = vsel %vm443_vm2, %v440_v27, 0.0  ;;  %v1051_v27 = vpack.c.bf16 %v674_v26, %v673_v24 }
  0xfa   : > { %1048 = vmatprep.subr.bf16.mxu1 %v1047_v25 }
  0xfb   : > { %454 = vadd.xlane.f32.xlu1 %v453_v28  ;;  %1019 = vmatmul.mubr.msk.f32.gmra.mrb[2].mxu1 %vm443_vm2, %v1153_v19 }
  0xfc   : > { %448 = vadd.xlane.f32.xlu0 %v447_v29  ;;  %1050 = vmatpush3.bf16.msra.mxu1 %v1047_v25 }
  0xfd   : > { %1052 = vmatprep.subr.bf16.mxu1 %v1051_v27 }
 0x100   : > { %1054 = vmatpush3.bf16.msra.mxu1 %v1051_v27 }
 0x184   : > { %v452_v36 = vpop.xlane.xlu1 %451 }
 0x185   : > { %v446_v34 = vpop.xlane.xlu0 %445 }
 0x188   : > { %v455_v49 = vpop.xlane.xlu1 %454 }
 0x189   : > { %v449_v41 = vpop.xlane.xlu0 %448 }
 0x1ca   : > { %v1017_v37 = vpop.f32.mrb[0].mxu1 }
 0x1cb   : > { %v554_v38 = vmul.f32 2.0, %v1017_v37  ;;  %v534_v39 = vpop.f32.mrb[1].mxu1 }
 0x1cc   : > { %v553_v42 = vmul.f32 2.0, %v534_v39 }
 0x1cd   : > { %v558_v43 = vsub.f32 %v449_v41, %v554_v38 }
 0x1ce   : > { %v557_v44 = vsub.f32 %v446_v34, %v553_v42  ;;  %v1020_v45 = vpop.f32.mrb[2].mxu1 }
 0x1cf   : > { %v556_v46 = vmul.f32 2.0, %v1020_v45  ;;  %v544_v47 = vpop.f32.mrb[3].mxu1  ;;  %v574_v48 = vadd.f32 %v572_v40, %v558_v43  ;;  %v676_v45 = vld [vmem:[%s1195_s16 + $0x28] sm:$0xff] }
 0x1d0   : > { %v555_v50 = vmul.f32 2.0, %v544_v47  ;;  %v573_v51 = vadd.f32 %v572_v40, %v557_v44  ;;  %v675_v44 = vld [vmem:[%s1195_s16 + $0x20] sm:$0xff]  ;;  %v677_v47 = vld [vmem:[%s1195_s16 + $0x30] sm:$0xff] }
 0x1d1   : > { %v560_v52 = vsub.f32 %v455_v49, %v556_v46  ;;  %v582_v53 = vsel %vm563_vm1, %v574_v48, inf  ;;  %v1055_v46 = vpack.c.bf16 %v676_v45, %v675_v44 }
 0x1d2   : > { %v559_v54 = vsub.f32 %v452_v36, %v555_v50  ;;  %583 = vmin.xlane.f32.xlu1 %v582_v53  ;;  %v579_v55 = vsel %vm563_vm1, %v573_v51, inf }
 0x1d3   : > { %580 = vmin.xlane.f32.xlu0 %v579_v55  ;;  %v576_v56 = vadd.f32 %v572_v40, %v560_v52  ;;  %1056 = vmatprep.subr.bf16.mxu1 %v1055_v46 }
 0x1d4   : > { %v575_v57 = vadd.f32 %v572_v40, %v559_v54  ;;  %1058 = vmatpush3.bf16.msra.mxu1 %v1055_v46 }
 0x1d5   : > { %v588_v58 = vsel %vm563_vm1, %v576_v56, inf }
 0x1d6   : > { %589 = vmin.xlane.f32.xlu1 %v588_v58  ;;  %v585_v59 = vsel %vm563_vm1, %v575_v57, inf }
 0x1d7   : > { %586 = vmin.xlane.f32.xlu0 %v585_v59 }
 0x25f   : > { %v584_v62 = vpop.xlane.xlu1 %583 }
 0x260   : > { %vm592_vm3 = vcmp.eq.f32.partialorder %v574_v48, %v584_v62  ;;  %v581_v63 = vpop.xlane.xlu0 %580  ;;  %v678_v48 = vld [vmem:[%s1195_s16 + $0x38] sm:$0xff] }
 0x261   : > { %v596_v0 = vsel %vm592_vm3, %v1181_v61, 64  ;;  %vm591_vm4 = vcmp.eq.f32.partialorder %v573_v51, %v581_v63  ;;  %v1059_v49 = vpack.c.bf16 %v678_v48, %v677_v47 }
 0x262   : > { %v614_v1 = vsel %vm563_vm1, %v596_v0, 2147483647  ;;  %v595_v2 = vsel %vm591_vm4, %v1181_v61, 64 }
 0x263   : > { %v599_v3 = vsel %vm563_vm1, %v595_v2, 2147483647  ;;  %v590_v4 = vpop.xlane.xlu1 %589  ;;  %v616_v5 = vshra.s32 %v614_v1, 16  ;;  %v615_v28 = vand.u32 65535, %v614_v1  ;;  %1060 = vmatprep.subr.bf16.mxu1 %v1059_v49 }
 0x264   : > { %vm594_vm5 = vcmp.eq.f32.partialorder %v576_v56, %v590_v4  ;;  %v587_v6 = vpop.xlane.xlu0 %586  ;;  %v601_v7 = vshra.s32 %v599_v3, 16  ;;  %v600_v29 = vand.u32 65535, %v599_v3  ;;  %1062 = vmatpush3.bf16.msra.mxu1 %v1059_v49 }
 0x265   : > { %v598_v8 = vsel %vm594_vm5, %v1181_v61, 64  ;;  %vm593_vm6 = vcmp.eq.f32.partialorder %v575_v57, %v587_v6  ;;  %v618_v9 = vcvt.s32.f32 %v616_v5  ;;  %v617_v31 = vcvt.s32.f32 %v615_v28 }
 0x266   : > { %v644_v10 = vsel %vm563_vm1, %v598_v8, 2147483647  ;;  %v597_v11 = vsel %vm593_vm6, %v1181_v61, 64  ;;  %v603_v12 = vcvt.s32.f32 %v601_v7  ;;  %v602_v34 = vcvt.s32.f32 %v600_v29 }
 0x267   : > { %v629_v13 = vsel %vm563_vm1, %v597_v11, 2147483647  ;;  %619 = vmin.xlane.f32.xlu1 %v618_v9  ;;  %v646_v14 = vshra.s32 %v644_v10, 16  ;;  %v645_v32 = vand.u32 65535, %v644_v10  ;;  %v1086_v6 = vmov 0.0  }
 0x268   : > { %604 = vmin.xlane.f32.xlu0 %v603_v12  ;;  %v631_v16 = vshra.s32 %v629_v13, 16  ;;  %v630_v35 = vand.u32 65535, %v629_v13 }
 0x269   : > { %v648_v18 = vcvt.s32.f32 %v646_v14  ;;  %v647_v39 = vcvt.s32.f32 %v645_v32 }
 0x26a   : > { %v633_v20 = vcvt.s32.f32 %v631_v16  ;;  %v632_v41 = vcvt.s32.f32 %v630_v35 }
 0x26b   : > { %649 = vmin.xlane.f32.xlu1 %v648_v18 }
 0x26c   : > { %634 = vmin.xlane.f32.xlu0 %v633_v20 }
 0x2f4   : > { %v620_v30 = vpop.xlane.xlu1 %619 }
 0x2f5   : > { %v605_v33 = vpop.xlane.xlu0 %604  ;;  %vm621_vm7 = vcmp.eq.f32.partialorder %v618_v9, %v620_v30  ;;  %v626_v50 = vcvt.f32.s32 %v620_v30 }
 0x2f6   : > { %v622_v36 = vsel %vm621_vm7, %v617_v31, inf  ;;  %vm606_vm8 = vcmp.eq.f32.partialorder %v603_v12, %v605_v33  ;;  %v611_v51 = vcvt.f32.s32 %v605_v33 }
 0x2f7   : > { %623 = vmin.xlane.f32.xlu1 %v622_v36  ;;  %v607_v37 = vsel %vm606_vm8, %v602_v34, inf  ;;  %v627_v53 = vshll.u32 %v626_v50, 16 }
 0x2f8   : > { %v650_v38 = vpop.xlane.xlu1 %649  ;;  %608 = vmin.xlane.f32.xlu0 %v607_v37  ;;  %v612_v57 = vshll.u32 %v611_v51, 16 }
 0x2f9   : > { %v635_v40 = vpop.xlane.xlu0 %634  ;;  %vm651_vm9 = vcmp.eq.f32.partialorder %v648_v18, %v650_v38  ;;  %v656_v54 = vcvt.f32.s32 %v650_v38 }
 0x2fa   : > { %v652_v42 = vsel %vm651_vm9, %v647_v39, inf  ;;  %vm636_vm10 = vcmp.eq.f32.partialorder %v633_v20, %v635_v40  ;;  %v641_v58 = vcvt.f32.s32 %v635_v40 }
 0x2fb   : > { %653 = vmin.xlane.f32.xlu1 %v652_v42  ;;  %v637_v43 = vsel %vm636_vm10, %v632_v41, inf  ;;  %v657_v0 = vshll.u32 %v656_v54, 16 }
 0x2fc   : > { %638 = vmin.xlane.f32.xlu0 %v637_v43  ;;  %v642_v3 = vshll.u32 %v641_v58, 16 }
 0x384   : > { %v624_v52 = vpop.xlane.xlu1 %623 }
 0x385   : > { %v625_v55 = vcvt.f32.s32 %v624_v52  ;;  %v609_v56 = vpop.xlane.xlu0 %608 }
 0x386   : > { %v610_v59 = vcvt.f32.s32 %v609_v56 }
 0x387   : > { %v628_v60 = vadd.s32 %v627_v53, %v625_v55 }
 0x388   : > { %v613_v62 = vadd.s32 %v612_v57, %v610_v59  ;;  %v654_v63 = vpop.xlane.xlu1 %653 }
 0x389   : > { %vm660_vm11 = vcmp.eq.s32.totalorder %v1181_v61, %v628_v60  ;;  %v655_v1 = vcvt.f32.s32 %v654_v63  ;;  %v639_v2 = vpop.xlane.xlu0 %638 }
 0x38a   : > { %v640_v4 = vcvt.f32.s32 %v639_v2  ;;  %vm659_vm12 = vcmp.eq.s32.totalorder %v1181_v61, %v613_v62  ;;  %v965_v8 = vsel %vm660_vm11, 1.0, %v1086_v6 }
 0x38b   : > { %v658_v5 = vadd.s32 %v657_v0, %v655_v1  ;;  %v964_v7 = vsel %vm659_vm12, 1.0, %v1086_v6 }
 0x38c   : > { %v643_v9 = vadd.s32 %v642_v3, %v640_v4  ;;  %1037 = vmatprep.mubr.msk.f32.mxu1 %vm563_vm1, %v964_v7 }
 0x38d   : > { %1038 = vmatmul.mubr.msk.f32.vlgmr.msra.gmra.mrb[4].mxu1 %vm563_vm1, %v965_v8  ;;  %vm662_vm13 = vcmp.eq.s32.totalorder %v1181_v61, %v658_v5 }
 0x38e   : > { %vm661_vm14 = vcmp.eq.s32.totalorder %v1181_v61, %v643_v9  ;;  %v967_v11 = vsel %vm662_vm13, 1.0, %v1086_v6 }
 0x38f   : > { %v966_v10 = vsel %vm661_vm14, 1.0, %v1086_v6 }
 0x390   : > { %1040 = vmatprep.mubr.msk.f32.mxu1 %vm563_vm1, %v966_v10 }
 0x391   : > { %1041 = vmatmul.mubr.msk.f32.gmra.mrb[6].mxu1 %vm563_vm1, %v967_v11 }
 0x460   : > { %v1039_v12 = vpop.f32.mrb[4].mxu1 }
 0x461   : > { %777 = vst.msk [vmem:[%s331_s20 + $0x8] sm:$0xff] %vm443_vm2, %v1039_v12  ;;  %v781_v13 = vsub.f32 %v1039_v12, %v1157_v22  ;;  %v757_v14 = vpop.f32.mrb[5].mxu1 }
 0x462   : > { %776 = vst.msk [vmem:[%s331_s20] sm:$0xff] %vm443_vm2, %v757_v14  ;;  %v780_v61 = vsub.f32 %v757_v14, %v1151_v17 }
 0x463   : > { %v785_v16 = vmul.f32 %v781_v13, %v781_v13 }
 0x464   : > { %v784_v18 = vmul.f32 %v780_v61, %v780_v61  ;;  %v1042_v20 = vpop.f32.mrb[6].mxu1 }
 0x465   : > { %779 = vst.msk [vmem:[%s331_s20 + $0x18] sm:$0xff] %vm443_vm2, %v1042_v20  ;;  %v783_v21 = vsub.f32 %v1042_v20, %v1153_v19  ;;  %v767_v23 = vpop.f32.mrb[7].mxu1  ;;  %v791_v24 = vsel %vm443_vm2, %v785_v16, 0.0 }
 0x466   : > { %778 = vst.msk [vmem:[%s331_s20 + $0x10] sm:$0xff] %vm443_vm2, %v767_v23  ;;  %v782_v25 = vsub.f32 %v767_v23, %v1149_v15  ;;  %792 = vadd.xlane.f32.xlu1 %v791_v24  ;;  %v788_v22 = vsel %vm443_vm2, %v784_v18, 0.0 }
 0x467   : > { %v787_v26 = vmul.f32 %v783_v21, %v783_v21  ;;  %789 = vadd.xlane.f32.xlu0 %v788_v22 }
 0x468   : > { %v786_v17 = vmul.f32 %v782_v25, %v782_v25 }
 0x469   : > { %v797_v27 = vsel %vm443_vm2, %v787_v26, 0.0 }
 0x46a   : > { %798 = vadd.xlane.f32.xlu1 %v797_v27  ;;  %v794_v28 = vsel %vm443_vm2, %v786_v17, 0.0 }
 0x46b   : > { %795 = vadd.xlane.f32.xlu0 %v794_v28 }
 0x4f3   : > { %v793_v19 = vpop.xlane.xlu1 %792 }
 0x4f4   : > { %v790_v29 = vpop.xlane.xlu0 %789 }
 0x4f5   : > { %v800_v30 = vadd.f32 %v793_v19, %v790_v29 }
 0x4f7   : > { %v799_v33 = vpop.xlane.xlu1 %798 }
 0x4f8   : > { %v796_v31 = vpop.xlane.xlu0 %795 }
 0x4f9   : > { %v801_v32 = vadd.f32 %v800_v30, %v796_v31 }
 0x4fb   : > { %v802_v15 = vadd.f32 %v801_v32, %v799_v33 }
 0x4fd   : > { %v803_v34 = vrot.slane %v802_v15, 4 }
 0x4ff   : > { %v804_v35 = vadd.f32 %v803_v34, %v802_v15 }
 0x501   : > { %v805_v36 = vrot.slane %v804_v35, 2 }
 0x503   : > { %v806_v37 = vadd.f32 %v805_v36, %v804_v35 }
 0x505   : > { %v807_v38 = vrot.slane %v806_v37, 1 }
 0x507   : > { %v808_v39 = vadd.f32 %v807_v38, %v806_v37 }
 0x509   : > { %v810_v40 = vmul.f32 0.001953125, %v808_v39 }
 0x50b   : > { %812 = vst.msk [vmem:[%s334_s25] sm:$0x1] %vm811_vm15, %v810_v40 }
 0x50c PF: > { %s17_s21 = sadd.s32 1, %s1084_s21  }
 0x50d   : > { %p14_p4 = scmp.ge.s32.totalorder %s17_s21, 4  }
 0x50f   :  { %16 = sbr.rel (!%p14_p4) target bundleno = 1 (0x1), region = 94 }

// kernel: unif_model_forward.40
= control target key start
LH: loop header
LB: loop body
LE: loop exit
PB: predicated region body
PF: predicated region fallthrough
CT: control target
= control target key end

     0   :  { %s692_s12 = smov 0   ;;  %s694_s13 = smov 0   ;;  %s759_s0 = inlined_call_operand.vmem [shape: bf16[2,50,128], index: 0, kind: input, shape index: {}]   ;;  %s760_s1 = inlined_call_operand.vmem [shape: bf16[2,128,64], index: 1, kind: input, shape index: {}]   ;;  %s761_s2 = inlined_call_operand.vmem [shape: f32[2,1,64], index: 2, kind: input, shape index: {}]   ;;  %s762_s3 = inlined_call_operand.vmem [shape: f32[2,50,64], index: 3, kind: output, shape index: {}]  }
   0x1   :  { %s696_s14 = smov 0  }
   0x2 LB: > { %s25_s15 = sadd.s32 1, %s666_s13  ;;  %p537_p0 = scmp.ge.s32.totalorder %s670_s14, 1  ;;  %s670_s14 = sphi %s696_s14, %s13_s14   ;;  %s666_s13 = sphi %s694_s13, %s764_s13   ;;  %s662_s12 = sphi %s692_s12, %s763_s12  }
   0x3   : > { %p27_p1 = scmp.ge.s32.totalorder %s25_s15, 2  ;;  %p176_p2 = scmp.lt.s32.totalorder %s670_s14, 3 }
   0x5   : > { %s766_s15 = smov (%p27_p1, %s25_s15), 0  ;;  %p177_p3 = pnand %p537_p0, %p176_p2 }
   0x6   : > { %p217_p4 = scmp.lt.s32.totalorder (!%p177_p3), %s662_s12, 1  ;;  %vm416_vm0 = vcmask (!%p177_p3), 523264   ;;  %vm423_vm1 = vcmask (!%p177_p3), 517120  }
   0x7   : > { %180 = sbr.rel (%p177_p3) target bundleno = 271 (0x10f), region = 32 }
   0xe   : > { %s768_s12 = smov (!%p217_p4, %s662_s12), 1 }
   0xf   : > { %s557_s16 = sshll.u32 %s768_s12, 6  ;;  %s610_s20 = smul.u32 28, %s768_s12 }
  0x10   : > { %s716_s19 = scalar_lea.vmem %s760_s1, %s557_s16  ;;  %s233_s26 = scalar_lea.vmem %s761_s2, %s768_s12 }
  0x11   : > { %v636_v0 = vld [vmem:[%s716_s19] sm:$0xff]   ;;  %v637_v1 = vld [vmem:[%s716_s19 + $0x8] sm:$0xff]   ;;  %v638_v2 = vld [vmem:[%s716_s19 + $0x10] sm:$0xff]   ;;  %s725_s23 = scalar_lea.vmem %s759_s0, %s610_s20  ;;  %s611_s27 = smul.u32 56, %s768_s12 }
  0x12   : > { %570 = vmatprep.subr.bf16.mxu0 %v636_v0  ;;  %594 = vmatprep.subr.bf16.mxu1 %v636_v0  ;;  %v639_v3 = vld [vmem:[%s716_s19 + $0x18] sm:$0xff]   ;;  %v644_v4 = vld [vmem:[%s725_s23] sm:$0xff]   ;;  %v645_v5 = vld [vmem:[%s725_s23 + $0x10] sm:$0xff]  }
  0x13   : > { %571 = vmatpush3.bf16.msra.mxu0 %v636_v0  ;;  %602 = vmatpush3.bf16.msra.mxu1 %v636_v0  ;;  %v640_v6 = vld [vmem:[%s716_s19 + $0x20] sm:$0xff]   ;;  %v641_v7 = vld [vmem:[%s716_s19 + $0x28] sm:$0xff]   ;;  %v642_v8 = vld [vmem:[%s716_s19 + $0x30] sm:$0xff]   ;;  %s242_s30 = scalar_lea.vmem %s762_s3, %s611_s27 }
  0x14   : > { %572 = vmatprep.subr.bf16.mxu0 %v637_v1  ;;  %595 = vmatprep.subr.bf16.mxu1 %v637_v1  ;;  %v643_v9 = vld [vmem:[%s716_s19 + $0x38] sm:$0xff]   ;;  %v646_v10 = vld [vmem:[%s725_s23 + $0x8] sm:$0xff]   ;;  %v542_v12 = vld [vmem:[%s233_s26] ss:$0 sm:$0xff] }
  0x15   : > { %586 = vmatprep.mubr.bf16.mxu0 %v644_v4  ;;  %590 = vmatprep.mubr.bf16.mxu1 %v645_v5  ;;  %v647_v11 = vld [vmem:[%s725_s23 + $0x18] ss:$0 sps:$4 sm:$0x11]  }
  0x17   : > { %573 = vmatpush3.bf16.msra.mxu0 %v637_v1  ;;  %603 = vmatpush3.bf16.msra.mxu1 %v637_v1 }
  0x18   : > { %574 = vmatprep.subr.bf16.mxu0 %v638_v2  ;;  %596 = vmatprep.subr.bf16.mxu1 %v638_v2 }
  0x1b   : > { %575 = vmatpush3.bf16.msra.mxu0 %v638_v2  ;;  %604 = vmatpush3.bf16.msra.mxu1 %v638_v2 }
  0x1c   : > { %576 = vmatprep.subr.bf16.mxu0 %v639_v3  ;;  %597 = vmatprep.subr.bf16.mxu1 %v639_v3 }
  0x1f   : > { %577 = vmatpush3.bf16.msra.mxu0 %v639_v3  ;;  %605 = vmatpush3.bf16.msra.mxu1 %v639_v3 }
  0x20   : > { %578 = vmatprep.subr.bf16.mxu0 %v640_v6  ;;  %598 = vmatprep.subr.bf16.mxu1 %v640_v6 }
  0x23   : > { %579 = vmatpush3.bf16.msra.mxu0 %v640_v6  ;;  %606 = vmatpush3.bf16.msra.mxu1 %v640_v6 }
  0x24   : > { %580 = vmatprep.subr.bf16.mxu0 %v641_v7  ;;  %599 = vmatprep.subr.bf16.mxu1 %v641_v7 }
  0x27   : > { %581 = vmatpush3.bf16.msra.mxu0 %v641_v7  ;;  %607 = vmatpush3.bf16.msra.mxu1 %v641_v7 }
  0x28   : > { %582 = vmatprep.subr.bf16.mxu0 %v642_v8  ;;  %600 = vmatprep.subr.bf16.mxu1 %v642_v8 }
  0x2b   : > { %583 = vmatpush3.bf16.msra.mxu0 %v642_v8  ;;  %608 = vmatpush3.bf16.msra.mxu1 %v642_v8 }
  0x2c   : > { %584 = vmatprep.subr.bf16.mxu0 %v643_v9  ;;  %601 = vmatprep.subr.bf16.mxu1 %v643_v9 }
  0x2f   : > { %585 = vmatpush3.bf16.msra.mxu0 %v643_v9  ;;  %609 = vmatpush3.bf16.msra.mxu1 %v643_v9 }
  0x32   : > { %587 = vmatmul.mubr.bf16.vlgmr.msra.gmra.mrb[0].mxu0 %v646_v10  ;;  %591 = vmatmul.mubr.bf16.vlgmr.msra.gmra.mrb[0].mxu1 %v647_v11 }
 0x105   : > { %v588_v13 = vpop.f32.mrb[0].mxu0  ;;  %v592_v14 = vpop.f32.mrb[0].mxu1 }
 0x106   : > { %v388_v15 = vadd.f32 %v588_v13, %v542_v12  ;;  %v404_v16 = vadd.f32 %v592_v14, %v542_v12  ;;  %v379_v17 = vpop.f32.mrb[1].mxu0  ;;  %v395_v18 = vpop.f32.mrb[1].mxu1 }
 0x107   : > { %v380_v19 = vadd.f32 %v542_v12, %v379_v17  ;;  %v396_v20 = vadd.f32 %v542_v12, %v395_v18  ;;  %v589_v21 = vpop.f32.mrb[2].mxu0  ;;  %v593_v22 = vpop.f32.mrb[2].mxu1 }
 0x108   : > { %v411_v23 = vmax.f32 %v388_v15, 0.0  ;;  %v415_v24 = vmax.f32 %v404_v16, 0.0  ;;  %v391_v25 = vadd.f32 %v589_v21, %v542_v12  ;;  %v382_v26 = vpop.f32.mrb[3].mxu0  ;;  %v398_v27 = vpop.f32.mrb[3].mxu1 }
 0x109   : > { %v409_v28 = vmax.f32 %v380_v19, 0.0  ;;  %v413_v29 = vmax.f32 %v396_v20, 0.0  ;;  %v383_v30 = vadd.f32 %v542_v12, %v382_v26  ;;  %v399_v31 = vadd.f32 %v542_v12, %v398_v27 }
 0x10a   : > { %419 = vst.msk [vmem:[%s242_s30 + $0x10] sm:$0xff] %vm416_vm0, %v411_v23  ;;  %v412_v32 = vmax.f32 %v391_v25, 0.0 }
 0x10b   : > { %424 = vst.msk [vmem:[%s242_s30 + $0x30] sm:$0x3] %vm423_vm1, %v415_v24  ;;  %v410_v33 = vmax.f32 %v383_v30, 0.0  ;;  %v414_v34 = vmax.f32 %v399_v31, 0.0 }
 0x10c   : > { %417 = vst.msk [vmem:[%s242_s30] sm:$0xff] %vm416_vm0, %v409_v28  ;;  %421 = vst.msk [vmem:[%s242_s30 + $0x20] sm:$0xff] %vm416_vm0, %v413_v29 }
 0x10d   : > { %420 = vst.msk [vmem:[%s242_s30 + $0x18] sm:$0xff] %vm416_vm0, %v412_v32  ;;  %418 = vst.msk [vmem:[%s242_s30 + $0x8] sm:$0xff] %vm416_vm0, %v410_v33 }
 0x10e   : > { %422 = vst.msk [vmem:[%s242_s30 + $0x28] sm:$0xff] %vm416_vm0, %v414_v34 }
 0x10f PF: > { %s13_s14 = sadd.s32 1, %s670_s14   ;;  %s763_s12 = smov %s666_s13 }
 0x110   : > { %p10_p5 = scmp.ge.s32.totalorder %s13_s14, 4   ;;  %s764_s13 = smov %s766_s15 }
 0x112   :  { %12 = sbr.rel (!%p10_p5) target bundleno = 2 (0x2), region = 68 }

// kernel: unif_model_forward.41
= control target key start
LH: loop header
LB: loop body
LE: loop exit
PB: predicated region body
PF: predicated region fallthrough
CT: control target
= control target key end

     0   :  { %s846_s12 = smov 0   ;;  %s848_s13 = smov 0   ;;  %s992_s0 = inlined_call_operand.vmem [shape: bf16[2,162,64], index: 0, kind: input, shape index: {}]   ;;  %s993_s1 = inlined_call_operand.vmem [shape: bf16[2,64,12], index: 1, kind: input, shape index: {}]   ;;  %s994_s2 = inlined_call_operand.vmem [shape: f32[2,1,12], index: 2, kind: input, shape index: {}]   ;;  %s995_s3 = inlined_call_operand.vmem [shape: f32[2,162,12], index: 3, kind: output, shape index: {}]  }
   0x1   :  { %s850_s14 = smov 0  }
   0x2 LB: > { %s25_s15 = sadd.s32 1, %s818_s13  ;;  %p647_p0 = scmp.ge.s32.totalorder %s822_s14, 1  ;;  %s822_s14 = sphi %s850_s14, %s13_s14   ;;  %s818_s13 = sphi %s848_s13, %s997_s13   ;;  %s814_s12 = sphi %s846_s12, %s996_s12  }
   0x3   : > { %p27_p1 = scmp.ge.s32.totalorder %s25_s15, 2  ;;  %p176_p2 = scmp.lt.s32.totalorder %s822_s14, 3 }
   0x5   : > { %s999_s15 = smov (%p27_p1, %s25_s15), 0  ;;  %p177_p3 = pnand %p647_p0, %p176_p2 }
   0x6   : > { %p217_p4 = scmp.lt.s32.totalorder (!%p177_p3), %s814_s12, 1  ;;  %v824_v0 = vmov (!%p177_p3), 0.0   ;;  %vm825_vm0 = vmmov (!%p177_p3), 0   ;;  %vm358_vm1 = vcmask (!%p177_p3), 523264   ;;  %vm512_vm2 = vcmask (!%p177_p3), 97280  }
   0x7   : > { %180 = sbr.rel (%p177_p3) target bundleno = 290 (0x122), region = 32  ;;  %697 = vmatprep.subr.bf16.mxu0 (!%p177_p3), %v824_v0  ;;  %749 = vmatprep.subr.bf16.mxu1 (!%p177_p3), %v824_v0  ;;  %vm533_vm3 = vcmask (!%p177_p3), 91136  }
   0x8   : > { %705 = vmatprep.mubr.msk.bf16.mxu0 (!%p177_p3), %vm825_vm0, %v824_v0  ;;  %729 = vmatprep.mubr.msk.bf16.mxu1 (!%p177_p3), %vm825_vm0, %v824_v0 }
   0xe   : > { %s1001_s12 = smov (!%p217_p4, %s814_s12), 1 }
   0xf   : > { %s681_s16 = sshll.u32 %s1001_s12, 5  ;;  %s757_s17 = smul.u32 84, %s1001_s12 }
  0x10   : > { %s230_s20 = scalar_lea.vmem %s993_s1, %s681_s16  ;;  %s233_s26 = scalar_lea.vmem %s994_s2, %s1001_s12 }
  0x11   : > { %v785_v1 = vld [vmem:[%s230_s20] sm:$0xff]   ;;  %v786_v2 = vld [vmem:[%s230_s20 + $0x8] sm:$0xff]   ;;  %s876_s23 = scalar_lea.vmem %s992_s0, %s757_s17  ;;  %v787_v3 = vld [vmem:[%s230_s20 + $0x10] sm:$0xff]   ;;  %s758_s27 = smul.u32 168, %s1001_s12 }
  0x12   : > { %698 = vmatpush3.bf16.msra.mxu0 %v785_v1  ;;  %753 = vmatpush3.bf16.msra.mxu1 %v785_v1  ;;  %v788_v4 = vld [vmem:[%s230_s20 + $0x18] sm:$0xff]   ;;  %v789_v5 = vld [vmem:[%s876_s23] sm:$0xff]   ;;  %v790_v6 = vld [vmem:[%s876_s23 + $0x30] sm:$0xff]  }
  0x13   : > { %699 = vmatprep.subr.bf16.mxu0 %v824_v0  ;;  %750 = vmatprep.subr.bf16.mxu1 %v824_v0  ;;  %v791_v7 = vld [vmem:[%s876_s23 + $0x8] sm:$0xff]   ;;  %v792_v8 = vld [vmem:[%s876_s23 + $0x38] sm:$0xff]   ;;  %v793_v9 = vld [vmem:[%s876_s23 + $0x10] sm:$0xff]   ;;  %s919_s30 = scalar_lea.vmem %s995_s3, %s758_s27 }
  0x14   : > { %v794_v10 = vld [vmem:[%s876_s23 + $0x40] sm:$0xff]   ;;  %v795_v11 = vld [vmem:[%s876_s23 + $0x18] sm:$0xff]   ;;  %v796_v12 = vld [vmem:[%s876_s23 + $0x48] sm:$0xff]  }
  0x15   : > { %v797_v13 = vld [vmem:[%s876_s23 + $0x20] sm:$0xff]   ;;  %v798_v14 = vld [vmem:[%s876_s23 + $0x50] ss:$0 sps:$4 sm:$0x11]   ;;  %v799_v15 = vld [vmem:[%s876_s23 + $0x28] sm:$0xff]  }
  0x16   : > { %700 = vmatpush3.bf16.msra.mxu0 %v786_v2  ;;  %754 = vmatpush3.bf16.msra.mxu1 %v786_v2  ;;  %v914_v16 = vld [vmem:[%s233_s26] ss:$0 sm:$0xff] }
  0x17   : > { %701 = vmatprep.subr.bf16.mxu0 %v824_v0  ;;  %751 = vmatprep.subr.bf16.mxu1 %v824_v0 }
  0x1a   : > { %702 = vmatpush3.bf16.msra.mxu0 %v787_v3  ;;  %755 = vmatpush3.bf16.msra.mxu1 %v787_v3 }
  0x1b   : > { %703 = vmatprep.subr.bf16.mxu0 %v824_v0  ;;  %752 = vmatprep.subr.bf16.mxu1 %v824_v0 }
  0x1e   : > { %704 = vmatpush3.bf16.msra.mxu0 %v788_v4  ;;  %756 = vmatpush3.bf16.msra.mxu1 %v788_v4 }
  0x21   : > { %706 = vmatmul.mubr.msk.bf16.vlgmr.msra.gmra.mrb[0].mxu0 %vm358_vm1, %v789_v5  ;;  %730 = vmatmul.mubr.msk.bf16.vlgmr.msra.gmra.mrb[0].mxu1 %vm358_vm1, %v790_v6 }
  0x22   : > { %709 = vmatprep.mubr.msk.bf16.mxu0 %vm825_vm0, %v824_v0  ;;  %733 = vmatprep.mubr.msk.bf16.mxu1 %vm825_vm0, %v824_v0 }
  0x29   : > { %710 = vmatmul.mubr.msk.bf16.gmra.mrb[4].mxu0 %vm358_vm1, %v791_v7  ;;  %734 = vmatmul.mubr.msk.bf16.gmra.mrb[4].mxu1 %vm358_vm1, %v792_v8 }
  0x2a   : > { %713 = vmatprep.mubr.msk.bf16.mxu0 %vm825_vm0, %v824_v0  ;;  %737 = vmatprep.mubr.msk.bf16.mxu1 %vm825_vm0, %v824_v0 }
  0x31   : > { %714 = vmatmul.mubr.msk.bf16.gmra.mrb[8].mxu0 %vm358_vm1, %v793_v9  ;;  %738 = vmatmul.mubr.msk.bf16.gmra.mrb[8].mxu1 %vm358_vm1, %v794_v10 }
  0x32   : > { %717 = vmatprep.mubr.msk.bf16.mxu0 %vm825_vm0, %v824_v0  ;;  %741 = vmatprep.mubr.msk.bf16.mxu1 %vm825_vm0, %v824_v0 }
  0x39   : > { %718 = vmatmul.mubr.msk.bf16.gmra.mrb[12].mxu0 %vm358_vm1, %v795_v11  ;;  %742 = vmatmul.mubr.msk.bf16.gmra.mrb[12].mxu1 %vm358_vm1, %v796_v12 }
  0x3a   : > { %721 = vmatprep.mubr.msk.bf16.mxu0 %vm825_vm0, %v824_v0  ;;  %745 = vmatprep.mubr.msk.bf16.mxu1 %vm825_vm0, %v824_v0 }
  0x41   : > { %722 = vmatmul.mubr.msk.bf16.gmra.mrb[16].mxu0 %vm358_vm1, %v797_v13  ;;  %746 = vmatmul.mubr.msk.bf16.gmra.mrb[16].mxu1 %vm358_vm1, %v798_v14 }
  0x42   : > { %725 = vmatprep.mubr.msk.bf16.mxu0 %vm825_vm0, %v824_v0 }
  0x49   : > { %726 = vmatmul.mubr.msk.bf16.gmra.mrb[20].mxu0 %vm358_vm1, %v799_v15 }
  0xf4   : > { %v426_v17 = vpop.f32.mrb[0].mxu0  ;;  %v474_v18 = vpop.f32.mrb[0].mxu1 }
  0xf5   : > { %v427_v19 = vadd.f32 %v914_v16, %v426_v17  ;;  %v707_v20 = vpop.f32.mrb[1].mxu0  ;;  %v475_v21 = vadd.f32 %v914_v16, %v474_v18  ;;  %v731_v22 = vpop.f32.mrb[1].mxu1 }
  0xf6   : > { %v429_v23 = vpop.f32.mrb[2].mxu0  ;;  %v477_v24 = vpop.f32.mrb[2].mxu1 }
  0xf7   : > { %513 = vst.msk [vmem:[%s919_s30] sm:$0xff] %vm512_vm2, %v427_v19  ;;  %v430_v25 = vadd.f32 %v914_v16, %v429_v23  ;;  %v708_v26 = vpop.f32.mrb[3].mxu0  ;;  %525 = vst.msk [vmem:[%s919_s30 + $0x60] sm:$0xff] %vm512_vm2, %v475_v21  ;;  %v478_v27 = vadd.f32 %v914_v16, %v477_v24  ;;  %v732_v28 = vpop.f32.mrb[3].mxu1 }
  0xf9   : > { %514 = vst.msk [vmem:[%s919_s30 + $0x8] sm:$0xff] %vm512_vm2, %v430_v25  ;;  %526 = vst.msk [vmem:[%s919_s30 + $0x68] sm:$0xff] %vm512_vm2, %v478_v27 }
  0xfc   : > { %v434_v29 = vpop.f32.mrb[4].mxu0  ;;  %v482_v30 = vpop.f32.mrb[4].mxu1 }
  0xfd   : > { %v435_v31 = vadd.f32 %v914_v16, %v434_v29  ;;  %v711_v32 = vpop.f32.mrb[5].mxu0  ;;  %v483_v33 = vadd.f32 %v914_v16, %v482_v30  ;;  %v735_v34 = vpop.f32.mrb[5].mxu1 }
  0xfe   : > { %v437_v35 = vpop.f32.mrb[6].mxu0  ;;  %v485_v36 = vpop.f32.mrb[6].mxu1 }
  0xff   : > { %515 = vst.msk [vmem:[%s919_s30 + $0x10] sm:$0xff] %vm512_vm2, %v435_v31  ;;  %v438_v37 = vadd.f32 %v914_v16, %v437_v35  ;;  %v712_v38 = vpop.f32.mrb[7].mxu0  ;;  %527 = vst.msk [vmem:[%s919_s30 + $0x70] sm:$0xff] %vm512_vm2, %v483_v33  ;;  %v486_v39 = vadd.f32 %v914_v16, %v485_v36  ;;  %v736_v40 = vpop.f32.mrb[7].mxu1 }
 0x101   : > { %516 = vst.msk [vmem:[%s919_s30 + $0x18] sm:$0xff] %vm512_vm2, %v438_v37  ;;  %528 = vst.msk [vmem:[%s919_s30 + $0x78] sm:$0xff] %vm512_vm2, %v486_v39 }
 0x104   : > { %v442_v41 = vpop.f32.mrb[8].mxu0  ;;  %v490_v42 = vpop.f32.mrb[8].mxu1 }
 0x105   : > { %v443_v43 = vadd.f32 %v914_v16, %v442_v41  ;;  %v715_v44 = vpop.f32.mrb[9].mxu0  ;;  %v491_v45 = vadd.f32 %v914_v16, %v490_v42  ;;  %v739_v46 = vpop.f32.mrb[9].mxu1 }
 0x106   : > { %v445_v47 = vpop.f32.mrb[10].mxu0  ;;  %v493_v48 = vpop.f32.mrb[10].mxu1 }
 0x107   : > { %517 = vst.msk [vmem:[%s919_s30 + $0x20] sm:$0xff] %vm512_vm2, %v443_v43  ;;  %v446_v49 = vadd.f32 %v914_v16, %v445_v47  ;;  %v716_v50 = vpop.f32.mrb[11].mxu0  ;;  %529 = vst.msk [vmem:[%s919_s30 + $0x80] sm:$0xff] %vm512_vm2, %v491_v45  ;;  %v494_v51 = vadd.f32 %v914_v16, %v493_v48  ;;  %v740_v52 = vpop.f32.mrb[11].mxu1 }
 0x109   : > { %518 = vst.msk [vmem:[%s919_s30 + $0x28] sm:$0xff] %vm512_vm2, %v446_v49  ;;  %530 = vst.msk [vmem:[%s919_s30 + $0x88] sm:$0xff] %vm512_vm2, %v494_v51 }
 0x10c   : > { %v450_v53 = vpop.f32.mrb[12].mxu0  ;;  %v498_v54 = vpop.f32.mrb[12].mxu1 }
 0x10d   : > { %v451_v55 = vadd.f32 %v914_v16, %v450_v53  ;;  %v719_v56 = vpop.f32.mrb[13].mxu0  ;;  %v499_v57 = vadd.f32 %v914_v16, %v498_v54  ;;  %v743_v58 = vpop.f32.mrb[13].mxu1 }
 0x10e   : > { %v453_v59 = vpop.f32.mrb[14].mxu0  ;;  %v501_v60 = vpop.f32.mrb[14].mxu1 }
 0x10f   : > { %519 = vst.msk [vmem:[%s919_s30 + $0x30] sm:$0xff] %vm512_vm2, %v451_v55  ;;  %v454_v61 = vadd.f32 %v914_v16, %v453_v59  ;;  %v720_v62 = vpop.f32.mrb[15].mxu0  ;;  %531 = vst.msk [vmem:[%s919_s30 + $0x90] sm:$0xff] %vm512_vm2, %v499_v57  ;;  %v502_v63 = vadd.f32 %v914_v16, %v501_v60  ;;  %v744_v0 = vpop.f32.mrb[15].mxu1 }
 0x111   : > { %520 = vst.msk [vmem:[%s919_s30 + $0x38] sm:$0xff] %vm512_vm2, %v454_v61  ;;  %532 = vst.msk [vmem:[%s919_s30 + $0x98] sm:$0xff] %vm512_vm2, %v502_v63 }
 0x114   : > { %v458_v1 = vpop.f32.mrb[16].mxu0  ;;  %v506_v2 = vpop.f32.mrb[16].mxu1 }
 0x115   : > { %v459_v3 = vadd.f32 %v914_v16, %v458_v1  ;;  %v723_v4 = vpop.f32.mrb[17].mxu0  ;;  %v507_v5 = vadd.f32 %v914_v16, %v506_v2  ;;  %v747_v6 = vpop.f32.mrb[17].mxu1 }
 0x116   : > { %v461_v7 = vpop.f32.mrb[18].mxu0  ;;  %v509_v8 = vpop.f32.mrb[18].mxu1 }
 0x117   : > { %521 = vst.msk [vmem:[%s919_s30 + $0x40] sm:$0xff] %vm512_vm2, %v459_v3  ;;  %v462_v9 = vadd.f32 %v914_v16, %v461_v7  ;;  %v724_v10 = vpop.f32.mrb[19].mxu0  ;;  %v748_v11 = vpop.f32.mrb[19].mxu1 }
 0x118   : > { %534 = vst.msk [vmem:[%s919_s30 + $0xa0] sm:$0x3] %vm533_vm3, %v507_v5 }
 0x119   : > { %522 = vst.msk [vmem:[%s919_s30 + $0x48] sm:$0xff] %vm512_vm2, %v462_v9 }
 0x11c   : > { %v466_v12 = vpop.f32.mrb[20].mxu0 }
 0x11d   : > { %v467_v13 = vadd.f32 %v914_v16, %v466_v12  ;;  %v727_v14 = vpop.f32.mrb[21].mxu0 }
 0x11e   : > { %v469_v15 = vpop.f32.mrb[22].mxu0 }
 0x11f   : > { %523 = vst.msk [vmem:[%s919_s30 + $0x50] sm:$0xff] %vm512_vm2, %v467_v13  ;;  %v470_v17 = vadd.f32 %v914_v16, %v469_v15  ;;  %v728_v18 = vpop.f32.mrb[23].mxu0 }
 0x121   : > { %524 = vst.msk [vmem:[%s919_s30 + $0x58] sm:$0xff] %vm512_vm2, %v470_v17 }
 0x122 PF: > { %s13_s14 = sadd.s32 1, %s822_s14   ;;  %s996_s12 = smov %s818_s13 }
 0x123   : > { %p10_p5 = scmp.ge.s32.totalorder %s13_s14, 4   ;;  %s997_s13 = smov %s999_s15 }
 0x125   :  { %12 = sbr.rel (!%p10_p5) target bundleno = 2 (0x2), region = 68 }

// kernel: squeeze.6
= control target key start
LH: loop header
LB: loop body
LE: loop exit
PB: predicated region body
PF: predicated region fallthrough
CT: control target
= control target key end

     0   :  { %vm4_vm0 = vcmask 1047556   ;;  %s1309_s14 = smov 14   ;;  %s1310_s13 = smov 12   ;;  %vm6_vm1 = vcmask 15360   ;;  %vm115_vm2 = vcmask 130160   ;;  %vm246_vm3 = vcmask 113760   ;;  %s2466_s0 = inlined_call_operand.vmem [shape: f32[1,2,8,2,8,2,3], index: 0, kind: input, shape index: {}]   ;;  %s2467_s1 = inlined_call_operand.vmem [shape: f32[2,16,16,3], index: 1, kind: output, shape index: {}]  }
   0x1   :  { %v1062_v0 = vld [vmem:[%s2466_s0 + $0x207] ss:$8 sm:$0xf]   ;;  %v1094_v36 = vld [vmem:[%s2466_s0 + $0x106] ss:$8 sm:$0xf]  }
   0x2   :  { %v1063_v1 = vld [vmem:[%s2466_s0 + $0x207] ss:$8 sm:$0xf0]   ;;  %v1095_v37 = vld [vmem:[%s2466_s0 + $0x106] ss:$8 sm:$0xf0]  }
   0x3   :  { %v133_v2 = vsel %vm4_vm0, %v1063_v1, %v1062_v0  ;;  %v1057_v3 = vld [vmem:[%s2466_s0 + $0x7] ss:$8 sm:$0xf]   ;;  %v1092_v38 = vld [vmem:[%s2466_s0 + $0x6] ss:$8 sm:$0xf]   ;;  %v253_v40 = vsel %vm4_vm0, %v1095_v37, %v1094_v36 }
   0x4   :  { %v1058_v4 = vld [vmem:[%s2466_s0 + $0x7] ss:$8 sm:$0xf0]   ;;  %134 = vrot.lane.b32.xlu1 %v133_v2, %s1309_s14  ;;  %v1093_v39 = vld [vmem:[%s2466_s0 + $0x6] ss:$8 sm:$0xf0]  }
   0x5   :  { %v112_v5 = vsel %vm4_vm0, %v1058_v4, %v1057_v3  ;;  %v1065_v6 = vld [vmem:[%s2466_s0 + $0x47] ss:$8 sm:$0xf]   ;;  %v243_v41 = vsel %vm4_vm0, %v1093_v39, %v1092_v38  ;;  %v1100_v42 = vld [vmem:[%s2466_s0 + $0x46] ss:$8 sm:$0xf]  }
   0x6   :  { %v1066_v7 = vld [vmem:[%s2466_s0 + $0x47] ss:$8 sm:$0xf0]   ;;  %113 = vrot.lane.b32.xlu0 %v112_v5, %s1309_s14  ;;  %v1101_v43 = vld [vmem:[%s2466_s0 + $0x46] ss:$8 sm:$0xf0]  }
   0x7   :  { %v144_v8 = vsel %vm4_vm0, %v1066_v7, %v1065_v6  ;;  %v1059_v9 = vld [vmem:[%s2466_s0 + $0x107] ss:$8 sm:$0xf]   ;;  %v1097_v44 = vld [vmem:[%s2466_s0 + $0x206] ss:$8 sm:$0xf]   ;;  %v275_v46 = vsel %vm4_vm0, %v1101_v43, %v1100_v42 }
   0x8   :  { %v1060_v10 = vld [vmem:[%s2466_s0 + $0x107] ss:$8 sm:$0xf0]   ;;  %145 = vrot.lane.b32.xlu1 %v144_v8, %s1309_s14  ;;  %v1098_v45 = vld [vmem:[%s2466_s0 + $0x206] ss:$8 sm:$0xf0]  }
   0x9   :  { %v122_v11 = vsel %vm4_vm0, %v1060_v10, %v1059_v9  ;;  %v1071_v12 = vld [vmem:[%s2466_s0 + $0x247] ss:$8 sm:$0xf]   ;;  %v264_v47 = vsel %vm4_vm0, %v1098_v45, %v1097_v44  ;;  %v1106_v48 = vld [vmem:[%s2466_s0 + $0x246] ss:$8 sm:$0xf]  }
   0xa   :  { %v1072_v13 = vld [vmem:[%s2466_s0 + $0x247] ss:$8 sm:$0xf0]   ;;  %123 = vrot.lane.b32.xlu0 %v122_v11, %s1309_s14  ;;  %v1107_v49 = vld [vmem:[%s2466_s0 + $0x246] ss:$8 sm:$0xf0]  }
   0xb   :  { %v1068_v14 = vld [vmem:[%s2466_s0 + $0x147] ss:$8 sm:$0xf]   ;;  %v166_v16 = vsel %vm4_vm0, %v1072_v13, %v1071_v12  ;;  %v1103_v50 = vld [vmem:[%s2466_s0 + $0x146] ss:$8 sm:$0xf]   ;;  %v297_v52 = vsel %vm4_vm0, %v1107_v49, %v1106_v48 }
   0xc   :  { %v1069_v15 = vld [vmem:[%s2466_s0 + $0x147] ss:$8 sm:$0xf0]   ;;  %167 = vrot.lane.b32.xlu1 %v166_v16, %s1309_s14  ;;  %v1104_v51 = vld [vmem:[%s2466_s0 + $0x146] ss:$8 sm:$0xf0]  }
   0xd   :  { %v155_v17 = vsel %vm4_vm0, %v1069_v15, %v1068_v14  ;;  %v1077_v18 = vld [vmem:[%s2466_s0 + $0x187] ss:$8 sm:$0xf]   ;;  %v286_v53 = vsel %vm4_vm0, %v1104_v51, %v1103_v50  ;;  %v1112_v54 = vld [vmem:[%s2466_s0 + $0x186] ss:$8 sm:$0xf]  }
   0xe   :  { %v1078_v19 = vld [vmem:[%s2466_s0 + $0x187] ss:$8 sm:$0xf0]   ;;  %156 = vrot.lane.b32.xlu0 %v155_v17, %s1309_s14  ;;  %v1113_v55 = vld [vmem:[%s2466_s0 + $0x186] ss:$8 sm:$0xf0]  }
   0xf   :  { %v1074_v20 = vld [vmem:[%s2466_s0 + $0x87] ss:$8 sm:$0xf]   ;;  %v188_v22 = vsel %vm4_vm0, %v1078_v19, %v1077_v18  ;;  %v1109_v56 = vld [vmem:[%s2466_s0 + $0x86] ss:$8 sm:$0xf]   ;;  %v319_v58 = vsel %vm4_vm0, %v1113_v55, %v1112_v54 }
  0x10   :  { %v1075_v21 = vld [vmem:[%s2466_s0 + $0x87] ss:$8 sm:$0xf0]   ;;  %189 = vrot.lane.b32.xlu1 %v188_v22, %s1309_s14  ;;  %v1110_v57 = vld [vmem:[%s2466_s0 + $0x86] ss:$8 sm:$0xf0]  }
  0x11   :  { %v177_v23 = vsel %vm4_vm0, %v1075_v21, %v1074_v20  ;;  %v1083_v24 = vld [vmem:[%s2466_s0 + $0xc7] ss:$8 sm:$0xf]   ;;  %v308_v59 = vsel %vm4_vm0, %v1110_v57, %v1109_v56  ;;  %v1118_v60 = vld [vmem:[%s2466_s0 + $0xc6] ss:$8 sm:$0xf]  }
  0x12   :  { %v1084_v25 = vld [vmem:[%s2466_s0 + $0xc7] ss:$8 sm:$0xf0]   ;;  %178 = vrot.lane.b32.xlu0 %v177_v23, %s1309_s14  ;;  %v1119_v61 = vld [vmem:[%s2466_s0 + $0xc6] ss:$8 sm:$0xf0]  }
  0x13   :  { %v1080_v26 = vld [vmem:[%s2466_s0 + $0x287] ss:$8 sm:$0xf]   ;;  %v210_v28 = vsel %vm4_vm0, %v1084_v25, %v1083_v24  ;;  %v1115_v62 = vld [vmem:[%s2466_s0 + $0x286] ss:$8 sm:$0xf]   ;;  %v341_v0 = vsel %vm4_vm0, %v1119_v61, %v1118_v60 }
  0x14   :  { %v1081_v27 = vld [vmem:[%s2466_s0 + $0x287] ss:$8 sm:$0xf0]   ;;  %211 = vrot.lane.b32.xlu1 %v210_v28, %s1309_s14  ;;  %v1116_v63 = vld [vmem:[%s2466_s0 + $0x286] ss:$8 sm:$0xf0]  }
  0x15   :  { %v199_v29 = vsel %vm4_vm0, %v1081_v27, %v1080_v26  ;;  %v1089_v30 = vld [vmem:[%s2466_s0 + $0x2c7] ss:$8 sm:$0xf]   ;;  %v330_v1 = vsel %vm4_vm0, %v1116_v63, %v1115_v62  ;;  %v1124_v2 = vld [vmem:[%s2466_s0 + $0x2c6] ss:$8 sm:$0xf]  }
  0x16   :  { %v1090_v31 = vld [vmem:[%s2466_s0 + $0x2c7] ss:$8 sm:$0xf0]   ;;  %200 = vrot.lane.b32.xlu0 %v199_v29, %s1309_s14  ;;  %v1125_v3 = vld [vmem:[%s2466_s0 + $0x2c6] ss:$8 sm:$0xf0]  }
  0x17   :  { %v1086_v32 = vld [vmem:[%s2466_s0 + $0x1c7] ss:$8 sm:$0xf]   ;;  %v232_v34 = vsel %vm4_vm0, %v1090_v31, %v1089_v30  ;;  %v1121_v4 = vld [vmem:[%s2466_s0 + $0x1c6] ss:$8 sm:$0xf]   ;;  %v363_v6 = vsel %vm4_vm0, %v1125_v3, %v1124_v2 }
  0x18   :  { %v1087_v33 = vld [vmem:[%s2466_s0 + $0x1c7] ss:$8 sm:$0xf0]   ;;  %233 = vrot.lane.b32.xlu1 %v232_v34, %s1309_s14  ;;  %v1122_v5 = vld [vmem:[%s2466_s0 + $0x1c6] ss:$8 sm:$0xf0]  }
  0x19   :  { %v221_v35 = vsel %vm4_vm0, %v1087_v33, %v1086_v32  ;;  %v352_v7 = vsel %vm4_vm0, %v1122_v5, %v1121_v4  ;;  %v1129_v8 = vld [vmem:[%s2466_s0 + $0x105] ss:$8 sm:$0xf]   ;;  %s1311_s5 = smov 10   ;;  %s1312_s16 = smov 8   ;;  %vm377_vm4 = vcmask 97360  }
  0x1a   :  { %222 = vrot.lane.b32.xlu0 %v221_v35, %s1309_s14  ;;  %v1130_v9 = vld [vmem:[%s2466_s0 + $0x105] ss:$8 sm:$0xf0]   ;;  %v1045_v33 = vld [vmem:[%s2466_s0 + $0x200] ss:$8 sm:$0xf]  }
  0x1b   :  { %v1127_v10 = vld [vmem:[%s2466_s0 + $0x5] ss:$8 sm:$0xf]   ;;  %v384_v12 = vsel %vm4_vm0, %v1130_v9, %v1129_v8  ;;  %v1046_v34 = vld [vmem:[%s2466_s0 + $0x200] ss:$8 sm:$0xf0]  }
  0x1c   :  { %254 = vrot.lane.b32.xlu1 %v253_v40, %s1310_s13  ;;  %v1128_v11 = vld [vmem:[%s2466_s0 + $0x5] ss:$8 sm:$0xf0]   ;;  %v76_v36 = vsel %vm4_vm0, %v1046_v34, %v1045_v33  ;;  %v2_v37 = vld [vmem:[%s2466_s0] ss:$8 sm:$0xf]  }
  0x1d   :  { %v374_v13 = vsel %vm4_vm0, %v1128_v11, %v1127_v10  ;;  %v1135_v14 = vld [vmem:[%s2466_s0 + $0x45] ss:$8 sm:$0xf]   ;;  %v3_v38 = vld [vmem:[%s2466_s0] ss:$8 sm:$0xf0]  }
  0x1e   :  { %244 = vrot.lane.b32.xlu0 %v243_v41, %s1310_s13  ;;  %v1136_v15 = vld [vmem:[%s2466_s0 + $0x45] ss:$8 sm:$0xf0]   ;;  %1047 = vst.msk [vmem:[%s2467_s1 + $0x40] sm:$0xff] %vm6_vm1, %v76_v36   ;;  %v5_v41 = vsel %vm4_vm0, %v3_v38, %v2_v37  ;;  %s1313_s3 = smov 6   ;;  %s1314_s2 = smov 4  }
  0x1f   :  { %v1132_v16 = vld [vmem:[%s2466_s0 + $0x205] ss:$8 sm:$0xf]   ;;  %v406_v18 = vsel %vm4_vm0, %v1136_v15, %v1135_v14  ;;  %7 = vst.msk [vmem:[%s2467_s1] sm:$0xff] %vm6_vm1, %v5_v41   ;;  %s1315_s22 = smov 2   ;;  %vm508_vm5 = vcmask 80960  }
  0x20   :  { %276 = vrot.lane.b32.xlu1 %v275_v46, %s1310_s13  ;;  %v1133_v17 = vld [vmem:[%s2466_s0 + $0x205] ss:$8 sm:$0xf0]   ;;  %v1024_v45 = vld [vmem:[%s2466_s0 + $0x40] ss:$8 sm:$0xf]  }
  0x21   :  { %v395_v19 = vsel %vm4_vm0, %v1133_v17, %v1132_v16  ;;  %v1141_v20 = vld [vmem:[%s2466_s0 + $0x245] ss:$8 sm:$0xf]   ;;  %v1025_v46 = vld [vmem:[%s2466_s0 + $0x40] ss:$8 sm:$0xf0]  }
  0x22   :  { %265 = vrot.lane.b32.xlu0 %v264_v47, %s1310_s13  ;;  %v1142_v21 = vld [vmem:[%s2466_s0 + $0x245] ss:$8 sm:$0xf0]   ;;  %v13_v48 = vsel %vm4_vm0, %v1025_v46, %v1024_v45  ;;  %v1033_v49 = vld [vmem:[%s2466_s0 + $0x100] ss:$8 sm:$0xf]  }
  0x23   :  { %v1138_v22 = vld [vmem:[%s2466_s0 + $0x145] ss:$8 sm:$0xf]   ;;  %v428_v24 = vsel %vm4_vm0, %v1142_v21, %v1141_v20  ;;  %v1034_v50 = vld [vmem:[%s2466_s0 + $0x100] ss:$8 sm:$0xf0]  }
  0x24   :  { %298 = vrot.lane.b32.xlu1 %v297_v52, %s1310_s13  ;;  %v1139_v23 = vld [vmem:[%s2466_s0 + $0x145] ss:$8 sm:$0xf0]   ;;  %1026 = vst.msk [vmem:[%s2467_s1 + $0x8] sm:$0xff] %vm6_vm1, %v13_v48   ;;  %vm639_vm6 = vcmask 64560   ;;  %vm770_vm7 = vcmask 48160  }
  0x25   :  { %v417_v25 = vsel %vm4_vm0, %v1139_v23, %v1138_v22  ;;  %v1147_v26 = vld [vmem:[%s2466_s0 + $0x185] ss:$8 sm:$0xf]   ;;  %v1164_v54 = vld [vmem:[%s2466_s0 + $0x104] ss:$8 sm:$0xf]  }
  0x26   :  { %287 = vrot.lane.b32.xlu0 %v286_v53, %s1310_s13  ;;  %v1148_v27 = vld [vmem:[%s2466_s0 + $0x185] ss:$8 sm:$0xf0]   ;;  %v40_v53 = vsel %vm4_vm0, %v1034_v50, %v1033_v49  ;;  %v1165_v55 = vld [vmem:[%s2466_s0 + $0x104] ss:$8 sm:$0xf0]  }
  0x27   :  { %v1144_v28 = vld [vmem:[%s2466_s0 + $0x85] ss:$8 sm:$0xf]   ;;  %v450_v32 = vsel %vm4_vm0, %v1148_v27, %v1147_v26  ;;  %1035 = vst.msk [vmem:[%s2467_s1 + $0x20] sm:$0xff] %vm6_vm1, %v40_v53   ;;  %v515_v4 = vsel %vm4_vm0, %v1165_v55, %v1164_v54  ;;  %vm901_vm8 = vcmask 31760  }
  0x28   :  { %320 = vrot.lane.b32.xlu1 %v319_v58, %s1310_s13  ;;  %v1145_v29 = vld [vmem:[%s2466_s0 + $0x85] ss:$8 sm:$0xf0]   ;;  %v1048_v57 = vld [vmem:[%s2466_s0 + $0x240] ss:$8 sm:$0xf]  }
  0x29   :  { %v1153_v30 = vld [vmem:[%s2466_s0 + $0xc5] ss:$8 sm:$0xf]   ;;  %v439_v35 = vsel %vm4_vm0, %v1145_v29, %v1144_v28  ;;  %v1049_v58 = vld [vmem:[%s2466_s0 + $0x240] ss:$8 sm:$0xf0]  }
  0x2a   :  { %309 = vrot.lane.b32.xlu0 %v308_v59, %s1310_s13  ;;  %v1154_v31 = vld [vmem:[%s2466_s0 + $0xc5] ss:$8 sm:$0xf0]   ;;  %v85_v60 = vsel %vm4_vm0, %v1049_v58, %v1048_v57  ;;  %v1036_v61 = vld [vmem:[%s2466_s0 + $0x140] ss:$8 sm:$0xf]  }
  0x2b   :  { %v1150_v39 = vld [vmem:[%s2466_s0 + $0x285] ss:$8 sm:$0xf]   ;;  %v472_v44 = vsel %vm4_vm0, %v1154_v31, %v1153_v30  ;;  %v1037_v62 = vld [vmem:[%s2466_s0 + $0x140] ss:$8 sm:$0xf0]  }
  0x2c   :  { %342 = vrot.lane.b32.xlu1 %v341_v0, %s1310_s13  ;;  %v1151_v40 = vld [vmem:[%s2466_s0 + $0x285] ss:$8 sm:$0xf0]   ;;  %v1162_v63 = vld [vmem:[%s2466_s0 + $0x4] ss:$8 sm:$0xf]  }
  0x2d   :  { %v1159_v42 = vld [vmem:[%s2466_s0 + $0x2c5] ss:$8 sm:$0xf]   ;;  %v461_v47 = vsel %vm4_vm0, %v1151_v40, %v1150_v39  ;;  %v1163_v0 = vld [vmem:[%s2466_s0 + $0x4] ss:$8 sm:$0xf0]  }
  0x2e   :  { %331 = vrot.lane.b32.xlu0 %v330_v1, %s1310_s13  ;;  %v1160_v43 = vld [vmem:[%s2466_s0 + $0x2c5] ss:$8 sm:$0xf0]   ;;  %1050 = vst.msk [vmem:[%s2467_s1 + $0x48] sm:$0xff] %vm6_vm1, %v85_v60   ;;  %v49_v1 = vsel %vm4_vm0, %v1037_v62, %v1036_v61 }
  0x2f   :  { %v1156_v51 = vld [vmem:[%s2466_s0 + $0x1c5] ss:$8 sm:$0xf]   ;;  %v494_v56 = vsel %vm4_vm0, %v1160_v43, %v1159_v42  ;;  %v1170_v2 = vld [vmem:[%s2466_s0 + $0x44] ss:$8 sm:$0xf]  }
  0x30   :  { %364 = vrot.lane.b32.xlu1 %v363_v6, %s1310_s13  ;;  %v1157_v52 = vld [vmem:[%s2466_s0 + $0x1c5] ss:$8 sm:$0xf0]   ;;  %v1171_v3 = vld [vmem:[%s2466_s0 + $0x44] ss:$8 sm:$0xf0]  }
  0x31   :  { %v483_v59 = vsel %vm4_vm0, %v1157_v52, %v1156_v51  ;;  %1038 = vst.msk [vmem:[%s2467_s1 + $0x28] sm:$0xff] %vm6_vm1, %v49_v1   ;;  %v1039_v5 = vld [vmem:[%s2466_s0 + $0x180] ss:$8 sm:$0xf]   ;;  %v537_v16 = vsel %vm4_vm0, %v1171_v3, %v1170_v2 }
  0x32   :  { %353 = vrot.lane.b32.xlu0 %v352_v7, %s1310_s13  ;;  %v1040_v6 = vld [vmem:[%s2466_s0 + $0x180] ss:$8 sm:$0xf0]   ;;  %v505_v7 = vsel %vm4_vm0, %v1163_v0, %v1162_v63  ;;  %v1167_v11 = vld [vmem:[%s2466_s0 + $0x204] ss:$8 sm:$0xf]  }
  0x33   :  { %v58_v8 = vsel %vm4_vm0, %v1040_v6, %v1039_v5  ;;  %v1027_v9 = vld [vmem:[%s2466_s0 + $0x80] ss:$8 sm:$0xf]   ;;  %v1176_v14 = vld [vmem:[%s2466_s0 + $0x244] ss:$8 sm:$0xf]  }
  0x34   :  { %385 = vrot.lane.b32.xlu1 %v384_v12, %s1311_s5  ;;  %v1028_v10 = vld [vmem:[%s2466_s0 + $0x80] ss:$8 sm:$0xf0]   ;;  %v1168_v12 = vld [vmem:[%s2466_s0 + $0x204] ss:$8 sm:$0xf0]  }
  0x35   :  { %1041 = vst.msk [vmem:[%s2467_s1 + $0x30] sm:$0xff] %vm6_vm1, %v58_v8   ;;  %v1177_v15 = vld [vmem:[%s2466_s0 + $0x244] ss:$8 sm:$0xf0]  }
  0x36   :  { %375 = vrot.lane.b32.xlu0 %v374_v13, %s1311_s5  ;;  %v22_v13 = vsel %vm4_vm0, %v1028_v10, %v1027_v9  ;;  %v1030_v17 = vld [vmem:[%s2466_s0 + $0xc0] ss:$8 sm:$0xf]   ;;  %v1173_v23 = vld [vmem:[%s2466_s0 + $0x144] ss:$8 sm:$0xf]   ;;  %v559_v28 = vsel %vm4_vm0, %v1177_v15, %v1176_v14 }
  0x37   :  { %1029 = vst.msk [vmem:[%s2467_s1 + $0x10] sm:$0xff] %vm6_vm1, %v22_v13   ;;  %v1051_v21 = vld [vmem:[%s2466_s0 + $0x280] ss:$8 sm:$0xf]  }
  0x38   :  { %407 = vrot.lane.b32.xlu1 %v406_v18, %s1311_s5  ;;  %v1031_v18 = vld [vmem:[%s2466_s0 + $0xc0] ss:$8 sm:$0xf0]   ;;  %v1182_v26 = vld [vmem:[%s2466_s0 + $0x184] ss:$8 sm:$0xf]  }
  0x39   :  { %v31_v20 = vsel %vm4_vm0, %v1031_v18, %v1030_v17  ;;  %v1052_v22 = vld [vmem:[%s2466_s0 + $0x280] ss:$8 sm:$0xf0]   ;;  %v1183_v27 = vld [vmem:[%s2466_s0 + $0x184] ss:$8 sm:$0xf0]  }
  0x3a   :  { %396 = vrot.lane.b32.xlu0 %v395_v19, %s1311_s5  ;;  %v526_v19 = vsel %vm4_vm0, %v1168_v12, %v1167_v11  ;;  %1032 = vst.msk [vmem:[%s2467_s1 + $0x18] sm:$0xff] %vm6_vm1, %v31_v20   ;;  %v1054_v29 = vld [vmem:[%s2466_s0 + $0x2c0] ss:$8 sm:$0xf]   ;;  %v581_v38 = vsel %vm4_vm0, %v1183_v27, %v1182_v26 }
  0x3b   :  { %v1055_v30 = vld [vmem:[%s2466_s0 + $0x2c0] ss:$8 sm:$0xf0]   ;;  %v1180_v36 = vld [vmem:[%s2466_s0 + $0x84] ss:$8 sm:$0xf0]  }
  0x3c   :  { %429 = vrot.lane.b32.xlu1 %v428_v24, %s1311_s5  ;;  %v1174_v24 = vld [vmem:[%s2466_s0 + $0x144] ss:$8 sm:$0xf0]   ;;  %v1042_v33 = vld [vmem:[%s2466_s0 + $0x1c0] ss:$8 sm:$0xf]  }
  0x3d   :  { %v548_v31 = vsel %vm4_vm0, %v1174_v24, %v1173_v23  ;;  %v1043_v34 = vld [vmem:[%s2466_s0 + $0x1c0] ss:$8 sm:$0xf0]   ;;  %v1188_v40 = vld [vmem:[%s2466_s0 + $0xc4] ss:$8 sm:$0xf]  }
  0x3e   :  { %418 = vrot.lane.b32.xlu0 %v417_v25, %s1311_s5  ;;  %v94_v25 = vsel %vm4_vm0, %v1052_v22, %v1051_v21  ;;  %v67_v37 = vsel %vm4_vm0, %v1043_v34, %v1042_v33  ;;  %v1189_v41 = vld [vmem:[%s2466_s0 + $0xc4] ss:$8 sm:$0xf0]   ;;  %v1199_v52 = vld [vmem:[%s2466_s0 + $0x103] ss:$8 sm:$0xf]  }
  0x3f   :  { %1053 = vst.msk [vmem:[%s2467_s1 + $0x50] sm:$0xff] %vm6_vm1, %v94_v25   ;;  %1044 = vst.msk [vmem:[%s2467_s1 + $0x38] sm:$0xff] %vm6_vm1, %v67_v37   ;;  %v1185_v42 = vld [vmem:[%s2466_s0 + $0x284] ss:$8 sm:$0xf]  }
  0x40   :  { %451 = vrot.lane.b32.xlu1 %v450_v32, %s1311_s5  ;;  %v103_v32 = vsel %vm4_vm0, %v1055_v30, %v1054_v29  ;;  %v1186_v43 = vld [vmem:[%s2466_s0 + $0x284] ss:$8 sm:$0xf0]   ;;  %v1200_v53 = vld [vmem:[%s2466_s0 + $0x103] ss:$8 sm:$0xf0]  }
  0x41   :  { %1056 = vst.msk [vmem:[%s2467_s1 + $0x58] sm:$0xff] %vm6_vm1, %v103_v32   ;;  %v592_v45 = vsel %vm4_vm0, %v1186_v43, %v1185_v42  ;;  %v1194_v46 = vld [vmem:[%s2466_s0 + $0x2c4] ss:$8 sm:$0xf]  }
  0x42   :  { %440 = vrot.lane.b32.xlu0 %v439_v35, %s1311_s5  ;;  %v1179_v35 = vld [vmem:[%s2466_s0 + $0x84] ss:$8 sm:$0xf]   ;;  %v1197_v54 = vld [vmem:[%s2466_s0 + $0x3] ss:$8 sm:$0xf]  }
  0x43   :  { %v570_v39 = vsel %vm4_vm0, %v1180_v36, %v1179_v35  ;;  %v1191_v48 = vld [vmem:[%s2466_s0 + $0x1c4] ss:$8 sm:$0xf]   ;;  %v1198_v55 = vld [vmem:[%s2466_s0 + $0x3] ss:$8 sm:$0xf0]  }
  0x44   :  { %473 = vrot.lane.b32.xlu1 %v472_v44, %s1311_s5  ;;  %v603_v44 = vsel %vm4_vm0, %v1189_v41, %v1188_v40  ;;  %v1192_v49 = vld [vmem:[%s2466_s0 + $0x1c4] ss:$8 sm:$0xf0]   ;;  %v636_v57 = vsel %vm4_vm0, %v1198_v55, %v1197_v54  ;;  %v1205_v58 = vld [vmem:[%s2466_s0 + $0x43] ss:$8 sm:$0xf]  }
  0x45   :  { %v614_v51 = vsel %vm4_vm0, %v1192_v49, %v1191_v48  ;;  %v1202_v60 = vld [vmem:[%s2466_s0 + $0x203] ss:$8 sm:$0xf]   ;;  %v1234_v25 = vld [vmem:[%s2466_s0 + $0x102] ss:$8 sm:$0xf]  }
  0x46   :  { %462 = vrot.lane.b32.xlu0 %v461_v47, %s1311_s5  ;;  %v1195_v47 = vld [vmem:[%s2466_s0 + $0x2c4] ss:$8 sm:$0xf0]   ;;  %v1203_v61 = vld [vmem:[%s2466_s0 + $0x203] ss:$8 sm:$0xf0]  }
  0x47   :  { %v625_v50 = vsel %vm4_vm0, %v1195_v47, %v1194_v46  ;;  %v657_v63 = vsel %vm4_vm0, %v1203_v61, %v1202_v60  ;;  %v1211_v0 = vld [vmem:[%s2466_s0 + $0x243] ss:$8 sm:$0xf]   ;;  %v1235_v26 = vld [vmem:[%s2466_s0 + $0x102] ss:$8 sm:$0xf0]  }
  0x48   :  { %495 = vrot.lane.b32.xlu1 %v494_v56, %s1311_s5  ;;  %v646_v56 = vsel %vm4_vm0, %v1200_v53, %v1199_v52  ;;  %v1212_v1 = vld [vmem:[%s2466_s0 + $0x243] ss:$8 sm:$0xf0]   ;;  %v1233_v29 = vld [vmem:[%s2466_s0 + $0x2] ss:$8 sm:$0xf0]   ;;  %v777_v30 = vsel %vm4_vm0, %v1235_v26, %v1234_v25 }
  0x49   :  { %v1208_v2 = vld [vmem:[%s2466_s0 + $0x143] ss:$8 sm:$0xf]   ;;  %v1240_v33 = vld [vmem:[%s2466_s0 + $0x42] ss:$8 sm:$0xf]  }
  0x4a   :  { %484 = vrot.lane.b32.xlu0 %v483_v59, %s1311_s5  ;;  %v1206_v59 = vld [vmem:[%s2466_s0 + $0x43] ss:$8 sm:$0xf0]   ;;  %v1241_v34 = vld [vmem:[%s2466_s0 + $0x42] ss:$8 sm:$0xf0]  }
  0x4b   :  { %v668_v62 = vsel %vm4_vm0, %v1206_v59, %v1205_v58  ;;  %v1209_v3 = vld [vmem:[%s2466_s0 + $0x143] ss:$8 sm:$0xf0]   ;;  %v1237_v36 = vld [vmem:[%s2466_s0 + $0x202] ss:$8 sm:$0xf]  }
  0x4c   :  { %516 = vrot.lane.b32.xlu1 %v515_v4, %s1312_s16  ;;  %v690_v4 = vsel %vm4_vm0, %v1212_v1, %v1211_v0  ;;  %v679_v5 = vsel %vm4_vm0, %v1209_v3, %v1208_v2  ;;  %v1217_v6 = vld [vmem:[%s2466_s0 + $0x183] ss:$8 sm:$0xf]   ;;  %v1238_v37 = vld [vmem:[%s2466_s0 + $0x202] ss:$8 sm:$0xf0]  }
  0x4d   :  { %v1214_v8 = vld [vmem:[%s2466_s0 + $0x83] ss:$8 sm:$0xf]   ;;  %v788_v40 = vsel %vm4_vm0, %v1238_v37, %v1237_v36  ;;  %v1246_v41 = vld [vmem:[%s2466_s0 + $0x242] ss:$8 sm:$0xf]  }
  0x4e   :  { %506 = vrot.lane.b32.xlu0 %v505_v7, %s1312_s16  ;;  %v1218_v7 = vld [vmem:[%s2466_s0 + $0x183] ss:$8 sm:$0xf0]   ;;  %v1247_v42 = vld [vmem:[%s2466_s0 + $0x242] ss:$8 sm:$0xf0]  }
  0x4f   :  { %v1215_v9 = vld [vmem:[%s2466_s0 + $0x83] ss:$8 sm:$0xf0]   ;;  %v712_v10 = vsel %vm4_vm0, %v1218_v7, %v1217_v6  ;;  %v821_v46 = vsel %vm4_vm0, %v1247_v42, %v1246_v41  ;;  %v1252_v49 = vld [vmem:[%s2466_s0 + $0x182] ss:$8 sm:$0xf]  }
  0x50   :  { %538 = vrot.lane.b32.xlu1 %v537_v16, %s1312_s16  ;;  %v701_v11 = vsel %vm4_vm0, %v1215_v9, %v1214_v8  ;;  %v1223_v12 = vld [vmem:[%s2466_s0 + $0xc3] ss:$8 sm:$0xf]   ;;  %v1249_v52 = vld [vmem:[%s2466_s0 + $0x82] ss:$8 sm:$0xf]  }
  0x51   :  { %v1224_v13 = vld [vmem:[%s2466_s0 + $0xc3] ss:$8 sm:$0xf0]   ;;  %v1250_v53 = vld [vmem:[%s2466_s0 + $0x82] ss:$8 sm:$0xf0]  }
  0x52   :  { %527 = vrot.lane.b32.xlu0 %v526_v19, %s1312_s16  ;;  %v1220_v14 = vld [vmem:[%s2466_s0 + $0x283] ss:$8 sm:$0xf]   ;;  %v734_v16 = vsel %vm4_vm0, %v1224_v13, %v1223_v12  ;;  %v1259_v58 = vld [vmem:[%s2466_s0 + $0xc2] ss:$8 sm:$0xf0]  }
  0x53   :  { %v1221_v15 = vld [vmem:[%s2466_s0 + $0x283] ss:$8 sm:$0xf0]   ;;  %v1255_v60 = vld [vmem:[%s2466_s0 + $0x282] ss:$8 sm:$0xf]  }
  0x54   :  { %560 = vrot.lane.b32.xlu1 %v559_v28, %s1312_s16  ;;  %v723_v17 = vsel %vm4_vm0, %v1221_v15, %v1220_v14  ;;  %v1229_v18 = vld [vmem:[%s2466_s0 + $0x2c3] ss:$8 sm:$0xf]   ;;  %v1232_v28 = vld [vmem:[%s2466_s0 + $0x2] ss:$8 sm:$0xf]  }
  0x55   :  { %v1230_v19 = vld [vmem:[%s2466_s0 + $0x2c3] ss:$8 sm:$0xf0]   ;;  %v767_v32 = vsel %vm4_vm0, %v1233_v29, %v1232_v28  ;;  %v1256_v61 = vld [vmem:[%s2466_s0 + $0x282] ss:$8 sm:$0xf0]  }
  0x56   :  { %549 = vrot.lane.b32.xlu0 %v548_v31, %s1312_s16  ;;  %v1226_v20 = vld [vmem:[%s2466_s0 + $0x1c3] ss:$8 sm:$0xf]   ;;  %v756_v22 = vsel %vm4_vm0, %v1230_v19, %v1229_v18  ;;  %v854_v0 = vsel %vm4_vm0, %v1256_v61, %v1255_v60  ;;  %v1264_v1 = vld [vmem:[%s2466_s0 + $0x2c2] ss:$8 sm:$0xf]  }
  0x57   :  { %v1227_v21 = vld [vmem:[%s2466_s0 + $0x1c3] ss:$8 sm:$0xf0]   ;;  %v1265_v2 = vld [vmem:[%s2466_s0 + $0x2c2] ss:$8 sm:$0xf0]  }
  0x58   :  { %582 = vrot.lane.b32.xlu1 %v581_v38, %s1312_s16  ;;  %v745_v24 = vsel %vm4_vm0, %v1227_v21, %v1226_v20  ;;  %v799_v38 = vsel %vm4_vm0, %v1241_v34, %v1240_v33  ;;  %v887_v6 = vsel %vm4_vm0, %v1265_v2, %v1264_v1  ;;  %v1269_v9 = vld [vmem:[%s2466_s0 + $0x101] ss:$8 sm:$0xf]  }
  0x59   :  { %v1267_v12 = vld [vmem:[%s2466_s0 + $0x1] ss:$8 sm:$0xf]  }
  0x5a   :  { %571 = vrot.lane.b32.xlu0 %v570_v39, %s1312_s16  ;;  %v1268_v13 = vld [vmem:[%s2466_s0 + $0x1] ss:$8 sm:$0xf0]  }
  0x5b   :  { %v1276_v18 = vld [vmem:[%s2466_s0 + $0x41] ss:$8 sm:$0xf0]  }
  0x5c   :  { %604 = vrot.lane.b32.xlu1 %v603_v44, %s1312_s16  ;;  %v1243_v44 = vld [vmem:[%s2466_s0 + $0x142] ss:$8 sm:$0xf]   ;;  %v1272_v20 = vld [vmem:[%s2466_s0 + $0x201] ss:$8 sm:$0xf]  }
  0x5d   :  { %v1273_v21 = vld [vmem:[%s2466_s0 + $0x201] ss:$8 sm:$0xf0]  }
  0x5e   :  { %593 = vrot.lane.b32.xlu0 %v592_v45, %s1312_s16  ;;  %v1244_v45 = vld [vmem:[%s2466_s0 + $0x142] ss:$8 sm:$0xf0]   ;;  %v1281_v25 = vld [vmem:[%s2466_s0 + $0x241] ss:$8 sm:$0xf]  }
  0x5f   :  { %v810_v48 = vsel %vm4_vm0, %v1244_v45, %v1243_v44  ;;  %v1282_v26 = vld [vmem:[%s2466_s0 + $0x241] ss:$8 sm:$0xf0]  }
  0x60   :  { %626 = vrot.lane.b32.xlu1 %v625_v50, %s1312_s16  ;;  %v1253_v50 = vld [vmem:[%s2466_s0 + $0x182] ss:$8 sm:$0xf0]   ;;  %v1278_v28 = vld [vmem:[%s2466_s0 + $0x141] ss:$8 sm:$0xf]  }
  0x61   :  { %v843_v54 = vsel %vm4_vm0, %v1253_v50, %v1252_v49  ;;  %v1279_v29 = vld [vmem:[%s2466_s0 + $0x141] ss:$8 sm:$0xf0]  }
  0x62   :  { %615 = vrot.lane.b32.xlu0 %v614_v51, %s1312_s16  ;;  %v1287_v33 = vld [vmem:[%s2466_s0 + $0x181] ss:$8 sm:$0xf]  }
  0x63   :  { %v1288_v34 = vld [vmem:[%s2466_s0 + $0x181] ss:$8 sm:$0xf0]  }
  0x64   :  { %647 = vrot.lane.b32.xlu1 %v646_v56, %s1313_s3  ;;  %v832_v56 = vsel %vm4_vm0, %v1250_v53, %v1249_v52  ;;  %v1284_v36 = vld [vmem:[%s2466_s0 + $0x81] ss:$8 sm:$0xf]  }
  0x65   :  { %v1285_v37 = vld [vmem:[%s2466_s0 + $0x81] ss:$8 sm:$0xf0]  }
  0x66   :  { %637 = vrot.lane.b32.xlu0 %v636_v57, %s1313_s3  ;;  %v1258_v57 = vld [vmem:[%s2466_s0 + $0xc2] ss:$8 sm:$0xf]   ;;  %v1293_v41 = vld [vmem:[%s2466_s0 + $0xc1] ss:$8 sm:$0xf]  }
  0x67   :  { %v1294_v42 = vld [vmem:[%s2466_s0 + $0xc1] ss:$8 sm:$0xf0]  }
  0x68   :  { %669 = vrot.lane.b32.xlu1 %v668_v62, %s1313_s3  ;;  %v865_v62 = vsel %vm4_vm0, %v1259_v58, %v1258_v57  ;;  %v1290_v44 = vld [vmem:[%s2466_s0 + $0x281] ss:$8 sm:$0xf]  }
  0x69   :  { %v1291_v45 = vld [vmem:[%s2466_s0 + $0x281] ss:$8 sm:$0xf0]  }
  0x6a   :  { %658 = vrot.lane.b32.xlu0 %v657_v63, %s1313_s3  ;;  %v1299_v49 = vld [vmem:[%s2466_s0 + $0x2c1] ss:$8 sm:$0xf]  }
  0x6b   :  { %v1300_v50 = vld [vmem:[%s2466_s0 + $0x2c1] ss:$8 sm:$0xf0]  }
  0x6c   :  { %691 = vrot.lane.b32.xlu1 %v690_v4, %s1313_s3  ;;  %v1261_v4 = vld [vmem:[%s2466_s0 + $0x1c2] ss:$8 sm:$0xf]   ;;  %v1296_v52 = vld [vmem:[%s2466_s0 + $0x1c1] ss:$8 sm:$0xf]  }
  0x6d   :  { %v1297_v53 = vld [vmem:[%s2466_s0 + $0x1c1] ss:$8 sm:$0xf0]  }
  0x6e   :  { %680 = vrot.lane.b32.xlu0 %v679_v5, %s1313_s3  ;;  %v1262_v5 = vld [vmem:[%s2466_s0 + $0x1c2] ss:$8 sm:$0xf0]  }
  0x6f   :  { %v876_v8 = vsel %vm4_vm0, %v1262_v5, %v1261_v4 }
  0x70   :  { %713 = vrot.lane.b32.xlu1 %v712_v10, %s1313_s3  ;;  %v1270_v10 = vld [vmem:[%s2466_s0 + $0x101] ss:$8 sm:$0xf0]  }
  0x71   :  { %v908_v14 = vsel %vm4_vm0, %v1270_v10, %v1269_v9 }
  0x72   :  { %702 = vrot.lane.b32.xlu0 %v701_v11, %s1313_s3 }
  0x74   :  { %735 = vrot.lane.b32.xlu1 %v734_v16, %s1313_s3  ;;  %v898_v16 = vsel %vm4_vm0, %v1268_v13, %v1267_v12 }
  0x76   :  { %724 = vrot.lane.b32.xlu0 %v723_v17, %s1313_s3  ;;  %v135_v23 = vpop.permute.xlu1 %134   ;;  %v1275_v17 = vld [vmem:[%s2466_s0 + $0x41] ss:$8 sm:$0xf]  }
  0x77   :  { %1064 = vst.msk [vmem:[%s2467_s1 + $0x40] sm:$0xff] %vm115_vm2, %v135_v23  }
  0x78   :  { %v114_v27 = vpop.permute.xlu0 %113   ;;  %757 = vrot.lane.b32.xlu1 %v756_v22, %s1313_s3  ;;  %v930_v22 = vsel %vm4_vm0, %v1276_v18, %v1275_v17 }
  0x79   :  { %116 = vst.msk [vmem:[%s2467_s1] sm:$0xff] %vm115_vm2, %v114_v27  }
  0x7a   :  { %746 = vrot.lane.b32.xlu0 %v745_v24, %s1313_s3  ;;  %v146_v31 = vpop.permute.xlu1 %145   ;;  %v919_v24 = vsel %vm4_vm0, %v1273_v21, %v1272_v20 }
  0x7b   :  { %1067 = vst.msk [vmem:[%s2467_s1 + $0x8] sm:$0xff] %vm115_vm2, %v146_v31  }
  0x7c   :  { %v124_v35 = vpop.permute.xlu0 %123   ;;  %778 = vrot.lane.b32.xlu1 %v777_v30, %s1314_s2  ;;  %v952_v30 = vsel %vm4_vm0, %v1282_v26, %v1281_v25 }
  0x7d   :  { %1061 = vst.msk [vmem:[%s2467_s1 + $0x20] sm:$0xff] %vm115_vm2, %v124_v35  }
  0x7e   :  { %768 = vrot.lane.b32.xlu0 %v767_v32, %s1314_s2  ;;  %v168_v39 = vpop.permute.xlu1 %167   ;;  %v941_v32 = vsel %vm4_vm0, %v1279_v29, %v1278_v28 }
  0x7f   :  { %1073 = vst.msk [vmem:[%s2467_s1 + $0x48] sm:$0xff] %vm115_vm2, %v168_v39  }
  0x80   :  { %v157_v43 = vpop.permute.xlu0 %156   ;;  %800 = vrot.lane.b32.xlu1 %v799_v38, %s1314_s2  ;;  %v974_v38 = vsel %vm4_vm0, %v1288_v34, %v1287_v33 }
  0x81   :  { %1070 = vst.msk [vmem:[%s2467_s1 + $0x28] sm:$0xff] %vm115_vm2, %v157_v43  }
  0x82   :  { %789 = vrot.lane.b32.xlu0 %v788_v40, %s1314_s2  ;;  %v190_v47 = vpop.permute.xlu1 %189   ;;  %v963_v40 = vsel %vm4_vm0, %v1285_v37, %v1284_v36 }
  0x83   :  { %1079 = vst.msk [vmem:[%s2467_s1 + $0x30] sm:$0xff] %vm115_vm2, %v190_v47  }
  0x84   :  { %v179_v51 = vpop.permute.xlu0 %178   ;;  %822 = vrot.lane.b32.xlu1 %v821_v46, %s1314_s2  ;;  %v996_v46 = vsel %vm4_vm0, %v1294_v42, %v1293_v41 }
  0x85   :  { %1076 = vst.msk [vmem:[%s2467_s1 + $0x10] sm:$0xff] %vm115_vm2, %v179_v51  }
  0x86   :  { %811 = vrot.lane.b32.xlu0 %v810_v48, %s1314_s2  ;;  %v212_v55 = vpop.permute.xlu1 %211   ;;  %v985_v48 = vsel %vm4_vm0, %v1291_v45, %v1290_v44 }
  0x87   :  { %1085 = vst.msk [vmem:[%s2467_s1 + $0x18] sm:$0xff] %vm115_vm2, %v212_v55  }
  0x88   :  { %v201_v59 = vpop.permute.xlu0 %200   ;;  %844 = vrot.lane.b32.xlu1 %v843_v54, %s1314_s2  ;;  %v1018_v54 = vsel %vm4_vm0, %v1300_v50, %v1299_v49 }
  0x89   :  { %1082 = vst.msk [vmem:[%s2467_s1 + $0x50] sm:$0xff] %vm115_vm2, %v201_v59  }
  0x8a   :  { %833 = vrot.lane.b32.xlu0 %v832_v56, %s1314_s2  ;;  %v234_v63 = vpop.permute.xlu1 %233   ;;  %v1007_v56 = vsel %vm4_vm0, %v1297_v53, %v1296_v52 }
  0x8b   :  { %1091 = vst.msk [vmem:[%s2467_s1 + $0x58] sm:$0xff] %vm115_vm2, %v234_v63  }
  0x8c   :  { %v223_v3 = vpop.permute.xlu0 %222   ;;  %866 = vrot.lane.b32.xlu1 %v865_v62, %s1314_s2 }
  0x8d   :  { %1088 = vst.msk [vmem:[%s2467_s1 + $0x38] sm:$0xff] %vm115_vm2, %v223_v3  }
  0x8e   :  { %855 = vrot.lane.b32.xlu0 %v854_v0, %s1314_s2  ;;  %v255_v7 = vpop.permute.xlu1 %254  }
  0x8f   :  { %1096 = vst.msk [vmem:[%s2467_s1 + $0x20] sm:$0xff] %vm246_vm3, %v255_v7  }
  0x90   :  { %v245_v11 = vpop.permute.xlu0 %244   ;;  %888 = vrot.lane.b32.xlu1 %v887_v6, %s1314_s2 }
  0x91   :  { %247 = vst.msk [vmem:[%s2467_s1] sm:$0xff] %vm246_vm3, %v245_v11  }
  0x92   :  { %877 = vrot.lane.b32.xlu0 %v876_v8, %s1314_s2  ;;  %v277_v15 = vpop.permute.xlu1 %276  }
  0x93   :  { %1102 = vst.msk [vmem:[%s2467_s1 + $0x8] sm:$0xff] %vm246_vm3, %v277_v15  }
  0x94   :  { %v266_v19 = vpop.permute.xlu0 %265   ;;  %909 = vrot.lane.b32.xlu1 %v908_v14, %s1315_s22 }
  0x95   :  { %1099 = vst.msk [vmem:[%s2467_s1 + $0x40] sm:$0xff] %vm246_vm3, %v266_v19  }
  0x96   :  { %899 = vrot.lane.b32.xlu0 %v898_v16, %s1315_s22  ;;  %v299_v23 = vpop.permute.xlu1 %298  }
  0x97   :  { %1108 = vst.msk [vmem:[%s2467_s1 + $0x48] sm:$0xff] %vm246_vm3, %v299_v23  }
  0x98   :  { %v288_v27 = vpop.permute.xlu0 %287   ;;  %931 = vrot.lane.b32.xlu1 %v930_v22, %s1315_s22 }
  0x99   :  { %1105 = vst.msk [vmem:[%s2467_s1 + $0x28] sm:$0xff] %vm246_vm3, %v288_v27  }
  0x9a   :  { %920 = vrot.lane.b32.xlu0 %v919_v24, %s1315_s22  ;;  %v321_v31 = vpop.permute.xlu1 %320  }
  0x9b   :  { %1114 = vst.msk [vmem:[%s2467_s1 + $0x30] sm:$0xff] %vm246_vm3, %v321_v31  }
  0x9c   :  { %v310_v35 = vpop.permute.xlu0 %309   ;;  %953 = vrot.lane.b32.xlu1 %v952_v30, %s1315_s22 }
  0x9d   :  { %1111 = vst.msk [vmem:[%s2467_s1 + $0x10] sm:$0xff] %vm246_vm3, %v310_v35  }
  0x9e   :  { %942 = vrot.lane.b32.xlu0 %v941_v32, %s1315_s22  ;;  %v343_v39 = vpop.permute.xlu1 %342  }
  0x9f   :  { %1120 = vst.msk [vmem:[%s2467_s1 + $0x18] sm:$0xff] %vm246_vm3, %v343_v39  }
  0xa0   :  { %v332_v43 = vpop.permute.xlu0 %331   ;;  %975 = vrot.lane.b32.xlu1 %v974_v38, %s1315_s22 }
  0xa1   :  { %1117 = vst.msk [vmem:[%s2467_s1 + $0x50] sm:$0xff] %vm246_vm3, %v332_v43  }
  0xa2   :  { %964 = vrot.lane.b32.xlu0 %v963_v40, %s1315_s22  ;;  %v365_v47 = vpop.permute.xlu1 %364  }
  0xa3   :  { %1126 = vst.msk [vmem:[%s2467_s1 + $0x58] sm:$0xff] %vm246_vm3, %v365_v47  }
  0xa4   :  { %v354_v51 = vpop.permute.xlu0 %353   ;;  %997 = vrot.lane.b32.xlu1 %v996_v46, %s1315_s22 }
  0xa5   :  { %1123 = vst.msk [vmem:[%s2467_s1 + $0x38] sm:$0xff] %vm246_vm3, %v354_v51  }
  0xa6   :  { %986 = vrot.lane.b32.xlu0 %v985_v48, %s1315_s22  ;;  %v386_v55 = vpop.permute.xlu1 %385  }
  0xa7   :  { %1131 = vst.msk [vmem:[%s2467_s1 + $0x20] sm:$0xff] %vm377_vm4, %v386_v55  }
  0xa8   :  { %v376_v57 = vpop.permute.xlu0 %375   ;;  %1019 = vrot.lane.b32.xlu1 %v1018_v54, %s1315_s22 }
  0xa9   :  { %378 = vst.msk [vmem:[%s2467_s1] sm:$0xff] %vm377_vm4, %v376_v57  }
  0xaa   :  { %1008 = vrot.lane.b32.xlu0 %v1007_v56, %s1315_s22  ;;  %v408_v58 = vpop.permute.xlu1 %407  }
  0xab   :  { %1137 = vst.msk [vmem:[%s2467_s1 + $0x8] sm:$0xff] %vm377_vm4, %v408_v58  }
  0xac   :  { %v397_v59 = vpop.permute.xlu0 %396  }
  0xad   :  { %1134 = vst.msk [vmem:[%s2467_s1 + $0x40] sm:$0xff] %vm377_vm4, %v397_v59  }
  0xae   :  { %v430_v60 = vpop.permute.xlu1 %429  }
  0xaf   :  { %1143 = vst.msk [vmem:[%s2467_s1 + $0x48] sm:$0xff] %vm377_vm4, %v430_v60  }
  0xb0   :  { %v419_v61 = vpop.permute.xlu0 %418  }
  0xb1   :  { %1140 = vst.msk [vmem:[%s2467_s1 + $0x28] sm:$0xff] %vm377_vm4, %v419_v61  }
  0xb2   :  { %v452_v62 = vpop.permute.xlu1 %451  }
  0xb3   :  { %1149 = vst.msk [vmem:[%s2467_s1 + $0x30] sm:$0xff] %vm377_vm4, %v452_v62  }
  0xb4   :  { %v441_v63 = vpop.permute.xlu0 %440  }
  0xb5   :  { %1146 = vst.msk [vmem:[%s2467_s1 + $0x10] sm:$0xff] %vm377_vm4, %v441_v63  }
  0xb6   :  { %v474_v0 = vpop.permute.xlu1 %473  }
  0xb7   :  { %1155 = vst.msk [vmem:[%s2467_s1 + $0x18] sm:$0xff] %vm377_vm4, %v474_v0  }
  0xb8   :  { %v463_v1 = vpop.permute.xlu0 %462  }
  0xb9   :  { %1152 = vst.msk [vmem:[%s2467_s1 + $0x50] sm:$0xff] %vm377_vm4, %v463_v1  }
  0xba   :  { %v496_v2 = vpop.permute.xlu1 %495  }
  0xbb   :  { %1161 = vst.msk [vmem:[%s2467_s1 + $0x58] sm:$0xff] %vm377_vm4, %v496_v2  }
  0xbc   :  { %v485_v3 = vpop.permute.xlu0 %484  }
  0xbd   :  { %1158 = vst.msk [vmem:[%s2467_s1 + $0x38] sm:$0xff] %vm377_vm4, %v485_v3  }
  0xbe   :  { %v517_v4 = vpop.permute.xlu1 %516  }
  0xbf   :  { %1166 = vst.msk [vmem:[%s2467_s1 + $0x20] sm:$0xff] %vm508_vm5, %v517_v4  }
  0xc0   :  { %v507_v5 = vpop.permute.xlu0 %506  }
  0xc1   :  { %509 = vst.msk [vmem:[%s2467_s1] sm:$0xff] %vm508_vm5, %v507_v5  }
  0xc2   :  { %v539_v6 = vpop.permute.xlu1 %538  }
  0xc3   :  { %1172 = vst.msk [vmem:[%s2467_s1 + $0x8] sm:$0xff] %vm508_vm5, %v539_v6  }
  0xc4   :  { %v528_v7 = vpop.permute.xlu0 %527  }
  0xc5   :  { %1169 = vst.msk [vmem:[%s2467_s1 + $0x40] sm:$0xff] %vm508_vm5, %v528_v7  }
  0xc6   :  { %v561_v8 = vpop.permute.xlu1 %560  }
  0xc7   :  { %1178 = vst.msk [vmem:[%s2467_s1 + $0x48] sm:$0xff] %vm508_vm5, %v561_v8  }
  0xc8   :  { %v550_v9 = vpop.permute.xlu0 %549  }
  0xc9   :  { %1175 = vst.msk [vmem:[%s2467_s1 + $0x28] sm:$0xff] %vm508_vm5, %v550_v9  }
  0xca   :  { %v583_v10 = vpop.permute.xlu1 %582  }
  0xcb   :  { %1184 = vst.msk [vmem:[%s2467_s1 + $0x30] sm:$0xff] %vm508_vm5, %v583_v10  }
  0xcc   :  { %v572_v11 = vpop.permute.xlu0 %571  }
  0xcd   :  { %1181 = vst.msk [vmem:[%s2467_s1 + $0x10] sm:$0xff] %vm508_vm5, %v572_v11  }
  0xce   :  { %v605_v12 = vpop.permute.xlu1 %604  }
  0xcf   :  { %1190 = vst.msk [vmem:[%s2467_s1 + $0x18] sm:$0xff] %vm508_vm5, %v605_v12  }
  0xd0   :  { %v594_v13 = vpop.permute.xlu0 %593  }
  0xd1   :  { %1187 = vst.msk [vmem:[%s2467_s1 + $0x50] sm:$0xff] %vm508_vm5, %v594_v13  }
  0xd2   :  { %v627_v14 = vpop.permute.xlu1 %626  }
  0xd3   :  { %1196 = vst.msk [vmem:[%s2467_s1 + $0x58] sm:$0xff] %vm508_vm5, %v627_v14  }
  0xd4   :  { %v616_v15 = vpop.permute.xlu0 %615  }
  0xd5   :  { %1193 = vst.msk [vmem:[%s2467_s1 + $0x38] sm:$0xff] %vm508_vm5, %v616_v15  }
  0xd6   :  { %v648_v16 = vpop.permute.xlu1 %647  }
  0xd7   :  { %1201 = vst.msk [vmem:[%s2467_s1 + $0x20] sm:$0xff] %vm639_vm6, %v648_v16  }
  0xd8   :  { %v638_v17 = vpop.permute.xlu0 %637  }
  0xd9   :  { %640 = vst.msk [vmem:[%s2467_s1] sm:$0xff] %vm639_vm6, %v638_v17  }
  0xda   :  { %v670_v18 = vpop.permute.xlu1 %669  }
  0xdb   :  { %1207 = vst.msk [vmem:[%s2467_s1 + $0x8] sm:$0xff] %vm639_vm6, %v670_v18  }
  0xdc   :  { %v659_v19 = vpop.permute.xlu0 %658  }
  0xdd   :  { %1204 = vst.msk [vmem:[%s2467_s1 + $0x40] sm:$0xff] %vm639_vm6, %v659_v19  }
  0xde   :  { %v692_v20 = vpop.permute.xlu1 %691  }
  0xdf   :  { %1213 = vst.msk [vmem:[%s2467_s1 + $0x48] sm:$0xff] %vm639_vm6, %v692_v20  }
  0xe0   :  { %v681_v21 = vpop.permute.xlu0 %680  }
  0xe1   :  { %1210 = vst.msk [vmem:[%s2467_s1 + $0x28] sm:$0xff] %vm639_vm6, %v681_v21  }
  0xe2   :  { %v714_v22 = vpop.permute.xlu1 %713  }
  0xe3   :  { %1219 = vst.msk [vmem:[%s2467_s1 + $0x30] sm:$0xff] %vm639_vm6, %v714_v22  }
  0xe4   :  { %v703_v23 = vpop.permute.xlu0 %702  }
  0xe5   :  { %1216 = vst.msk [vmem:[%s2467_s1 + $0x10] sm:$0xff] %vm639_vm6, %v703_v23  }
  0xe6   :  { %v736_v24 = vpop.permute.xlu1 %735  }
  0xe7   :  { %1225 = vst.msk [vmem:[%s2467_s1 + $0x18] sm:$0xff] %vm639_vm6, %v736_v24  }
  0xe8   :  { %v725_v25 = vpop.permute.xlu0 %724  }
  0xe9   :  { %1222 = vst.msk [vmem:[%s2467_s1 + $0x50] sm:$0xff] %vm639_vm6, %v725_v25  }
  0xea   :  { %v758_v26 = vpop.permute.xlu1 %757  }
  0xeb   :  { %1231 = vst.msk [vmem:[%s2467_s1 + $0x58] sm:$0xff] %vm639_vm6, %v758_v26  }
  0xec   :  { %v747_v27 = vpop.permute.xlu0 %746  }
  0xed   :  { %1228 = vst.msk [vmem:[%s2467_s1 + $0x38] sm:$0xff] %vm639_vm6, %v747_v27  }
  0xee   :  { %v779_v28 = vpop.permute.xlu1 %778  }
  0xef   :  { %1236 = vst.msk [vmem:[%s2467_s1 + $0x20] sm:$0xff] %vm770_vm7, %v779_v28  }
  0xf0   :  { %v769_v29 = vpop.permute.xlu0 %768  }
  0xf1   :  { %771 = vst.msk [vmem:[%s2467_s1] sm:$0xff] %vm770_vm7, %v769_v29  }
  0xf2   :  { %v801_v30 = vpop.permute.xlu1 %800  }
  0xf3   :  { %1242 = vst.msk [vmem:[%s2467_s1 + $0x8] sm:$0xff] %vm770_vm7, %v801_v30  }
  0xf4   :  { %v790_v31 = vpop.permute.xlu0 %789  }
  0xf5   :  { %1239 = vst.msk [vmem:[%s2467_s1 + $0x40] sm:$0xff] %vm770_vm7, %v790_v31  }
  0xf6   :  { %v823_v32 = vpop.permute.xlu1 %822  }
  0xf7   :  { %1248 = vst.msk [vmem:[%s2467_s1 + $0x48] sm:$0xff] %vm770_vm7, %v823_v32  }
  0xf8   :  { %v812_v33 = vpop.permute.xlu0 %811  }
  0xf9   :  { %1245 = vst.msk [vmem:[%s2467_s1 + $0x28] sm:$0xff] %vm770_vm7, %v812_v33  }
  0xfa   :  { %v845_v34 = vpop.permute.xlu1 %844  }
  0xfb   :  { %1254 = vst.msk [vmem:[%s2467_s1 + $0x30] sm:$0xff] %vm770_vm7, %v845_v34  }
  0xfc   :  { %v834_v35 = vpop.permute.xlu0 %833  }
  0xfd   :  { %1251 = vst.msk [vmem:[%s2467_s1 + $0x10] sm:$0xff] %vm770_vm7, %v834_v35  }
  0xfe   :  { %v867_v36 = vpop.permute.xlu1 %866  }
  0xff   :  { %1260 = vst.msk [vmem:[%s2467_s1 + $0x18] sm:$0xff] %vm770_vm7, %v867_v36  }
 0x100   :  { %v856_v37 = vpop.permute.xlu0 %855  }
 0x101   :  { %1257 = vst.msk [vmem:[%s2467_s1 + $0x50] sm:$0xff] %vm770_vm7, %v856_v37  }
 0x102   :  { %v889_v38 = vpop.permute.xlu1 %888  }
 0x103   :  { %1266 = vst.msk [vmem:[%s2467_s1 + $0x58] sm:$0xff] %vm770_vm7, %v889_v38  }
 0x104   :  { %v878_v39 = vpop.permute.xlu0 %877  }
 0x105   :  { %1263 = vst.msk [vmem:[%s2467_s1 + $0x38] sm:$0xff] %vm770_vm7, %v878_v39  }
 0x106   :  { %v910_v40 = vpop.permute.xlu1 %909  }
 0x107   :  { %1271 = vst.msk [vmem:[%s2467_s1 + $0x20] sm:$0xff] %vm901_vm8, %v910_v40  }
 0x108   :  { %v900_v41 = vpop.permute.xlu0 %899  }
 0x109   :  { %902 = vst.msk [vmem:[%s2467_s1] sm:$0xff] %vm901_vm8, %v900_v41  }
 0x10a   :  { %v932_v42 = vpop.permute.xlu1 %931  }
 0x10b   :  { %1277 = vst.msk [vmem:[%s2467_s1 + $0x8] sm:$0xff] %vm901_vm8, %v932_v42  }
 0x10c   :  { %v921_v43 = vpop.permute.xlu0 %920  }
 0x10d   :  { %1274 = vst.msk [vmem:[%s2467_s1 + $0x40] sm:$0xff] %vm901_vm8, %v921_v43  }
 0x10e   :  { %v954_v44 = vpop.permute.xlu1 %953  }
 0x10f   :  { %1283 = vst.msk [vmem:[%s2467_s1 + $0x48] sm:$0xff] %vm901_vm8, %v954_v44  }
 0x110   :  { %v943_v45 = vpop.permute.xlu0 %942  }
 0x111   :  { %1280 = vst.msk [vmem:[%s2467_s1 + $0x28] sm:$0xff] %vm901_vm8, %v943_v45  }
 0x112   :  { %v976_v46 = vpop.permute.xlu1 %975  }
 0x113   :  { %1289 = vst.msk [vmem:[%s2467_s1 + $0x30] sm:$0xff] %vm901_vm8, %v976_v46  }
 0x114   :  { %v965_v47 = vpop.permute.xlu0 %964  }
 0x115   :  { %1286 = vst.msk [vmem:[%s2467_s1 + $0x10] sm:$0xff] %vm901_vm8, %v965_v47  }
 0x116   :  { %v998_v48 = vpop.permute.xlu1 %997  }
 0x117   :  { %1295 = vst.msk [vmem:[%s2467_s1 + $0x18] sm:$0xff] %vm901_vm8, %v998_v48  }
 0x118   :  { %v987_v49 = vpop.permute.xlu0 %986  }
 0x119   :  { %1292 = vst.msk [vmem:[%s2467_s1 + $0x50] sm:$0xff] %vm901_vm8, %v987_v49  }
 0x11a   :  { %v1020_v50 = vpop.permute.xlu1 %1019  }
 0x11b   :  { %1301 = vst.msk [vmem:[%s2467_s1 + $0x58] sm:$0xff] %vm901_vm8, %v1020_v50  }
 0x11c   :  { %v1009_v51 = vpop.permute.xlu0 %1008  }
 0x11d   :  { %1298 = vst.msk [vmem:[%s2467_s1 + $0x38] sm:$0xff] %vm901_vm8, %v1009_v51  }

</bundles_post_ra>
